<compile_context>
chip_gen: v7x
topology: tpu7x:2x2x1
jax: 0.10.0
libtpu: 0.0.40
codegen_flags: <defaults>
</compile_context>

<pallas_src>
import numpy as np

import jax
import jax.numpy as jnp
from jax.experimental import pallas as pl
from jax.experimental.pallas import tpu as pltpu

EPS = 1e-5
EXPANSION = 4


def _round_up(x, m):
    return ((x + m - 1) // m) * m


def _vmem_limit(block_bytes):
    # double-buffered blocks + headroom; stay well under v7x's 64 MiB physical VMEM.
    return int(min(48 << 20, max(32 << 20, 2 * block_bytes + (4 << 20))))


# ----------------------------------------------------------------------------
# Kernel 1: fused (sum of matmuls) + folded-BN offset (+ residual) (+ ReLU)
# ----------------------------------------------------------------------------
def _fused_matmul_bn(terms, offset, residual=None, relu=True,
                     out_dtype=jnp.bfloat16, tm=512, tc=512):
    """Computes act( sum_i x_i @ w_i + offset [+ residual] ) with one Pallas kernel.

    terms:    list of (x (M, K_i), w (K_i, C)).  Cast to bf16, accumulated in f32.
    offset:   (C,) f32 folded-BN offset (scale already folded into w).
    residual: optional (M, C) tensor added before the activation.
    """
    M = terms[0][0].shape[0]
    C = terms[0][1].shape[1]
    n_terms = len(terms)
    has_res = residual is not None

    # Row tiling: never fall back to tm = M for large M; pad M up instead.
    tm = min(tm, _round_up(M, 8))
    Mp = _round_up(M, tm)
    # Output-channel tiling (second parallel grid axis; feeds both v7x TensorCores).
    tc = tc if (C > tc and C % tc == 0) else C

    xs, ws = [], []
    for x, w in terms:
        x = x.astype(jnp.bfloat16)
        if Mp != M:
            x = jnp.pad(x, ((0, Mp - M), (0, 0)))
        xs.append(x)
        ws.append(w.astype(jnp.bfloat16))
    off2d = offset.reshape(1, C).astype(jnp.float32)
    if has_res:
        res = residual
        if Mp != M:
            res = jnp.pad(res, ((0, Mp - M), (0, 0)))

    def kernel(*refs):
        x_refs = refs[:n_terms]
        w_refs = refs[n_terms:2 * n_terms]
        b_ref = refs[2 * n_terms]
        r_ref = refs[2 * n_terms + 1] if has_res else None
        o_ref = refs[-1]

        acc = None
        for xr, wr in zip(x_refs, w_refs):
            y = jnp.dot(xr[...], wr[...], preferred_element_type=jnp.float32)
            acc = y if acc is None else acc + y
        acc = acc + b_ref[...]
        if has_res:
            acc = acc + r_ref[...].astype(jnp.float32)
        if relu:
            acc = jnp.maximum(acc, 0.0)
        o_ref[...] = acc.astype(o_ref.dtype)

    in_specs = [pl.BlockSpec((tm, x.shape[1]), lambda i, j: (i, 0)) for x in xs]
    in_specs += [pl.BlockSpec((w.shape[0], tc), lambda i, j: (0, j)) for w in ws]
    in_specs += [pl.BlockSpec((1, tc), lambda i, j: (0, j))]
    args = xs + ws + [off2d]
    if has_res:
        in_specs.append(pl.BlockSpec((tm, tc), lambda i, j: (i, j)))
        args.append(res)

    # VMEM budget from actual block sizes (inputs + weights + bias + residual + out + acc).
    bb = sum(tm * x.shape[1] * 2 for x in xs)
    bb += sum(w.shape[0] * tc * 2 for w in ws)
    bb += tc * 4
    if has_res:
        bb += tm * tc * int(res.dtype.itemsize)
    bb += tm * tc * int(np.dtype(out_dtype).itemsize)
    bb += tm * tc * 4  # f32 accumulator value

    out = pl.pallas_call(
        kernel,
        out_shape=jax.ShapeDtypeStruct((Mp, C), out_dtype),
        grid=(Mp // tm, C // tc),
        in_specs=in_specs,
        out_specs=pl.BlockSpec((tm, tc), lambda i, j: (i, j)),
        compiler_params=pltpu.CompilerParams(
            dimension_semantics=("parallel", "parallel"),
            vmem_limit_bytes=_vmem_limit(bb)),
    )(*args)
    return out[:M] if Mp != M else out


# ----------------------------------------------------------------------------
# Kernel 2: fused 3x3 conv (pad=1, stride s) + folded-BN + ReLU, no im2col in HBM
# ----------------------------------------------------------------------------
def _conv3x3_bn_relu(h1_nhwc, w2_oihw, scale, offset, stride):
    """h1_nhwc: (N, H, W, P) bf16.  Returns ((N*Ho*Wo, P) bf16, Ho, Wo).

    The padded activation is split into stride-phases once (one HBM pass), after which
    every 3x3 tap is a constant row-shifted slice of the flattened per-image slab.  The
    kernel holds one image's slab in VMEM and accumulates the 9 tap matmuls in f32.
    """
    N, H, W, P = h1_nhwc.shape
    s = stride
    Ho = (H - 1) // s + 1
    Wo = (W - 1) // s + 1

    # One zero-pad pass: conv padding=1, then round padded dims up to multiples of s.
    Hp = _round_up(H + 2, s)
    Wp = _round_up(W + 2, s)
    xp = jnp.pad(h1_nhwc, ((0, 0), (1, Hp - H - 1), (1, Wp - W - 1), (0, 0)))

    # Phase split: phase (ry, cx) = xp[:, ry::s, cx::s, :]   (skipped when s == 1).
    Hs, Ws = Hp // s, Wp // s
    if s == 1:
        phases = xp.reshape(N, 1, Hp * Wp, P)
    else:
        phases = jnp.stack(
            [xp[:, ry::s, cx::s, :] for ry in range(s) for cx in range(s)], axis=1)
        phases = phases.reshape(N, s * s, Hs * Ws, P)

    Mrows = Ho * Ws                               # output rows per image (Ws-Wo slack cols)
    max_off = (2 // s) * Ws + (2 // s)            # largest per-tap row shift
    slab = _round_up(max(Hs * Ws, Mrows + max_off), 8)
    phases = jnp.pad(phases, ((0, 0), (0, 0), (0, slab - Hs * Ws), (0, 0)))
    phases = phases.astype(jnp.bfloat16)

    # tap (dy, dx) -> (phase index, constant row shift inside that phase's flattened slab)
    taps = [((dy % s) * s + (dx % s), (dy // s) * Ws + (dx // s))
            for dy in range(3) for dx in range(3)]

    # Weights: OIHW -> (kh, kw, cin, cout) -> (9, P, P), BN scale folded in, bf16.
    w2 = jnp.transpose(w2_oihw, (2, 3, 1, 0)).reshape(9, P, P)
    w2 = (w2 * scale.reshape(1, 1, P)).astype(jnp.bfloat16)
    off2d = offset.reshape(1, P).astype(jnp.float32)

    def kernel(a_ref, w_ref, b_ref, o_ref):
        acc = None
        for t, (p, off) in enumerate(taps):
            xt = a_ref[0, p, pl.ds(off, Mrows), :]
            y = jnp.dot(xt, w_ref[t], preferred_element_type=jnp.float32)
            acc = y if acc is None else acc + y
        acc = jnp.maximum(acc + b_ref[...], 0.0)
        o_ref[0] = acc.astype(o_ref.dtype)

    bb = (s * s * slab * P * 2       # input slab (bf16)
          + 9 * P * P * 2            # weights
          + P * 4                    # bias
          + Mrows * P * 2            # output block (bf16)
          + Mrows * P * 4 * 2)       # f32 accumulator + tap temporaries

    out = pl.pallas_call(
        kernel,
        out_shape=jax.ShapeDtypeStruct((N, Mrows, P), jnp.bfloat16),
        grid=(N,),
        in_specs=[
            pl.BlockSpec((1, s * s, slab, P), lambda n: (n, 0, 0, 0)),
            pl.BlockSpec((9, P, P), lambda n: (0, 0, 0)),
            pl.BlockSpec((1, P), lambda n: (0, 0)),
        ],
        out_specs=pl.BlockSpec((1, Mrows, P), lambda n: (n, 0, 0)),
        compiler_params=pltpu.CompilerParams(
            dimension_semantics=("parallel",),
            vmem_limit_bytes=_vmem_limit(bb)),
    )(phases, w2, off2d)

    # Drop the Ws - Wo slack columns per output row.
    out = out.reshape(N, Ho, Ws, P)[:, :, :Wo, :].reshape(N * Ho * Wo, P)
    return out, Ho, Wo


# ----------------------------------------------------------------------------
# Glue: BN folding
# ----------------------------------------------------------------------------
def _fold_bn(gamma, beta, mean, var, eps=EPS):
    scale = gamma / jnp.sqrt(var + eps)
    offset = beta - mean * scale
    return scale, offset


# ----------------------------------------------------------------------------
# Bottleneck forward (Pallas version)
# ----------------------------------------------------------------------------
def bottleneck_forward(x_nchw, params, stride=1, downsample=None):
    N, Cin, H, W = x_nchw.shape
    P = params["conv1_w"].shape[0]                    # planes
    Cout = P * EXPANSION

    # TODO(synk): if the surrounding model keeps NHWC end-to-end, drop the two layout
    # transposes (each is an extra full-tensor HBM pass at ResNet sizes).
    x = jnp.transpose(x_nchw, (0, 2, 3, 1)).astype(jnp.bfloat16)     # NHWC, bf16

    s1, o1 = _fold_bn(*params["bn1"])
    s2, o2 = _fold_bn(*params["bn2"])
    s3, o3 = _fold_bn(*params["bn3"])

    # stage 1: 1x1 conv + bn1 + relu   (BN scale folded into the weight)
    W1 = params["conv1_w"][:, :, 0, 0].T * s1.reshape(1, P)
    h1 = _fused_matmul_bn([(x.reshape(N * H * W, Cin), W1)], o1,
                          relu=True, out_dtype=jnp.bfloat16)

    # stage 2: 3x3 conv (stride, pad=1) + bn2 + relu (no materialized im2col)
    h2, Ho, Wo = _conv3x3_bn_relu(h1.reshape(N, H, W, P), params["conv2_w"],
                                  s2, o2, stride)

    # stage 3: 1x1 conv + bn3 + identity + relu; downsample conv fused into this kernel
    W3 = params["conv3_w"][:, :, 0, 0].T * s3.reshape(1, Cout)
    if downsample is None:
        assert stride == 1 and Cin == Cout, "downsample required when shapes change"
        out = _fused_matmul_bn([(h2, W3)], o3,
                               residual=x.reshape(N * H * W, Cin),
                               relu=True, out_dtype=jnp.float32)
    else:
        sd, od = _fold_bn(*downsample["bn"])
        Wd = downsample["conv_w"][:, :, 0, 0].T * sd.reshape(1, Cout)
        xd = x[:, ::stride, ::stride, :][:, :Ho, :Wo, :].reshape(N * Ho * Wo, Cin)
        out = _fused_matmul_bn([(h2, W3), (xd, Wd)], o3 + od,
                               relu=True, out_dtype=jnp.float32)

    return jnp.transpose(out.reshape(N, Ho, Wo, Cout), (0, 3, 1, 2))   # back to NCHW


# ----------------------------------------------------------------------------
# Pure-JAX f32 reference (XLA convs) for correctness checking
# ----------------------------------------------------------------------------
def bottleneck_reference(x_nchw, params, stride=1, downsample=None):
    def conv(x, w, s, pad):
        return jax.lax.conv_general_dilated(
            x, w, (s, s), pad, dimension_numbers=("NCHW", "OIHW", "NCHW"),
            precision=jax.lax.Precision.HIGHEST)

    def bn(x, bn_p):
        g, b, m, v = (t[None, :, None, None] for t in bn_p)
        return (x - m) / jnp.sqrt(v + EPS) * g + b

    out = jnp.maximum(bn(conv(x_nchw, params["conv1_w"], 1, "VALID"), params["bn1"]), 0.0)
    out = jnp.maximum(bn(conv(out, params["conv2_w"], stride, ((1, 1), (1, 1))), params["bn2"]), 0.0)
    out = bn(conv(out, params["conv3_w"], 1, "VALID"), params["bn3"])
    if downsample is None:
        identity = x_nchw
    else:
        identity = bn(conv(x_nchw, downsample["conv_w"], stride, "VALID"), downsample["bn"])
    return jnp.maximum(out + identity, 0.0)


# ----------------------------------------------------------------------------
# Deterministic parameter init (matches the nn.Module shapes)
# ----------------------------------------------------------------------------
def _conv_w(key, cout, cin, kh, kw):
    fan_in = cin * kh * kw
    return jax.random.normal(key, (cout, cin, kh, kw), jnp.float32) / jnp.sqrt(fan_in)


def _bn_p(key, n):
    k1, k2, k3, k4 = jax.random.split(key, 4)
    gamma = jax.random.uniform(k1, (n,), jnp.float32, 0.5, 1.5)
    beta = 0.1 * jax.random.normal(k2, (n,), jnp.float32)
    mean = 0.1 * jax.random.normal(k3, (n,), jnp.float32)
    var = jax.random.uniform(k4, (n,), jnp.float32, 0.5, 1.5)
    return (gamma, beta, mean, var)


def init_bottleneck_params(key, inplanes, planes, with_downsample=False):
    ks = jax.random.split(key, 8)
    params = {
        "conv1_w": _conv_w(ks[0], planes, inplanes, 1, 1),
        "bn1": _bn_p(ks[1], planes),
        "conv2_w": _conv_w(ks[2], planes, planes, 3, 3),
        "bn2": _bn_p(ks[3], planes),
        "conv3_w": _conv_w(ks[4], planes * EXPANSION, planes, 1, 1),
        "bn3": _bn_p(ks[5], planes * EXPANSION),
    }
    downsample = None
    if with_downsample:
        downsample = {
            "conv_w": _conv_w(ks[6], planes * EXPANSION, inplanes, 1, 1),
            "bn": _bn_p(ks[7], planes * EXPANSION),
        }
    return params, downsample


# ----------------------------------------------------------------------------
if __name__ == "__main__":
    key = jax.random.PRNGKey(0)
    k_x, k_p, k_p2, k_x3, k_p3 = jax.random.split(key, 5)

    fwd = jax.jit(bottleneck_forward, static_argnums=(2,))

    # case 1: stride=1, no downsample (inplanes == planes * expansion)
    N, inplanes, planes, H, W = 2, 16, 4, 16, 16
    x = jax.random.normal(k_x, (N, inplanes, H, W), jnp.float32)   # NCHW like PyTorch
    params, _ = init_bottleneck_params(k_p, inplanes, planes, with_downsample=False)

    out = jax.block_until_ready(fwd(x, params, 1, None))
    ref = bottleneck_reference(x, params, stride=1, downsample=None)
    assert out.shape == (N, planes * EXPANSION, H, W)
    # bf16 matmuls (f32 accumulate) vs f32-HIGHEST reference -> relaxed tolerance
    assert jnp.allclose(out, ref, atol=0.1, rtol=0.1), float(jnp.max(jnp.abs(out - ref)))

    # case 2: stride=2 with downsample path (exercises phase-split conv2 + fused downsample)
    params2, downsample2 = init_bottleneck_params(k_p2, inplanes, planes, with_downsample=True)
    out2 = jax.block_until_ready(fwd(x, params2, 2, downsample2))
    ref2 = bottleneck_reference(x, params2, stride=2, downsample=downsample2)
    assert out2.shape == (N, planes * EXPANSION, H // 2, W // 2)
    assert jnp.allclose(out2, ref2, atol=0.1, rtol=0.1), float(jnp.max(jnp.abs(out2 - ref2)))

    # case 3: odd spatial dims (15x15) + stride=2 + downsample (exercises padded-M path,
    # stride-phase rounding and the slack-column handling of the 3x3 kernel)
    H3 = W3 = 15
    x3 = jax.random.normal(k_x3, (N, inplanes, H3, W3), jnp.float32)
    params3, downsample3 = init_bottleneck_params(k_p3, inplanes, planes, with_downsample=True)
    out3 = jax.block_until_ready(fwd(x3, params3, 2, downsample3))
    ref3 = bottleneck_reference(x3, params3, stride=2, downsample=downsample3)
    assert out3.shape == (N, planes * EXPANSION, (H3 - 1) // 2 + 1, (W3 - 1) // 2 + 1)
    assert jnp.allclose(out3, ref3, atol=0.1, rtol=0.1), float(jnp.max(jnp.abs(out3 - ref3)))

    print("KERNEL_OK")
</pallas_src>

<mosaic_0001>
module attributes {stable_mosaic.version = 11 : i64} {
  func.func @kernel(%arg0: i32, %arg1: i32, %arg2: memref<512x16xbf16, #tpu.memory_space<vmem>>, %arg3: memref<16x4xbf16, #tpu.memory_space<vmem>>, %arg4: memref<1x4xf32, #tpu.memory_space<vmem>>, %arg5: memref<512x4xbf16, #tpu.memory_space<vmem>>) attributes {dimension_semantics = [#tpu.dimension_semantics<parallel>, #tpu.dimension_semantics<parallel>], iteration_bounds = array<i64: 1, 1>, scalar_prefetch = 0 : i64, scratch_operands = 0 : i64, tpu.core_type = #tpu.core_type<tc>, window_params = [{transform_indices = @transform_0, window_bounds = array<i64: 512, 16>}, {transform_indices = @transform_1, window_bounds = array<i64: 16, 4>}, {transform_indices = @transform_2, window_bounds = array<i64: 1, 4>}, {transform_indices = @transform_3, window_bounds = array<i64: 512, 4>}]} {
    %c0 = arith.constant 0 : index
    %c0_0 = arith.constant 0 : index
    %0 = vector.load %arg2[%c0, %c0_0] : memref<512x16xbf16, #tpu.memory_space<vmem>>, vector<512x16xbf16>
    %c0_1 = arith.constant 0 : index
    %c0_2 = arith.constant 0 : index
    %1 = vector.load %arg3[%c0_1, %c0_2] : memref<16x4xbf16, #tpu.memory_space<vmem>>, vector<16x4xbf16>
    %cst = arith.constant dense<0.000000e+00> : vector<512x4xf32>
    %2 = tpu.matmul %0, %1, %cst {dimension_numbers = #tpu.dot_dimension_numbers<[1], [0], [0], [1], [0, 0, 1, 1], [], []>} : vector<512x16xbf16>, vector<16x4xbf16>, vector<512x4xf32> -> vector<512x4xf32>
    %c0_3 = arith.constant 0 : index
    %c0_4 = arith.constant 0 : index
    %3 = vector.load %arg4[%c0_3, %c0_4] : memref<1x4xf32, #tpu.memory_space<vmem>>, vector<1x4xf32>
    %4 = vector.broadcast %3 : vector<1x4xf32> to vector<512x4xf32>
    %5 = arith.addf %2, %4 : vector<512x4xf32>
    %cst_5 = arith.constant 0.000000e+00 : f32
    %6 = vector.broadcast %cst_5 : f32 to vector<512x4xf32>
    %7 = arith.maximumf %5, %6 : vector<512x4xf32>
    %8 = arith.truncf %7 : vector<512x4xf32> to vector<512x4xbf16>
    %c0_6 = arith.constant 0 : index
    %c0_7 = arith.constant 0 : index
    %9 = vector.load %arg5[%c0_6, %c0_7] : memref<512x4xbf16, #tpu.memory_space<vmem>>, vector<512x4xbf16>
    tpu.vector_store %arg5[%c0_6, %c0_7], %8 {strides = array<i32>} : memref<512x4xbf16, #tpu.memory_space<vmem>>, vector<512x4xbf16>,
    return
  }
  func.func @transform_0(%arg0: i32, %arg1: i32) -> (i32, i32) {
    %c0_i32 = arith.constant 0 : i32
    %c0_i32_0 = arith.constant 0 : i32
    return %arg0, %c0_i32 : i32, i32
  }
  func.func @transform_1(%arg0: i32, %arg1: i32) -> (i32, i32) {
    %c0_i32 = arith.constant 0 : i32
    %c0_i32_0 = arith.constant 0 : i32
    return %c0_i32, %arg1 : i32, i32
  }
  func.func @transform_2(%arg0: i32, %arg1: i32) -> (i32, i32) {
    %c0_i32 = arith.constant 0 : i32
    %c0_i32_0 = arith.constant 0 : i32
    return %c0_i32, %arg1 : i32, i32
  }
  func.func @transform_3(%arg0: i32, %arg1: i32) -> (i32, i32) {
    %c0_i32 = arith.constant 0 : i32
    return %arg0, %arg1 : i32, i32
  }
}

module attributes {stable_mosaic.version = 11 : i64} {
  func.func @kernel(%arg0: i32, %arg1: memref<1x1x328x4xbf16, #tpu.memory_space<vmem>>, %arg2: memref<9x4x4xbf16, #tpu.memory_space<vmem>>, %arg3: memref<1x4xf32, #tpu.memory_space<vmem>>, %arg4: memref<1x288x4xbf16, #tpu.memory_space<vmem>>) attributes {dimension_semantics = [#tpu.dimension_semantics<parallel>], iteration_bounds = array<i64: 2>, scalar_prefetch = 0 : i64, scratch_operands = 0 : i64, tpu.core_type = #tpu.core_type<tc>, window_params = [{transform_indices = @transform_0, window_bounds = array<i64: 1, 1, 328, 4>}, {pipeline_mode = #tpu.pipeline_mode<synchronous>, transform_indices = @transform_1, window_bounds = array<i64: 9, 4, 4>}, {pipeline_mode = #tpu.pipeline_mode<synchronous>, transform_indices = @transform_2, window_bounds = array<i64: 1, 4>}, {transform_indices = @transform_3, window_bounds = array<i64: 1, 288, 4>}]} {
    %c0 = arith.constant 0 : index
    %c0_0 = arith.constant 0 : index
    %c0_1 = arith.constant 0 : index
    %c0_2 = arith.constant 0 : index
    %0 = vector.load %arg1[%c0, %c0_0, %c0_1, %c0_2] : memref<1x1x328x4xbf16, #tpu.memory_space<vmem>>, vector<1x1x288x4xbf16>
    %1 = vector.shape_cast %0 : vector<1x1x288x4xbf16> to vector<288x4xbf16>
    %c0_3 = arith.constant 0 : index
    %c0_4 = arith.constant 0 : index
    %c0_5 = arith.constant 0 : index
    %2 = vector.load %arg2[%c0_3, %c0_4, %c0_5] : memref<9x4x4xbf16, #tpu.memory_space<vmem>>, vector<1x4x4xbf16>
    %3 = vector.shape_cast %2 : vector<1x4x4xbf16> to vector<4x4xbf16>
    %cst = arith.constant dense<0.000000e+00> : vector<288x4xf32>
    %4 = tpu.matmul %1, %3, %cst {dimension_numbers = #tpu.dot_dimension_numbers<[1], [0], [0], [1], [0, 0, 1, 1], [], []>} : vector<288x4xbf16>, vector<4x4xbf16>, vector<288x4xf32> -> vector<288x4xf32>
    %c0_6 = arith.constant 0 : index
    %c0_7 = arith.constant 0 : index
    %c1 = arith.constant 1 : index
    %c0_8 = arith.constant 0 : index
    %5 = vector.load %arg1[%c0_6, %c0_7, %c1, %c0_8] : memref<1x1x328x4xbf16, #tpu.memory_space<vmem>>, vector<1x1x288x4xbf16>
    %6 = vector.shape_cast %5 : vector<1x1x288x4xbf16> to vector<288x4xbf16>
    %c1_9 = arith.constant 1 : index
    %c0_10 = arith.constant 0 : index
    %c0_11 = arith.constant 0 : index
    %7 = vector.load %arg2[%c1_9, %c0_10, %c0_11] : memref<9x4x4xbf16, #tpu.memory_space<vmem>>, vector<1x4x4xbf16>
    %8 = vector.shape_cast %7 : vector<1x4x4xbf16> to vector<4x4xbf16>
    %cst_12 = arith.constant dense<0.000000e+00> : vector<288x4xf32>
    %9 = tpu.matmul %6, %8, %cst_12 {dimension_numbers = #tpu.dot_dimension_numbers<[1], [0], [0], [1], [0, 0, 1, 1], [], []>} : vector<288x4xbf16>, vector<4x4xbf16>, vector<288x4xf32> -> vector<288x4xf32>
    %10 = arith.addf %4, %9 : vector<288x4xf32>
    %c0_13 = arith.constant 0 : index
    %c0_14 = arith.constant 0 : index
    %c2 = arith.constant 2 : index
    %c0_15 = arith.constant 0 : index
    %11 = vector.load %arg1[%c0_13, %c0_14, %c2, %c0_15] : memref<1x1x328x4xbf16, #tpu.memory_space<vmem>>, vector<1x1x288x4xbf16>
    %12 = vector.shape_cast %11 : vector<1x1x288x4xbf16> to vector<288x4xbf16>
    %c2_16 = arith.constant 2 : index
    %c0_17 = arith.constant 0 : index
    %c0_18 = arith.constant 0 : index
    %13 = vector.load %arg2[%c2_16, %c0_17, %c0_18] : memref<9x4x4xbf16, #tpu.memory_space<vmem>>, vector<1x4x4xbf16>
    %14 = vector.shape_cast %13 : vector<1x4x4xbf16> to vector<4x4xbf16>
    %cst_19 = arith.constant dense<0.000000e+00> : vector<288x4xf32>
    %15 = tpu.matmul %12, %14, %cst_19 {dimension_numbers = #tpu.dot_dimension_numbers<[1], [0], [0], [1], [0, 0, 1, 1], [], []>} : vector<288x4xbf16>, vector<4x4xbf16>, vector<288x4xf32> -> vector<288x4xf32>
    %16 = arith.addf %10, %15 : vector<288x4xf32>
    %c0_20 = arith.constant 0 : index
    %c0_21 = arith.constant 0 : index
    %c18 = arith.constant 18 : index
    %c0_22 = arith.constant 0 : index
    %17 = vector.load %arg1[%c0_20, %c0_21, %c18, %c0_22] : memref<1x1x328x4xbf16, #tpu.memory_space<vmem>>, vector<1x1x288x4xbf16>
    %18 = vector.shape_cast %17 : vector<1x1x288x4xbf16> to vector<288x4xbf16>
    %c3 = arith.constant 3 : index
    %c0_23 = arith.constant 0 : index
    %c0_24 = arith.constant 0 : index
    %19 = vector.load %arg2[%c3, %c0_23, %c0_24] : memref<9x4x4xbf16, #tpu.memory_space<vmem>>, vector<1x4x4xbf16>
    %20 = vector.shape_cast %19 : vector<1x4x4xbf16> to vector<4x4xbf16>
    %cst_25 = arith.constant dense<0.000000e+00> : vector<288x4xf32>
    %21 = tpu.matmul %18, %20, %cst_25 {dimension_numbers = #tpu.dot_dimension_numbers<[1], [0], [0], [1], [0, 0, 1, 1], [], []>} : vector<288x4xbf16>, vector<4x4xbf16>, vector<288x4xf32> -> vector<288x4xf32>
    %22 = arith.addf %16, %21 : vector<288x4xf32>
    %c0_26 = arith.constant 0 : index
    %c0_27 = arith.constant 0 : index
    %c19 = arith.constant 19 : index
    %c0_28 = arith.constant 0 : index
    %23 = vector.load %arg1[%c0_26, %c0_27, %c19, %c0_28] : memref<1x1x328x4xbf16, #tpu.memory_space<vmem>>, vector<1x1x288x4xbf16>
    %24 = vector.shape_cast %23 : vector<1x1x288x4xbf16> to vector<288x4xbf16>
    %c4 = arith.constant 4 : index
    %c0_29 = arith.constant 0 : index
    %c0_30 = arith.constant 0 : index
    %25 = vector.load %arg2[%c4, %c0_29, %c0_30] : memref<9x4x4xbf16, #tpu.memory_space<vmem>>, vector<1x4x4xbf16>
    %26 = vector.shape_cast %25 : vector<1x4x4xbf16> to vector<4x4xbf16>
    %cst_31 = arith.constant dense<0.000000e+00> : vector<288x4xf32>
    %27 = tpu.matmul %24, %26, %cst_31 {dimension_numbers = #tpu.dot_dimension_numbers<[1], [0], [0], [1], [0, 0, 1, 1], [], []>} : vector<288x4xbf16>, vector<4x4xbf16>, vector<288x4xf32> -> vector<288x4xf32>
    %28 = arith.addf %22, %27 : vector<288x4xf32>
    %c0_32 = arith.constant 0 : index
    %c0_33 = arith.constant 0 : index
    %c20 = arith.constant 20 : index
    %c0_34 = arith.constant 0 : index
    %29 = vector.load %arg1[%c0_32, %c0_33, %c20, %c0_34] : memref<1x1x328x4xbf16, #tpu.memory_space<vmem>>, vector<1x1x288x4xbf16>
    %30 = vector.shape_cast %29 : vector<1x1x288x4xbf16> to vector<288x4xbf16>
    %c5 = arith.constant 5 : index
    %c0_35 = arith.constant 0 : index
    %c0_36 = arith.constant 0 : index
    %31 = vector.load %arg2[%c5, %c0_35, %c0_36] : memref<9x4x4xbf16, #tpu.memory_space<vmem>>, vector<1x4x4xbf16>
    %32 = vector.shape_cast %31 : vector<1x4x4xbf16> to vector<4x4xbf16>
    %cst_37 = arith.constant dense<0.000000e+00> : vector<288x4xf32>
    %33 = tpu.matmul %30, %32, %cst_37 {dimension_numbers = #tpu.dot_dimension_numbers<[1], [0], [0], [1], [0, 0, 1, 1], [], []>} : vector<288x4xbf16>, vector<4x4xbf16>, vector<288x4xf32> -> vector<288x4xf32>
    %34 = arith.addf %28, %33 : vector<288x4xf32>
    %c0_38 = arith.constant 0 : index
    %c0_39 = arith.constant 0 : index
    %c36 = arith.constant 36 : index
    %c0_40 = arith.constant 0 : index
    %35 = vector.load %arg1[%c0_38, %c0_39, %c36, %c0_40] : memref<1x1x328x4xbf16, #tpu.memory_space<vmem>>, vector<1x1x288x4xbf16>
    %36 = vector.shape_cast %35 : vector<1x1x288x4xbf16> to vector<288x4xbf16>
    %c6 = arith.constant 6 : index
    %c0_41 = arith.constant 0 : index
    %c0_42 = arith.constant 0 : index
    %37 = vector.load %arg2[%c6, %c0_41, %c0_42] : memref<9x4x4xbf16, #tpu.memory_space<vmem>>, vector<1x4x4xbf16>
    %38 = vector.shape_cast %37 : vector<1x4x4xbf16> to vector<4x4xbf16>
    %cst_43 = arith.constant dense<0.000000e+00> : vector<288x4xf32>
    %39 = tpu.matmul %36, %38, %cst_43 {dimension_numbers = #tpu.dot_dimension_numbers<[1], [0], [0], [1], [0, 0, 1, 1], [], []>} : vector<288x4xbf16>, vector<4x4xbf16>, vector<288x4xf32> -> vector<288x4xf32>
    %40 = arith.addf %34, %39 : vector<288x4xf32>
    %c0_44 = arith.constant 0 : index
    %c0_45 = arith.constant 0 : index
    %c37 = arith.constant 37 : index
    %c0_46 = arith.constant 0 : index
    %41 = vector.load %arg1[%c0_44, %c0_45, %c37, %c0_46] : memref<1x1x328x4xbf16, #tpu.memory_space<vmem>>, vector<1x1x288x4xbf16>
    %42 = vector.shape_cast %41 : vector<1x1x288x4xbf16> to vector<288x4xbf16>
    %c7 = arith.constant 7 : index
    %c0_47 = arith.constant 0 : index
    %c0_48 = arith.constant 0 : index
    %43 = vector.load %arg2[%c7, %c0_47, %c0_48] : memref<9x4x4xbf16, #tpu.memory_space<vmem>>, vector<1x4x4xbf16>
    %44 = vector.shape_cast %43 : vector<1x4x4xbf16> to vector<4x4xbf16>
    %cst_49 = arith.constant dense<0.000000e+00> : vector<288x4xf32>
    %45 = tpu.matmul %42, %44, %cst_49 {dimension_numbers = #tpu.dot_dimension_numbers<[1], [0], [0], [1], [0, 0, 1, 1], [], []>} : vector<288x4xbf16>, vector<4x4xbf16>, vector<288x4xf32> -> vector<288x4xf32>
    %46 = arith.addf %40, %45 : vector<288x4xf32>
    %c0_50 = arith.constant 0 : index
    %c0_51 = arith.constant 0 : index
    %c38 = arith.constant 38 : index
    %c0_52 = arith.constant 0 : index
    %47 = vector.load %arg1[%c0_50, %c0_51, %c38, %c0_52] : memref<1x1x328x4xbf16, #tpu.memory_space<vmem>>, vector<1x1x288x4xbf16>
    %48 = vector.shape_cast %47 : vector<1x1x288x4xbf16> to vector<288x4xbf16>
    %c8 = arith.constant 8 : index
    %c0_53 = arith.constant 0 : index
    %c0_54 = arith.constant 0 : index
    %49 = vector.load %arg2[%c8, %c0_53, %c0_54] : memref<9x4x4xbf16, #tpu.memory_space<vmem>>, vector<1x4x4xbf16>
    %50 = vector.shape_cast %49 : vector<1x4x4xbf16> to vector<4x4xbf16>
    %cst_55 = arith.constant dense<0.000000e+00> : vector<288x4xf32>
    %51 = tpu.matmul %48, %50, %cst_55 {dimension_numbers = #tpu.dot_dimension_numbers<[1], [0], [0], [1], [0, 0, 1, 1], [], []>} : vector<288x4xbf16>, vector<4x4xbf16>, vector<288x4xf32> -> vector<288x4xf32>
    %52 = arith.addf %46, %51 : vector<288x4xf32>
    %c0_56 = arith.constant 0 : index
    %c0_57 = arith.constant 0 : index
    %53 = vector.load %arg3[%c0_56, %c0_57] : memref<1x4xf32, #tpu.memory_space<vmem>>, vector<1x4xf32>
    %54 = vector.broadcast %53 : vector<1x4xf32> to vector<288x4xf32>
    %55 = arith.addf %52, %54 : vector<288x4xf32>
    %cst_58 = arith.constant 0.000000e+00 : f32
    %56 = vector.broadcast %cst_58 : f32 to vector<288x4xf32>
    %57 = arith.maximumf %55, %56 : vector<288x4xf32>
    %58 = arith.truncf %57 : vector<288x4xf32> to vector<288x4xbf16>
    %c0_59 = arith.constant 0 : index
    %c0_60 = arith.constant 0 : index
    %c0_61 = arith.constant 0 : index
    %59 = vector.load %arg4[%c0_59, %c0_60, %c0_61] : memref<1x288x4xbf16, #tpu.memory_space<vmem>>, vector<1x288x4xbf16>
    %60 = vector.shape_cast %59 : vector<1x288x4xbf16> to vector<288x4xbf16>
    %61 = vector.shape_cast %58 : vector<288x4xbf16> to vector<1x288x4xbf16>
    tpu.vector_store %arg4[%c0_59, %c0_60, %c0_61], %61 {strides = array<i32>} : memref<1x288x4xbf16, #tpu.memory_space<vmem>>, vector<1x288x4xbf16>,
    return
  }
  func.func @transform_0(%arg0: i32) -> (i32, i32, i32, i32) {
    %c0_i32 = arith.constant 0 : i32
    %c0_i32_0 = arith.constant 0 : i32
    %c0_i32_1 = arith.constant 0 : i32
    %c0_i32_2 = arith.constant 0 : i32
    return %arg0, %c0_i32, %c0_i32_0, %c0_i32_1 : i32, i32, i32, i32
  }
  func.func @transform_1(%arg0: i32) -> (i32, i32, i32) {
    %c0_i32 = arith.constant 0 : i32
    %c0_i32_0 = arith.constant 0 : i32
    %c0_i32_1 = arith.constant 0 : i32
    %c0_i32_2 = arith.constant 0 : i32
    return %c0_i32, %c0_i32_0, %c0_i32_1 : i32, i32, i32
  }
  func.func @transform_2(%arg0: i32) -> (i32, i32) {
    %c0_i32 = arith.constant 0 : i32
    %c0_i32_0 = arith.constant 0 : i32
    %c0_i32_1 = arith.constant 0 : i32
    return %c0_i32, %c0_i32_0 : i32, i32
  }
  func.func @transform_3(%arg0: i32) -> (i32, i32, i32) {
    %c0_i32 = arith.constant 0 : i32
    %c0_i32_0 = arith.constant 0 : i32
    %c0_i32_1 = arith.constant 0 : i32
    return %arg0, %c0_i32, %c0_i32_0 : i32, i32, i32
  }
}

module attributes {stable_mosaic.version = 11 : i64} {
  func.func @kernel(%arg0: i32, %arg1: i32, %arg2: memref<512x4xbf16, #tpu.memory_space<vmem>>, %arg3: memref<4x16xbf16, #tpu.memory_space<vmem>>, %arg4: memref<1x16xf32, #tpu.memory_space<vmem>>, %arg5: memref<512x16xbf16, #tpu.memory_space<vmem>>, %arg6: memref<512x16xf32, #tpu.memory_space<vmem>>) attributes {dimension_semantics = [#tpu.dimension_semantics<parallel>, #tpu.dimension_semantics<parallel>], iteration_bounds = array<i64: 1, 1>, scalar_prefetch = 0 : i64, scratch_operands = 0 : i64, tpu.core_type = #tpu.core_type<tc>, window_params = [{transform_indices = @transform_0, window_bounds = array<i64: 512, 4>}, {transform_indices = @transform_1, window_bounds = array<i64: 4, 16>}, {transform_indices = @transform_2, window_bounds = array<i64: 1, 16>}, {transform_indices = @transform_3, window_bounds = array<i64: 512, 16>}, {transform_indices = @transform_4, window_bounds = array<i64: 512, 16>}]} {
    %c0 = arith.constant 0 : index
    %c0_0 = arith.constant 0 : index
    %0 = vector.load %arg2[%c0, %c0_0] : memref<512x4xbf16, #tpu.memory_space<vmem>>, vector<512x4xbf16>
    %c0_1 = arith.constant 0 : index
    %c0_2 = arith.constant 0 : index
    %1 = vector.load %arg3[%c0_1, %c0_2] : memref<4x16xbf16, #tpu.memory_space<vmem>>, vector<4x16xbf16>
    %cst = arith.constant dense<0.000000e+00> : vector<512x16xf32>
    %2 = tpu.matmul %0, %1, %cst {dimension_numbers = #tpu.dot_dimension_numbers<[1], [0], [0], [1], [0, 0, 1, 1], [], []>} : vector<512x4xbf16>, vector<4x16xbf16>, vector<512x16xf32> -> vector<512x16xf32>
    %c0_3 = arith.constant 0 : index
    %c0_4 = arith.constant 0 : index
    %3 = vector.load %arg4[%c0_3, %c0_4] : memref<1x16xf32, #tpu.memory_space<vmem>>, vector<1x16xf32>
    %4 = vector.broadcast %3 : vector<1x16xf32> to vector<512x16xf32>
    %5 = arith.addf %2, %4 : vector<512x16xf32>
    %c0_5 = arith.constant 0 : index
    %c0_6 = arith.constant 0 : index
    %6 = vector.load %arg5[%c0_5, %c0_6] : memref<512x16xbf16, #tpu.memory_space<vmem>>, vector<512x16xbf16>
    %7 = arith.extf %6 : vector<512x16xbf16> to vector<512x16xf32>
    %8 = arith.addf %5, %7 : vector<512x16xf32>
    %cst_7 = arith.constant 0.000000e+00 : f32
    %9 = vector.broadcast %cst_7 : f32 to vector<512x16xf32>
    %10 = arith.maximumf %8, %9 : vector<512x16xf32>
    %c0_8 = arith.constant 0 : index
    %c0_9 = arith.constant 0 : index
    %11 = vector.load %arg6[%c0_8, %c0_9] : memref<512x16xf32, #tpu.memory_space<vmem>>, vector<512x16xf32>
    tpu.vector_store %arg6[%c0_8, %c0_9], %10 {strides = array<i32>} : memref<512x16xf32, #tpu.memory_space<vmem>>, vector<512x16xf32>,
    return
  }
  func.func @transform_0(%arg0: i32, %arg1: i32) -> (i32, i32) {
    %c0_i32 = arith.constant 0 : i32
    %c0_i32_0 = arith.constant 0 : i32
    return %arg0, %c0_i32 : i32, i32
  }
  func.func @transform_1(%arg0: i32, %arg1: i32) -> (i32, i32) {
    %c0_i32 = arith.constant 0 : i32
    %c0_i32_0 = arith.constant 0 : i32
    return %c0_i32, %arg1 : i32, i32
  }
  func.func @transform_2(%arg0: i32, %arg1: i32) -> (i32, i32) {
    %c0_i32 = arith.constant 0 : i32
    %c0_i32_0 = arith.constant 0 : i32
    return %c0_i32, %arg1 : i32, i32
  }
  func.func @transform_3(%arg0: i32, %arg1: i32) -> (i32, i32) {
    %c0_i32 = arith.constant 0 : i32
    return %arg0, %arg1 : i32, i32
  }
  func.func @transform_4(%arg0: i32, %arg1: i32) -> (i32, i32) {
    %c0_i32 = arith.constant 0 : i32
    return %arg0, %arg1 : i32, i32
  }
}

</mosaic_0001>

<bundles_post_ra>
// kernel: bottleneck_forward.3
= control target key start
LH: loop header
LB: loop body
LE: loop exit
PB: predicated region body
PF: predicated region fallthrough
CT: control target
= control target key end

     0   :  { %vm254_vm0 = vcmask 130048   ;;  %vm960_vm1 = vcmask 27648   ;;  %s1833_s1 = inlined_call_operand.vmem [shape: bf16[16,4], index: 1, kind: input, shape index: {}]   ;;  %s1834_s0 = inlined_call_operand.vmem [shape: bf16[512,16], index: 0, kind: input, shape index: {}]   ;;  %s1835_s2 = inlined_call_operand.vmem [shape: f32[1,4], index: 2, kind: input, shape index: {}]   ;;  %s1836_s3 = inlined_call_operand.vmem [shape: bf16[512,4], index: 3, kind: output, shape index: {}]  }
   0x1   :  { %v1324_v0 = vld [vmem:[%s1833_s1] sm:$0xff]   ;;  %v1327_v3 = vld [vmem:[%s1834_s0 + $0x8] sm:$0xff]   ;;  %v1329_v5 = vld [vmem:[%s1834_s0 + $0x10] sm:$0xff]  }
   0x2   :  { %v1325_v1 = vld [vmem:[%s1834_s0] sm:$0xff]   ;;  %1256 = vmatprep.subr.bf16.mxu0 %v1324_v0  ;;  %1322 = vmatprep.subr.bf16.mxu1 %v1324_v0  ;;  %v1328_v4 = vld [vmem:[%s1834_s0 + $0x88] sm:$0xff]   ;;  %v1330_v6 = vld [vmem:[%s1834_s0 + $0x90] sm:$0xff]  }
   0x3   :  { %v1326_v2 = vld [vmem:[%s1834_s0 + $0x80] sm:$0xff]   ;;  %1257 = vmatpush3.bf16.msra.mxu0 %v1324_v0  ;;  %1323 = vmatpush3.bf16.msra.mxu1 %v1324_v0  ;;  %v1331_v7 = vld [vmem:[%s1834_s0 + $0x18] sm:$0xff]   ;;  %v1335_v11 = vld [vmem:[%s1834_s0 + $0x28] sm:$0xff]  }
   0x4   :  { %1258 = vmatprep.mubr.msk.bf16.mxu0 %vm254_vm0, %v1325_v1  ;;  %1290 = vmatprep.mubr.msk.bf16.mxu1 %vm254_vm0, %v1326_v2  ;;  %v1332_v8 = vld [vmem:[%s1834_s0 + $0x98] sm:$0xff]   ;;  %v1333_v9 = vld [vmem:[%s1834_s0 + $0x20] sm:$0xff]   ;;  %v1336_v12 = vld [vmem:[%s1834_s0 + $0xa8] sm:$0xff]  }
   0x5   :  { %v1334_v10 = vld [vmem:[%s1834_s0 + $0xa0] sm:$0xff]   ;;  %v1337_v13 = vld [vmem:[%s1834_s0 + $0x30] sm:$0xff]   ;;  %v1339_v15 = vld [vmem:[%s1834_s0 + $0x38] sm:$0xff]  }
   0x6   :  { %1259 = vmatmul.mubr.msk.bf16.vlgmr.msra.gmra.mrb[0].mxu0 %vm254_vm0, %v1327_v3  ;;  %1291 = vmatmul.mubr.msk.bf16.vlgmr.msra.gmra.mrb[0].mxu1 %vm254_vm0, %v1328_v4  ;;  %v1338_v14 = vld [vmem:[%s1834_s0 + $0xb0] sm:$0xff]   ;;  %v1340_v16 = vld [vmem:[%s1834_s0 + $0xb8] sm:$0xff]   ;;  %v1341_v17 = vld [vmem:[%s1834_s0 + $0x40] sm:$0xff]  }
   0x7   :  { %1262 = vmatprep.mubr.msk.bf16.mxu0 %vm254_vm0, %v1329_v5  ;;  %1294 = vmatprep.mubr.msk.bf16.mxu1 %vm254_vm0, %v1330_v6  ;;  %v1342_v18 = vld [vmem:[%s1834_s0 + $0xc0] sm:$0xff]   ;;  %v1343_v19 = vld [vmem:[%s1834_s0 + $0x48] sm:$0xff]   ;;  %v1345_v21 = vld [vmem:[%s1834_s0 + $0x50] sm:$0xff]  }
   0x8   :  { %v1344_v20 = vld [vmem:[%s1834_s0 + $0xc8] sm:$0xff]   ;;  %v1346_v22 = vld [vmem:[%s1834_s0 + $0xd0] sm:$0xff]   ;;  %v1347_v23 = vld [vmem:[%s1834_s0 + $0x58] sm:$0xff]  }
   0x9   :  { %v1348_v24 = vld [vmem:[%s1834_s0 + $0xd8] sm:$0xff]   ;;  %v1349_v25 = vld [vmem:[%s1834_s0 + $0x60] sm:$0xff]   ;;  %v1351_v27 = vld [vmem:[%s1834_s0 + $0x68] sm:$0xff]  }
   0xa   :  { %v1350_v26 = vld [vmem:[%s1834_s0 + $0xe0] sm:$0xff]   ;;  %v1352_v28 = vld [vmem:[%s1834_s0 + $0xe8] sm:$0xff]   ;;  %v1353_v29 = vld [vmem:[%s1834_s0 + $0x70] sm:$0xff]  }
   0xb   :  { %v1354_v30 = vld [vmem:[%s1834_s0 + $0xf0] sm:$0xff]   ;;  %v1355_v31 = vld [vmem:[%s1834_s0 + $0x78] sm:$0xff]   ;;  %v1511_v33 = vld [vmem:[%s1835_s2] ss:$0 sm:$0xff] }
   0xc   :  { %v1356_v32 = vld [vmem:[%s1834_s0 + $0xf8] sm:$0xff]  }
   0xe   :  { %1263 = vmatmul.mubr.msk.bf16.gmra.mrb[4].mxu0 %vm254_vm0, %v1331_v7  ;;  %1295 = vmatmul.mubr.msk.bf16.gmra.mrb[4].mxu1 %vm254_vm0, %v1332_v8 }
   0xf   :  { %1266 = vmatprep.mubr.msk.bf16.mxu0 %vm254_vm0, %v1333_v9  ;;  %1298 = vmatprep.mubr.msk.bf16.mxu1 %vm254_vm0, %v1334_v10 }
  0x16   :  { %1267 = vmatmul.mubr.msk.bf16.gmra.mrb[8].mxu0 %vm254_vm0, %v1335_v11  ;;  %1299 = vmatmul.mubr.msk.bf16.gmra.mrb[8].mxu1 %vm254_vm0, %v1336_v12 }
  0x17   :  { %1270 = vmatprep.mubr.msk.bf16.mxu0 %vm254_vm0, %v1337_v13  ;;  %1302 = vmatprep.mubr.msk.bf16.mxu1 %vm254_vm0, %v1338_v14 }
  0x1e   :  { %1271 = vmatmul.mubr.msk.bf16.gmra.mrb[12].mxu0 %vm254_vm0, %v1339_v15  ;;  %1303 = vmatmul.mubr.msk.bf16.gmra.mrb[12].mxu1 %vm254_vm0, %v1340_v16 }
  0x1f   :  { %1274 = vmatprep.mubr.msk.bf16.mxu0 %vm254_vm0, %v1341_v17  ;;  %1306 = vmatprep.mubr.msk.bf16.mxu1 %vm254_vm0, %v1342_v18 }
  0x26   :  { %1275 = vmatmul.mubr.msk.bf16.gmra.mrb[16].mxu0 %vm254_vm0, %v1343_v19  ;;  %1307 = vmatmul.mubr.msk.bf16.gmra.mrb[16].mxu1 %vm254_vm0, %v1344_v20 }
  0x27   :  { %1278 = vmatprep.mubr.msk.bf16.mxu0 %vm254_vm0, %v1345_v21  ;;  %1310 = vmatprep.mubr.msk.bf16.mxu1 %vm254_vm0, %v1346_v22 }
  0x2e   :  { %1279 = vmatmul.mubr.msk.bf16.gmra.mrb[20].mxu0 %vm254_vm0, %v1347_v23  ;;  %1311 = vmatmul.mubr.msk.bf16.gmra.mrb[20].mxu1 %vm254_vm0, %v1348_v24 }
  0x2f   :  { %1282 = vmatprep.mubr.msk.bf16.mxu0 %vm254_vm0, %v1349_v25  ;;  %1314 = vmatprep.mubr.msk.bf16.mxu1 %vm254_vm0, %v1350_v26 }
  0x36   :  { %1283 = vmatmul.mubr.msk.bf16.gmra.mrb[24].mxu0 %vm254_vm0, %v1351_v27  ;;  %1315 = vmatmul.mubr.msk.bf16.gmra.mrb[24].mxu1 %vm254_vm0, %v1352_v28 }
  0x37   :  { %1286 = vmatprep.mubr.msk.bf16.mxu0 %vm254_vm0, %v1353_v29  ;;  %1318 = vmatprep.mubr.msk.bf16.mxu1 %vm254_vm0, %v1354_v30 }
  0x3e   :  { %1287 = vmatmul.mubr.msk.bf16.gmra.mrb[28].mxu0 %vm254_vm0, %v1355_v31  ;;  %1319 = vmatmul.mubr.msk.bf16.gmra.mrb[28].mxu1 %vm254_vm0, %v1356_v32 }
  0xd9   :  { %v1260_v34 = vpop.f32.mrb[0].mxu0  ;;  %v1292_v35 = vpop.f32.mrb[0].mxu1 }
  0xda   :  { %v394_v36 = vadd.f32 %v1260_v34, %v1511_v33  ;;  %v522_v37 = vadd.f32 %v1292_v35, %v1511_v33  ;;  %v385_v38 = vpop.f32.mrb[1].mxu0  ;;  %v513_v39 = vpop.f32.mrb[1].mxu1 }
  0xdb   :  { %v386_v40 = vadd.f32 %v1511_v33, %v385_v38  ;;  %v514_v41 = vadd.f32 %v1511_v33, %v513_v39  ;;  %v1261_v42 = vpop.f32.mrb[2].mxu0  ;;  %v1293_v43 = vpop.f32.mrb[2].mxu1 }
  0xdc   :  { %v642_v44 = vmax.f32 %v394_v36, 0.0  ;;  %v674_v45 = vmax.f32 %v522_v37, 0.0  ;;  %v397_v46 = vadd.f32 %v1261_v42, %v1511_v33  ;;  %v525_v47 = vadd.f32 %v1293_v43, %v1511_v33  ;;  %v388_v48 = vpop.f32.mrb[3].mxu0  ;;  %v516_v49 = vpop.f32.mrb[3].mxu1 }
  0xdd   :  { %v640_v50 = vmax.f32 %v386_v40, 0.0  ;;  %v672_v51 = vmax.f32 %v514_v41, 0.0  ;;  %v389_v52 = vadd.f32 %v1511_v33, %v388_v48  ;;  %v517_v53 = vadd.f32 %v1511_v33, %v516_v49 }
  0xde   :  { %v1161_v54 = vpack.c.bf16 %v642_v44, %v642_v44  ;;  %v1193_v55 = vpack.c.bf16 %v674_v45, %v674_v45  ;;  %v643_v56 = vmax.f32 %v397_v46, 0.0  ;;  %v675_v57 = vmax.f32 %v525_v47, 0.0 }
  0xdf   :  { %v1159_v58 = vpack.c.bf16 %v640_v50, %v640_v50  ;;  %v1191_v59 = vpack.c.bf16 %v672_v51, %v672_v51  ;;  %v641_v60 = vmax.f32 %v389_v52, 0.0  ;;  %v673_v61 = vmax.f32 %v517_v53, 0.0 }
  0xe0   :  { %963 = vst.msk [vmem:[%s1836_s3 + $0x8] sm:$0xf] %vm960_vm1, %v1161_v54  ;;  %995 = vst.msk [vmem:[%s1836_s3 + $0x88] sm:$0xf] %vm960_vm1, %v1193_v55  ;;  %v1162_v62 = vpack.c.bf16 %v643_v56, %v643_v56  ;;  %v1194_v63 = vpack.c.bf16 %v675_v57, %v675_v57 }
  0xe1   :  { %961 = vst.msk [vmem:[%s1836_s3] sm:$0xf] %vm960_vm1, %v1159_v58  ;;  %993 = vst.msk [vmem:[%s1836_s3 + $0x80] sm:$0xf] %vm960_vm1, %v1191_v59  ;;  %v1160_v0 = vpack.c.bf16 %v641_v60, %v641_v60  ;;  %v1192_v1 = vpack.c.bf16 %v673_v61, %v673_v61  ;;  %v1264_v2 = vpop.f32.mrb[4].mxu0  ;;  %v1296_v3 = vpop.f32.mrb[4].mxu1 }
  0xe2   :  { %964 = vst.msk [vmem:[%s1836_s3 + $0xc] sm:$0xf] %vm960_vm1, %v1162_v62  ;;  %996 = vst.msk [vmem:[%s1836_s3 + $0x8c] sm:$0xf] %vm960_vm1, %v1194_v63  ;;  %v410_v4 = vadd.f32 %v1264_v2, %v1511_v33  ;;  %v538_v5 = vadd.f32 %v1296_v3, %v1511_v33  ;;  %v401_v6 = vpop.f32.mrb[5].mxu0  ;;  %v529_v7 = vpop.f32.mrb[5].mxu1 }
  0xe3   :  { %962 = vst.msk [vmem:[%s1836_s3 + $0x4] sm:$0xf] %vm960_vm1, %v1160_v0  ;;  %994 = vst.msk [vmem:[%s1836_s3 + $0x84] sm:$0xf] %vm960_vm1, %v1192_v1  ;;  %v402_v8 = vadd.f32 %v1511_v33, %v401_v6  ;;  %v530_v9 = vadd.f32 %v1511_v33, %v529_v7  ;;  %v1265_v10 = vpop.f32.mrb[6].mxu0  ;;  %v1297_v11 = vpop.f32.mrb[6].mxu1 }
  0xe4   :  { %v646_v12 = vmax.f32 %v410_v4, 0.0  ;;  %v678_v13 = vmax.f32 %v538_v5, 0.0  ;;  %v413_v14 = vadd.f32 %v1265_v10, %v1511_v33  ;;  %v541_v15 = vadd.f32 %v1297_v11, %v1511_v33  ;;  %v404_v16 = vpop.f32.mrb[7].mxu0  ;;  %v532_v17 = vpop.f32.mrb[7].mxu1 }
  0xe5   :  { %v644_v18 = vmax.f32 %v402_v8, 0.0  ;;  %v676_v19 = vmax.f32 %v530_v9, 0.0  ;;  %v405_v20 = vadd.f32 %v1511_v33, %v404_v16  ;;  %v533_v21 = vadd.f32 %v1511_v33, %v532_v17 }
  0xe6   :  { %v1165_v22 = vpack.c.bf16 %v646_v12, %v646_v12  ;;  %v1197_v23 = vpack.c.bf16 %v678_v13, %v678_v13  ;;  %v647_v24 = vmax.f32 %v413_v14, 0.0  ;;  %v679_v25 = vmax.f32 %v541_v15, 0.0 }
  0xe7   :  { %v1163_v26 = vpack.c.bf16 %v644_v18, %v644_v18  ;;  %v1195_v27 = vpack.c.bf16 %v676_v19, %v676_v19  ;;  %v645_v28 = vmax.f32 %v405_v20, 0.0  ;;  %v677_v29 = vmax.f32 %v533_v21, 0.0 }
  0xe8   :  { %967 = vst.msk [vmem:[%s1836_s3 + $0x18] sm:$0xf] %vm960_vm1, %v1165_v22  ;;  %999 = vst.msk [vmem:[%s1836_s3 + $0x98] sm:$0xf] %vm960_vm1, %v1197_v23  ;;  %v1166_v30 = vpack.c.bf16 %v647_v24, %v647_v24  ;;  %v1198_v31 = vpack.c.bf16 %v679_v25, %v679_v25 }
  0xe9   :  { %965 = vst.msk [vmem:[%s1836_s3 + $0x10] sm:$0xf] %vm960_vm1, %v1163_v26  ;;  %997 = vst.msk [vmem:[%s1836_s3 + $0x90] sm:$0xf] %vm960_vm1, %v1195_v27  ;;  %v1164_v32 = vpack.c.bf16 %v645_v28, %v645_v28  ;;  %v1196_v34 = vpack.c.bf16 %v677_v29, %v677_v29  ;;  %v1268_v35 = vpop.f32.mrb[8].mxu0  ;;  %v1300_v36 = vpop.f32.mrb[8].mxu1 }
  0xea   :  { %968 = vst.msk [vmem:[%s1836_s3 + $0x1c] sm:$0xf] %vm960_vm1, %v1166_v30  ;;  %1000 = vst.msk [vmem:[%s1836_s3 + $0x9c] sm:$0xf] %vm960_vm1, %v1198_v31  ;;  %v426_v37 = vadd.f32 %v1268_v35, %v1511_v33  ;;  %v554_v38 = vadd.f32 %v1300_v36, %v1511_v33  ;;  %v417_v39 = vpop.f32.mrb[9].mxu0  ;;  %v545_v40 = vpop.f32.mrb[9].mxu1 }
  0xeb   :  { %966 = vst.msk [vmem:[%s1836_s3 + $0x14] sm:$0xf] %vm960_vm1, %v1164_v32  ;;  %998 = vst.msk [vmem:[%s1836_s3 + $0x94] sm:$0xf] %vm960_vm1, %v1196_v34  ;;  %v418_v41 = vadd.f32 %v1511_v33, %v417_v39  ;;  %v546_v42 = vadd.f32 %v1511_v33, %v545_v40  ;;  %v1269_v43 = vpop.f32.mrb[10].mxu0  ;;  %v1301_v44 = vpop.f32.mrb[10].mxu1 }
  0xec   :  { %v650_v45 = vmax.f32 %v426_v37, 0.0  ;;  %v682_v46 = vmax.f32 %v554_v38, 0.0  ;;  %v429_v47 = vadd.f32 %v1269_v43, %v1511_v33  ;;  %v557_v48 = vadd.f32 %v1301_v44, %v1511_v33  ;;  %v420_v49 = vpop.f32.mrb[11].mxu0  ;;  %v548_v50 = vpop.f32.mrb[11].mxu1 }
  0xed   :  { %v648_v51 = vmax.f32 %v418_v41, 0.0  ;;  %v680_v52 = vmax.f32 %v546_v42, 0.0  ;;  %v421_v53 = vadd.f32 %v1511_v33, %v420_v49  ;;  %v549_v54 = vadd.f32 %v1511_v33, %v548_v50 }
  0xee   :  { %v1169_v55 = vpack.c.bf16 %v650_v45, %v650_v45  ;;  %v1201_v56 = vpack.c.bf16 %v682_v46, %v682_v46  ;;  %v651_v57 = vmax.f32 %v429_v47, 0.0  ;;  %v683_v58 = vmax.f32 %v557_v48, 0.0 }
  0xef   :  { %v1167_v59 = vpack.c.bf16 %v648_v51, %v648_v51  ;;  %v1199_v60 = vpack.c.bf16 %v680_v52, %v680_v52  ;;  %v649_v61 = vmax.f32 %v421_v53, 0.0  ;;  %v681_v62 = vmax.f32 %v549_v54, 0.0 }
  0xf0   :  { %971 = vst.msk [vmem:[%s1836_s3 + $0x28] sm:$0xf] %vm960_vm1, %v1169_v55  ;;  %1003 = vst.msk [vmem:[%s1836_s3 + $0xa8] sm:$0xf] %vm960_vm1, %v1201_v56  ;;  %v1170_v63 = vpack.c.bf16 %v651_v57, %v651_v57  ;;  %v1202_v0 = vpack.c.bf16 %v683_v58, %v683_v58 }
  0xf1   :  { %969 = vst.msk [vmem:[%s1836_s3 + $0x20] sm:$0xf] %vm960_vm1, %v1167_v59  ;;  %1001 = vst.msk [vmem:[%s1836_s3 + $0xa0] sm:$0xf] %vm960_vm1, %v1199_v60  ;;  %v1168_v1 = vpack.c.bf16 %v649_v61, %v649_v61  ;;  %v1200_v2 = vpack.c.bf16 %v681_v62, %v681_v62  ;;  %v1272_v3 = vpop.f32.mrb[12].mxu0  ;;  %v1304_v4 = vpop.f32.mrb[12].mxu1 }
  0xf2   :  { %972 = vst.msk [vmem:[%s1836_s3 + $0x2c] sm:$0xf] %vm960_vm1, %v1170_v63  ;;  %1004 = vst.msk [vmem:[%s1836_s3 + $0xac] sm:$0xf] %vm960_vm1, %v1202_v0  ;;  %v442_v5 = vadd.f32 %v1272_v3, %v1511_v33  ;;  %v570_v6 = vadd.f32 %v1304_v4, %v1511_v33  ;;  %v433_v7 = vpop.f32.mrb[13].mxu0  ;;  %v561_v8 = vpop.f32.mrb[13].mxu1 }
  0xf3   :  { %970 = vst.msk [vmem:[%s1836_s3 + $0x24] sm:$0xf] %vm960_vm1, %v1168_v1  ;;  %1002 = vst.msk [vmem:[%s1836_s3 + $0xa4] sm:$0xf] %vm960_vm1, %v1200_v2  ;;  %v434_v9 = vadd.f32 %v1511_v33, %v433_v7  ;;  %v562_v10 = vadd.f32 %v1511_v33, %v561_v8  ;;  %v1273_v11 = vpop.f32.mrb[14].mxu0  ;;  %v1305_v12 = vpop.f32.mrb[14].mxu1 }
  0xf4   :  { %v654_v13 = vmax.f32 %v442_v5, 0.0  ;;  %v686_v14 = vmax.f32 %v570_v6, 0.0  ;;  %v445_v15 = vadd.f32 %v1273_v11, %v1511_v33  ;;  %v573_v16 = vadd.f32 %v1305_v12, %v1511_v33  ;;  %v436_v17 = vpop.f32.mrb[15].mxu0  ;;  %v564_v18 = vpop.f32.mrb[15].mxu1 }
  0xf5   :  { %v652_v19 = vmax.f32 %v434_v9, 0.0  ;;  %v684_v20 = vmax.f32 %v562_v10, 0.0  ;;  %v437_v21 = vadd.f32 %v1511_v33, %v436_v17  ;;  %v565_v22 = vadd.f32 %v1511_v33, %v564_v18 }
  0xf6   :  { %v1173_v23 = vpack.c.bf16 %v654_v13, %v654_v13  ;;  %v1205_v24 = vpack.c.bf16 %v686_v14, %v686_v14  ;;  %v655_v25 = vmax.f32 %v445_v15, 0.0  ;;  %v687_v26 = vmax.f32 %v573_v16, 0.0 }
  0xf7   :  { %v1171_v27 = vpack.c.bf16 %v652_v19, %v652_v19  ;;  %v1203_v28 = vpack.c.bf16 %v684_v20, %v684_v20  ;;  %v653_v29 = vmax.f32 %v437_v21, 0.0  ;;  %v685_v30 = vmax.f32 %v565_v22, 0.0 }
  0xf8   :  { %975 = vst.msk [vmem:[%s1836_s3 + $0x38] sm:$0xf] %vm960_vm1, %v1173_v23  ;;  %1007 = vst.msk [vmem:[%s1836_s3 + $0xb8] sm:$0xf] %vm960_vm1, %v1205_v24  ;;  %v1174_v31 = vpack.c.bf16 %v655_v25, %v655_v25  ;;  %v1206_v32 = vpack.c.bf16 %v687_v26, %v687_v26 }
  0xf9   :  { %973 = vst.msk [vmem:[%s1836_s3 + $0x30] sm:$0xf] %vm960_vm1, %v1171_v27  ;;  %1005 = vst.msk [vmem:[%s1836_s3 + $0xb0] sm:$0xf] %vm960_vm1, %v1203_v28  ;;  %v1172_v34 = vpack.c.bf16 %v653_v29, %v653_v29  ;;  %v1204_v35 = vpack.c.bf16 %v685_v30, %v685_v30  ;;  %v1276_v36 = vpop.f32.mrb[16].mxu0  ;;  %v1308_v37 = vpop.f32.mrb[16].mxu1 }
  0xfa   :  { %976 = vst.msk [vmem:[%s1836_s3 + $0x3c] sm:$0xf] %vm960_vm1, %v1174_v31  ;;  %1008 = vst.msk [vmem:[%s1836_s3 + $0xbc] sm:$0xf] %vm960_vm1, %v1206_v32  ;;  %v458_v38 = vadd.f32 %v1276_v36, %v1511_v33  ;;  %v586_v39 = vadd.f32 %v1308_v37, %v1511_v33  ;;  %v449_v40 = vpop.f32.mrb[17].mxu0  ;;  %v577_v41 = vpop.f32.mrb[17].mxu1 }
  0xfb   :  { %974 = vst.msk [vmem:[%s1836_s3 + $0x34] sm:$0xf] %vm960_vm1, %v1172_v34  ;;  %1006 = vst.msk [vmem:[%s1836_s3 + $0xb4] sm:$0xf] %vm960_vm1, %v1204_v35  ;;  %v450_v42 = vadd.f32 %v1511_v33, %v449_v40  ;;  %v578_v43 = vadd.f32 %v1511_v33, %v577_v41  ;;  %v1277_v44 = vpop.f32.mrb[18].mxu0  ;;  %v1309_v45 = vpop.f32.mrb[18].mxu1 }
  0xfc   :  { %v658_v46 = vmax.f32 %v458_v38, 0.0  ;;  %v690_v47 = vmax.f32 %v586_v39, 0.0  ;;  %v461_v48 = vadd.f32 %v1277_v44, %v1511_v33  ;;  %v589_v49 = vadd.f32 %v1309_v45, %v1511_v33  ;;  %v452_v50 = vpop.f32.mrb[19].mxu0  ;;  %v580_v51 = vpop.f32.mrb[19].mxu1 }
  0xfd   :  { %v656_v52 = vmax.f32 %v450_v42, 0.0  ;;  %v688_v53 = vmax.f32 %v578_v43, 0.0  ;;  %v453_v54 = vadd.f32 %v1511_v33, %v452_v50  ;;  %v581_v55 = vadd.f32 %v1511_v33, %v580_v51 }
  0xfe   :  { %v1177_v56 = vpack.c.bf16 %v658_v46, %v658_v46  ;;  %v1209_v57 = vpack.c.bf16 %v690_v47, %v690_v47  ;;  %v659_v58 = vmax.f32 %v461_v48, 0.0  ;;  %v691_v59 = vmax.f32 %v589_v49, 0.0 }
  0xff   :  { %v1175_v60 = vpack.c.bf16 %v656_v52, %v656_v52  ;;  %v1207_v61 = vpack.c.bf16 %v688_v53, %v688_v53  ;;  %v657_v62 = vmax.f32 %v453_v54, 0.0  ;;  %v689_v63 = vmax.f32 %v581_v55, 0.0 }
 0x100   :  { %979 = vst.msk [vmem:[%s1836_s3 + $0x48] sm:$0xf] %vm960_vm1, %v1177_v56  ;;  %1011 = vst.msk [vmem:[%s1836_s3 + $0xc8] sm:$0xf] %vm960_vm1, %v1209_v57  ;;  %v1178_v0 = vpack.c.bf16 %v659_v58, %v659_v58  ;;  %v1210_v1 = vpack.c.bf16 %v691_v59, %v691_v59 }
 0x101   :  { %977 = vst.msk [vmem:[%s1836_s3 + $0x40] sm:$0xf] %vm960_vm1, %v1175_v60  ;;  %1009 = vst.msk [vmem:[%s1836_s3 + $0xc0] sm:$0xf] %vm960_vm1, %v1207_v61  ;;  %v1176_v2 = vpack.c.bf16 %v657_v62, %v657_v62  ;;  %v1208_v3 = vpack.c.bf16 %v689_v63, %v689_v63  ;;  %v1280_v4 = vpop.f32.mrb[20].mxu0  ;;  %v1312_v5 = vpop.f32.mrb[20].mxu1 }
 0x102   :  { %980 = vst.msk [vmem:[%s1836_s3 + $0x4c] sm:$0xf] %vm960_vm1, %v1178_v0  ;;  %1012 = vst.msk [vmem:[%s1836_s3 + $0xcc] sm:$0xf] %vm960_vm1, %v1210_v1  ;;  %v474_v6 = vadd.f32 %v1280_v4, %v1511_v33  ;;  %v602_v7 = vadd.f32 %v1312_v5, %v1511_v33  ;;  %v465_v8 = vpop.f32.mrb[21].mxu0  ;;  %v593_v9 = vpop.f32.mrb[21].mxu1 }
 0x103   :  { %978 = vst.msk [vmem:[%s1836_s3 + $0x44] sm:$0xf] %vm960_vm1, %v1176_v2  ;;  %1010 = vst.msk [vmem:[%s1836_s3 + $0xc4] sm:$0xf] %vm960_vm1, %v1208_v3  ;;  %v466_v10 = vadd.f32 %v1511_v33, %v465_v8  ;;  %v594_v11 = vadd.f32 %v1511_v33, %v593_v9  ;;  %v1281_v12 = vpop.f32.mrb[22].mxu0  ;;  %v1313_v13 = vpop.f32.mrb[22].mxu1 }
 0x104   :  { %v662_v14 = vmax.f32 %v474_v6, 0.0  ;;  %v694_v15 = vmax.f32 %v602_v7, 0.0  ;;  %v477_v16 = vadd.f32 %v1281_v12, %v1511_v33  ;;  %v605_v17 = vadd.f32 %v1313_v13, %v1511_v33  ;;  %v468_v18 = vpop.f32.mrb[23].mxu0  ;;  %v596_v19 = vpop.f32.mrb[23].mxu1 }
 0x105   :  { %v660_v20 = vmax.f32 %v466_v10, 0.0  ;;  %v692_v21 = vmax.f32 %v594_v11, 0.0  ;;  %v469_v22 = vadd.f32 %v1511_v33, %v468_v18  ;;  %v597_v23 = vadd.f32 %v1511_v33, %v596_v19 }
 0x106   :  { %v1181_v24 = vpack.c.bf16 %v662_v14, %v662_v14  ;;  %v1213_v25 = vpack.c.bf16 %v694_v15, %v694_v15  ;;  %v663_v26 = vmax.f32 %v477_v16, 0.0  ;;  %v695_v27 = vmax.f32 %v605_v17, 0.0 }
 0x107   :  { %v1179_v28 = vpack.c.bf16 %v660_v20, %v660_v20  ;;  %v1211_v29 = vpack.c.bf16 %v692_v21, %v692_v21  ;;  %v661_v30 = vmax.f32 %v469_v22, 0.0  ;;  %v693_v31 = vmax.f32 %v597_v23, 0.0 }
 0x108   :  { %983 = vst.msk [vmem:[%s1836_s3 + $0x58] sm:$0xf] %vm960_vm1, %v1181_v24  ;;  %1015 = vst.msk [vmem:[%s1836_s3 + $0xd8] sm:$0xf] %vm960_vm1, %v1213_v25  ;;  %v1182_v32 = vpack.c.bf16 %v663_v26, %v663_v26  ;;  %v1214_v34 = vpack.c.bf16 %v695_v27, %v695_v27 }
 0x109   :  { %981 = vst.msk [vmem:[%s1836_s3 + $0x50] sm:$0xf] %vm960_vm1, %v1179_v28  ;;  %1013 = vst.msk [vmem:[%s1836_s3 + $0xd0] sm:$0xf] %vm960_vm1, %v1211_v29  ;;  %v1180_v35 = vpack.c.bf16 %v661_v30, %v661_v30  ;;  %v1212_v36 = vpack.c.bf16 %v693_v31, %v693_v31  ;;  %v1284_v37 = vpop.f32.mrb[24].mxu0  ;;  %v1316_v38 = vpop.f32.mrb[24].mxu1 }
 0x10a   :  { %984 = vst.msk [vmem:[%s1836_s3 + $0x5c] sm:$0xf] %vm960_vm1, %v1182_v32  ;;  %1016 = vst.msk [vmem:[%s1836_s3 + $0xdc] sm:$0xf] %vm960_vm1, %v1214_v34  ;;  %v490_v39 = vadd.f32 %v1284_v37, %v1511_v33  ;;  %v618_v40 = vadd.f32 %v1316_v38, %v1511_v33  ;;  %v481_v41 = vpop.f32.mrb[25].mxu0  ;;  %v609_v42 = vpop.f32.mrb[25].mxu1 }
 0x10b   :  { %982 = vst.msk [vmem:[%s1836_s3 + $0x54] sm:$0xf] %vm960_vm1, %v1180_v35  ;;  %1014 = vst.msk [vmem:[%s1836_s3 + $0xd4] sm:$0xf] %vm960_vm1, %v1212_v36  ;;  %v482_v43 = vadd.f32 %v1511_v33, %v481_v41  ;;  %v610_v44 = vadd.f32 %v1511_v33, %v609_v42  ;;  %v1285_v45 = vpop.f32.mrb[26].mxu0  ;;  %v1317_v46 = vpop.f32.mrb[26].mxu1 }
 0x10c   :  { %v666_v47 = vmax.f32 %v490_v39, 0.0  ;;  %v698_v48 = vmax.f32 %v618_v40, 0.0  ;;  %v493_v49 = vadd.f32 %v1285_v45, %v1511_v33  ;;  %v621_v50 = vadd.f32 %v1317_v46, %v1511_v33  ;;  %v484_v51 = vpop.f32.mrb[27].mxu0  ;;  %v612_v52 = vpop.f32.mrb[27].mxu1 }
 0x10d   :  { %v664_v53 = vmax.f32 %v482_v43, 0.0  ;;  %v696_v54 = vmax.f32 %v610_v44, 0.0  ;;  %v485_v55 = vadd.f32 %v1511_v33, %v484_v51  ;;  %v613_v56 = vadd.f32 %v1511_v33, %v612_v52 }
 0x10e   :  { %v1185_v57 = vpack.c.bf16 %v666_v47, %v666_v47  ;;  %v1217_v58 = vpack.c.bf16 %v698_v48, %v698_v48  ;;  %v667_v59 = vmax.f32 %v493_v49, 0.0  ;;  %v699_v60 = vmax.f32 %v621_v50, 0.0 }
 0x10f   :  { %v1183_v61 = vpack.c.bf16 %v664_v53, %v664_v53  ;;  %v1215_v62 = vpack.c.bf16 %v696_v54, %v696_v54  ;;  %v665_v63 = vmax.f32 %v485_v55, 0.0  ;;  %v697_v0 = vmax.f32 %v613_v56, 0.0 }
 0x110   :  { %987 = vst.msk [vmem:[%s1836_s3 + $0x68] sm:$0xf] %vm960_vm1, %v1185_v57  ;;  %1019 = vst.msk [vmem:[%s1836_s3 + $0xe8] sm:$0xf] %vm960_vm1, %v1217_v58  ;;  %v1186_v1 = vpack.c.bf16 %v667_v59, %v667_v59  ;;  %v1218_v2 = vpack.c.bf16 %v699_v60, %v699_v60 }
 0x111   :  { %985 = vst.msk [vmem:[%s1836_s3 + $0x60] sm:$0xf] %vm960_vm1, %v1183_v61  ;;  %1017 = vst.msk [vmem:[%s1836_s3 + $0xe0] sm:$0xf] %vm960_vm1, %v1215_v62  ;;  %v1184_v3 = vpack.c.bf16 %v665_v63, %v665_v63  ;;  %v1216_v4 = vpack.c.bf16 %v697_v0, %v697_v0  ;;  %v1288_v5 = vpop.f32.mrb[28].mxu0  ;;  %v1320_v6 = vpop.f32.mrb[28].mxu1 }
 0x112   :  { %988 = vst.msk [vmem:[%s1836_s3 + $0x6c] sm:$0xf] %vm960_vm1, %v1186_v1  ;;  %1020 = vst.msk [vmem:[%s1836_s3 + $0xec] sm:$0xf] %vm960_vm1, %v1218_v2  ;;  %v506_v7 = vadd.f32 %v1288_v5, %v1511_v33  ;;  %v634_v8 = vadd.f32 %v1320_v6, %v1511_v33  ;;  %v497_v9 = vpop.f32.mrb[29].mxu0  ;;  %v625_v10 = vpop.f32.mrb[29].mxu1 }
 0x113   :  { %986 = vst.msk [vmem:[%s1836_s3 + $0x64] sm:$0xf] %vm960_vm1, %v1184_v3  ;;  %1018 = vst.msk [vmem:[%s1836_s3 + $0xe4] sm:$0xf] %vm960_vm1, %v1216_v4  ;;  %v498_v11 = vadd.f32 %v1511_v33, %v497_v9  ;;  %v626_v12 = vadd.f32 %v1511_v33, %v625_v10  ;;  %v1289_v13 = vpop.f32.mrb[30].mxu0  ;;  %v1321_v14 = vpop.f32.mrb[30].mxu1 }
 0x114   :  { %v670_v15 = vmax.f32 %v506_v7, 0.0  ;;  %v702_v16 = vmax.f32 %v634_v8, 0.0  ;;  %v509_v17 = vadd.f32 %v1289_v13, %v1511_v33  ;;  %v637_v18 = vadd.f32 %v1321_v14, %v1511_v33  ;;  %v500_v19 = vpop.f32.mrb[31].mxu0  ;;  %v628_v20 = vpop.f32.mrb[31].mxu1 }
 0x115   :  { %v668_v21 = vmax.f32 %v498_v11, 0.0  ;;  %v700_v22 = vmax.f32 %v626_v12, 0.0  ;;  %v501_v23 = vadd.f32 %v1511_v33, %v500_v19  ;;  %v629_v24 = vadd.f32 %v1511_v33, %v628_v20 }
 0x116   :  { %v1189_v25 = vpack.c.bf16 %v670_v15, %v670_v15  ;;  %v1221_v26 = vpack.c.bf16 %v702_v16, %v702_v16  ;;  %v671_v27 = vmax.f32 %v509_v17, 0.0  ;;  %v703_v28 = vmax.f32 %v637_v18, 0.0 }
 0x117   :  { %v1187_v29 = vpack.c.bf16 %v668_v21, %v668_v21  ;;  %v1219_v30 = vpack.c.bf16 %v700_v22, %v700_v22  ;;  %v669_v31 = vmax.f32 %v501_v23, 0.0  ;;  %v701_v32 = vmax.f32 %v629_v24, 0.0 }
 0x118   :  { %991 = vst.msk [vmem:[%s1836_s3 + $0x78] sm:$0xf] %vm960_vm1, %v1189_v25  ;;  %1023 = vst.msk [vmem:[%s1836_s3 + $0xf8] sm:$0xf] %vm960_vm1, %v1221_v26  ;;  %v1190_v34 = vpack.c.bf16 %v671_v27, %v671_v27  ;;  %v1222_v33 = vpack.c.bf16 %v703_v28, %v703_v28 }
 0x119   :  { %989 = vst.msk [vmem:[%s1836_s3 + $0x70] sm:$0xf] %vm960_vm1, %v1187_v29  ;;  %1021 = vst.msk [vmem:[%s1836_s3 + $0xf0] sm:$0xf] %vm960_vm1, %v1219_v30  ;;  %v1188_v35 = vpack.c.bf16 %v669_v31, %v669_v31  ;;  %v1220_v36 = vpack.c.bf16 %v701_v32, %v701_v32 }
 0x11a   :  { %992 = vst.msk [vmem:[%s1836_s3 + $0x7c] sm:$0xf] %vm960_vm1, %v1190_v34  ;;  %1024 = vst.msk [vmem:[%s1836_s3 + $0xfc] sm:$0xf] %vm960_vm1, %v1222_v33 }
 0x11b   :  { %990 = vst.msk [vmem:[%s1836_s3 + $0x74] sm:$0xf] %vm960_vm1, %v1188_v35  ;;  %1022 = vst.msk [vmem:[%s1836_s3 + $0xf4] sm:$0xf] %vm960_vm1, %v1220_v36 }

// kernel: bottleneck_forward.5
= control target key start
LH: loop header
LB: loop body
LE: loop exit
PB: predicated region body
PF: predicated region fallthrough
CT: control target
= control target key end

     0   :  { %vm347_vm0 = vcmask 1041408   ;;  %vm250_vm1 = vcmask 31744   ;;  %vm896_vm2 = vcmask 130048   ;;  %s1901_s1 = inlined_call_operand.vmem [shape: bf16[4,16], index: 1, kind: input, shape index: {}]   ;;  %s1902_s0 = inlined_call_operand.vmem [shape: bf16[512,4], index: 0, kind: input, shape index: {}]   ;;  %s1903_s3 = inlined_call_operand.vmem [shape: bf16[512,16], index: 3, kind: input, shape index: {}]   ;;  %s1904_s2 = inlined_call_operand.vmem [shape: f32[1,16], index: 2, kind: input, shape index: {}]   ;;  %s1905_s4 = inlined_call_operand.vmem [shape: f32[512,16], index: 4, kind: output, shape index: {}]  }
   0x1   :  { %v82_v0 = vld [vmem:[%s1901_s1] sm:$0x3]  ;;  %v1294_v4 = vld [vmem:[%s1902_s0 + $0x8] sm:$0xff]   ;;  %v1296_v6 = vld [vmem:[%s1902_s0 + $0x10] sm:$0xff]  }
   0x2   :  { %1290 = vmatprep.subr.msk.bf16.mxu0 %vm347_vm0, %v82_v0  ;;  %1291 = vmatprep.subr.msk.bf16.mxu1 %vm347_vm0, %v82_v0  ;;  %v349_v1 = vsel %vm347_vm0, %v82_v0, 0  ;;  %v1292_v2 = vld [vmem:[%s1902_s0] sm:$0xff]   ;;  %v1295_v5 = vld [vmem:[%s1902_s0 + $0x88] sm:$0xff]   ;;  %v1297_v7 = vld [vmem:[%s1902_s0 + $0x90] sm:$0xff]  }
   0x3   :  { %1223 = vmatpush3.bf16.msra.mxu0 %v349_v1  ;;  %1289 = vmatpush3.bf16.msra.mxu1 %v349_v1  ;;  %v1293_v3 = vld [vmem:[%s1902_s0 + $0x80] sm:$0xff]   ;;  %v1298_v8 = vld [vmem:[%s1902_s0 + $0x18] sm:$0xff]   ;;  %v1302_v12 = vld [vmem:[%s1902_s0 + $0x28] sm:$0xff]  }
   0x4   :  { %1224 = vmatprep.mubr.msk.bf16.mxu0 %vm250_vm1, %v1292_v2  ;;  %1256 = vmatprep.mubr.msk.bf16.mxu1 %vm250_vm1, %v1293_v3  ;;  %v1299_v9 = vld [vmem:[%s1902_s0 + $0x98] sm:$0xff]   ;;  %v1300_v10 = vld [vmem:[%s1902_s0 + $0x20] sm:$0xff]   ;;  %v1303_v13 = vld [vmem:[%s1902_s0 + $0xa8] sm:$0xff]  }
   0x5   :  { %v1301_v11 = vld [vmem:[%s1902_s0 + $0xa0] sm:$0xff]   ;;  %v1304_v14 = vld [vmem:[%s1902_s0 + $0x30] sm:$0xff]   ;;  %v1306_v16 = vld [vmem:[%s1902_s0 + $0x38] sm:$0xff]  }
   0x6   :  { %1225 = vmatmul.mubr.msk.bf16.vlgmr.msra.gmra.mrb[0].mxu0 %vm250_vm1, %v1294_v4  ;;  %1257 = vmatmul.mubr.msk.bf16.vlgmr.msra.gmra.mrb[0].mxu1 %vm250_vm1, %v1295_v5  ;;  %v1305_v15 = vld [vmem:[%s1902_s0 + $0xb0] sm:$0xff]   ;;  %v1307_v17 = vld [vmem:[%s1902_s0 + $0xb8] sm:$0xff]   ;;  %v1308_v18 = vld [vmem:[%s1902_s0 + $0x40] sm:$0xff]  }
   0x7   :  { %1228 = vmatprep.mubr.msk.bf16.mxu0 %vm250_vm1, %v1296_v6  ;;  %1260 = vmatprep.mubr.msk.bf16.mxu1 %vm250_vm1, %v1297_v7  ;;  %v1309_v19 = vld [vmem:[%s1902_s0 + $0xc0] sm:$0xff]   ;;  %v1310_v20 = vld [vmem:[%s1902_s0 + $0x48] sm:$0xff]   ;;  %v1312_v22 = vld [vmem:[%s1902_s0 + $0x50] sm:$0xff]  }
   0x8   :  { %v1311_v21 = vld [vmem:[%s1902_s0 + $0xc8] sm:$0xff]   ;;  %v1313_v23 = vld [vmem:[%s1902_s0 + $0xd0] sm:$0xff]   ;;  %v1314_v24 = vld [vmem:[%s1902_s0 + $0x58] sm:$0xff]  }
   0x9   :  { %v1315_v25 = vld [vmem:[%s1902_s0 + $0xd8] sm:$0xff]   ;;  %v1316_v26 = vld [vmem:[%s1902_s0 + $0x60] sm:$0xff]   ;;  %v1318_v28 = vld [vmem:[%s1902_s0 + $0x68] sm:$0xff]  }
   0xa   :  { %v1317_v27 = vld [vmem:[%s1902_s0 + $0xe0] sm:$0xff]   ;;  %v1319_v29 = vld [vmem:[%s1902_s0 + $0xe8] sm:$0xff]   ;;  %v1320_v30 = vld [vmem:[%s1902_s0 + $0x70] sm:$0xff]  }
   0xb   :  { %v1321_v31 = vld [vmem:[%s1902_s0 + $0xf0] sm:$0xff]   ;;  %v1322_v32 = vld [vmem:[%s1902_s0 + $0x78] sm:$0xff]   ;;  %v1158_v34 = vld [vmem:[%s1903_s3 + $0x8] sm:$0xff]  }
   0xc   :  { %v1323_v33 = vld [vmem:[%s1902_s0 + $0xf8] sm:$0xff]   ;;  %v1174_v35 = vld [vmem:[%s1903_s3 + $0x88] sm:$0xff]   ;;  %v1031_v36 = vld [vmem:[%s1903_s3] sm:$0xff]   ;;  %v1036_v39 = vunpack.c.l.bf16 %v1158_v34  ;;  %v1037_v47 = vunpack.c.h.bf16 %v1158_v34 }
   0xd   :  { %v1492_v37 = vld [vmem:[%s1904_s2] ss:$0 sm:$0xff]  ;;  %v1100_v41 = vunpack.c.l.bf16 %v1174_v35  ;;  %v1032_v42 = vunpack.c.l.bf16 %v1031_v36  ;;  %v1101_v48 = vunpack.c.h.bf16 %v1174_v35  ;;  %v1033_v53 = vunpack.c.h.bf16 %v1031_v36  ;;  %v1160_v1 = vld [vmem:[%s1903_s3 + $0x18] sm:$0xff]   ;;  %v1159_v7 = vld [vmem:[%s1903_s3 + $0x10] sm:$0xff]  }
   0xe   :  { %1229 = vmatmul.mubr.msk.bf16.gmra.mrb[4].mxu0 %vm250_vm1, %v1298_v8  ;;  %1261 = vmatmul.mubr.msk.bf16.gmra.mrb[4].mxu1 %vm250_vm1, %v1299_v9  ;;  %v1173_v38 = vld [vmem:[%s1903_s3 + $0x80] sm:$0xff]   ;;  %v1176_v6 = vld [vmem:[%s1903_s3 + $0x98] sm:$0xff]  }
   0xf   :  { %1232 = vmatprep.mubr.msk.bf16.mxu0 %vm250_vm1, %v1300_v10  ;;  %1264 = vmatprep.mubr.msk.bf16.mxu1 %vm250_vm1, %v1301_v11  ;;  %v1096_v46 = vunpack.c.l.bf16 %v1173_v38  ;;  %v1097_v59 = vunpack.c.h.bf16 %v1173_v38 }
  0x16   :  { %1233 = vmatmul.mubr.msk.bf16.gmra.mrb[8].mxu0 %vm250_vm1, %v1302_v12  ;;  %1265 = vmatmul.mubr.msk.bf16.gmra.mrb[8].mxu1 %vm250_vm1, %v1303_v13  ;;  %v1175_v12 = vld [vmem:[%s1903_s3 + $0x90] sm:$0xff]  }
  0x17   :  { %1236 = vmatprep.mubr.msk.bf16.mxu0 %vm250_vm1, %v1304_v14  ;;  %1268 = vmatprep.mubr.msk.bf16.mxu1 %vm250_vm1, %v1305_v15 }
  0x1e   :  { %1237 = vmatmul.mubr.msk.bf16.gmra.mrb[12].mxu0 %vm250_vm1, %v1306_v16  ;;  %1269 = vmatmul.mubr.msk.bf16.gmra.mrb[12].mxu1 %vm250_vm1, %v1307_v17  ;;  %v1044_v16 = vunpack.c.l.bf16 %v1160_v1 }
  0x1f   :  { %1240 = vmatprep.mubr.msk.bf16.mxu0 %vm250_vm1, %v1308_v18  ;;  %1272 = vmatprep.mubr.msk.bf16.mxu1 %vm250_vm1, %v1309_v19 }
  0x26   :  { %1241 = vmatmul.mubr.msk.bf16.gmra.mrb[16].mxu0 %vm250_vm1, %v1310_v20  ;;  %1273 = vmatmul.mubr.msk.bf16.gmra.mrb[16].mxu1 %vm250_vm1, %v1311_v21  ;;  %v1108_v20 = vunpack.c.l.bf16 %v1176_v6  ;;  %v1040_v21 = vunpack.c.l.bf16 %v1159_v7 }
  0x27   :  { %1244 = vmatprep.mubr.msk.bf16.mxu0 %vm250_vm1, %v1312_v22  ;;  %1276 = vmatprep.mubr.msk.bf16.mxu1 %vm250_vm1, %v1313_v23 }
  0x2e   :  { %1245 = vmatmul.mubr.msk.bf16.gmra.mrb[20].mxu0 %vm250_vm1, %v1314_v24  ;;  %1277 = vmatmul.mubr.msk.bf16.gmra.mrb[20].mxu1 %vm250_vm1, %v1315_v25 }
  0x2f   :  { %1248 = vmatprep.mubr.msk.bf16.mxu0 %vm250_vm1, %v1316_v26  ;;  %1280 = vmatprep.mubr.msk.bf16.mxu1 %vm250_vm1, %v1317_v27  ;;  %v1104_v26 = vunpack.c.l.bf16 %v1175_v12  ;;  %v1045_v27 = vunpack.c.h.bf16 %v1160_v1 }
  0x36   :  { %1249 = vmatmul.mubr.msk.bf16.gmra.mrb[24].mxu0 %vm250_vm1, %v1318_v28  ;;  %1281 = vmatmul.mubr.msk.bf16.gmra.mrb[24].mxu1 %vm250_vm1, %v1319_v29 }
  0x37   :  { %1252 = vmatprep.mubr.msk.bf16.mxu0 %vm250_vm1, %v1320_v30  ;;  %1284 = vmatprep.mubr.msk.bf16.mxu1 %vm250_vm1, %v1321_v31 }
  0x3e   :  { %1253 = vmatmul.mubr.msk.bf16.gmra.mrb[28].mxu0 %vm250_vm1, %v1322_v32  ;;  %1285 = vmatmul.mubr.msk.bf16.gmra.mrb[28].mxu1 %vm250_vm1, %v1323_v33  ;;  %v1109_v32 = vunpack.c.h.bf16 %v1176_v6  ;;  %v1041_v33 = vunpack.c.h.bf16 %v1159_v7 }
  0xd9   :  { %v1226_v40 = vpop.f32.mrb[0].mxu0  ;;  %v1258_v44 = vpop.f32.mrb[0].mxu1 }
  0xda   :  { %v394_v43 = vadd.f32 %v1226_v40, %v1492_v37  ;;  %v385_v45 = vpop.f32.mrb[1].mxu0  ;;  %v522_v49 = vadd.f32 %v1258_v44, %v1492_v37  ;;  %v513_v51 = vpop.f32.mrb[1].mxu1  ;;  %v1105_v40 = vunpack.c.h.bf16 %v1175_v12 }
  0xdb   :  { %v386_v50 = vadd.f32 %v1492_v37, %v385_v45  ;;  %v1227_v52 = vpop.f32.mrb[2].mxu0  ;;  %v514_v55 = vadd.f32 %v1492_v37, %v513_v51  ;;  %v1259_v57 = vpop.f32.mrb[2].mxu1  ;;  %v1178_v51 = vld [vmem:[%s1903_s3 + $0xa8] sm:$0xff]  }
  0xdc   :  { %v770_v54 = vadd.f32 %v1036_v39, %v394_v43  ;;  %v397_v56 = vadd.f32 %v1227_v52, %v1492_v37  ;;  %v388_v58 = vpop.f32.mrb[3].mxu0  ;;  %v802_v60 = vadd.f32 %v1100_v41, %v522_v49  ;;  %v525_v62 = vadd.f32 %v1259_v57, %v1492_v37  ;;  %v516_v0 = vpop.f32.mrb[3].mxu1  ;;  %v1161_v52 = vld [vmem:[%s1903_s3 + $0x20] sm:$0xff]  }
  0xdd   :  { %v768_v61 = vadd.f32 %v1032_v42, %v386_v50  ;;  %v389_v63 = vadd.f32 %v1492_v37, %v388_v58  ;;  %v800_v3 = vadd.f32 %v1096_v46, %v514_v55  ;;  %v517_v5 = vadd.f32 %v1492_v37, %v516_v0  ;;  %v1162_v46 = vld [vmem:[%s1903_s3 + $0x28] sm:$0xff]   ;;  %v1177_v57 = vld [vmem:[%s1903_s3 + $0xa0] sm:$0xff]  }
  0xde   :  { %v834_v2 = vmax.f32 %v770_v54, 0.0  ;;  %v771_v4 = vadd.f32 %v1037_v47, %v397_v56  ;;  %v866_v8 = vmax.f32 %v802_v60, 0.0  ;;  %v803_v10 = vadd.f32 %v1101_v48, %v525_v62 }
  0xdf   :  { %v832_v9 = vmax.f32 %v768_v61, 0.0  ;;  %v769_v11 = vadd.f32 %v1033_v53, %v389_v63  ;;  %v864_v13 = vmax.f32 %v800_v3, 0.0  ;;  %v801_v15 = vadd.f32 %v1097_v59, %v517_v5 }
  0xe0   :  { %899 = vst.msk [vmem:[%s1905_s4 + $0x10] sm:$0xff] %vm896_vm2, %v834_v2  ;;  %v835_v14 = vmax.f32 %v771_v4, 0.0  ;;  %931 = vst.msk [vmem:[%s1905_s4 + $0x110] sm:$0xff] %vm896_vm2, %v866_v8  ;;  %v867_v17 = vmax.f32 %v803_v10, 0.0  ;;  %v1052_v61 = vunpack.c.l.bf16 %v1162_v46  ;;  %v1116_v1 = vunpack.c.l.bf16 %v1178_v51 }
  0xe1   :  { %897 = vst.msk [vmem:[%s1905_s4] sm:$0xff] %vm896_vm2, %v832_v9  ;;  %v833_v18 = vmax.f32 %v769_v11, 0.0  ;;  %v1230_v19 = vpop.f32.mrb[4].mxu0  ;;  %929 = vst.msk [vmem:[%s1905_s4 + $0x100] sm:$0xff] %vm896_vm2, %v864_v13  ;;  %v865_v22 = vmax.f32 %v801_v15, 0.0  ;;  %v1262_v24 = vpop.f32.mrb[4].mxu1  ;;  %v1048_v2 = vunpack.c.l.bf16 %v1161_v52  ;;  %v1112_v7 = vunpack.c.l.bf16 %v1177_v57 }
  0xe2   :  { %900 = vst.msk [vmem:[%s1905_s4 + $0x18] sm:$0xff] %vm896_vm2, %v835_v14  ;;  %v410_v23 = vadd.f32 %v1230_v19, %v1492_v37  ;;  %v401_v25 = vpop.f32.mrb[5].mxu0  ;;  %932 = vst.msk [vmem:[%s1905_s4 + $0x118] sm:$0xff] %vm896_vm2, %v867_v17  ;;  %v538_v28 = vadd.f32 %v1262_v24, %v1492_v37  ;;  %v529_v30 = vpop.f32.mrb[5].mxu1  ;;  %v1053_v8 = vunpack.c.h.bf16 %v1162_v46  ;;  %v1117_v13 = vunpack.c.h.bf16 %v1178_v51 }
  0xe3   :  { %898 = vst.msk [vmem:[%s1905_s4 + $0x8] sm:$0xff] %vm896_vm2, %v833_v18  ;;  %v402_v29 = vadd.f32 %v1492_v37, %v401_v25  ;;  %v1231_v31 = vpop.f32.mrb[6].mxu0  ;;  %930 = vst.msk [vmem:[%s1905_s4 + $0x108] sm:$0xff] %vm896_vm2, %v865_v22  ;;  %v530_v35 = vadd.f32 %v1492_v37, %v529_v30  ;;  %v1263_v38 = vpop.f32.mrb[6].mxu1  ;;  %v1049_v14 = vunpack.c.h.bf16 %v1161_v52 }
  0xe4   :  { %v774_v34 = vadd.f32 %v1044_v16, %v410_v23  ;;  %v413_v36 = vadd.f32 %v1231_v31, %v1492_v37  ;;  %v404_v39 = vpop.f32.mrb[7].mxu0  ;;  %v806_v41 = vadd.f32 %v1108_v20, %v538_v28  ;;  %v541_v43 = vadd.f32 %v1263_v38, %v1492_v37  ;;  %v532_v45 = vpop.f32.mrb[7].mxu1  ;;  %v1180_v31 = vld [vmem:[%s1903_s3 + $0xb8] sm:$0xff]   ;;  %v1179_v38 = vld [vmem:[%s1903_s3 + $0xb0] sm:$0xff]  }
  0xe5   :  { %v772_v42 = vadd.f32 %v1040_v21, %v402_v29  ;;  %v405_v44 = vadd.f32 %v1492_v37, %v404_v39  ;;  %v804_v48 = vadd.f32 %v1104_v26, %v530_v35  ;;  %v533_v50 = vadd.f32 %v1492_v37, %v532_v45  ;;  %v1164_v26 = vld [vmem:[%s1903_s3 + $0x38] sm:$0xff]  }
  0xe6   :  { %v838_v47 = vmax.f32 %v774_v34, 0.0  ;;  %v775_v49 = vadd.f32 %v1045_v27, %v413_v36  ;;  %v870_v53 = vmax.f32 %v806_v41, 0.0  ;;  %v807_v55 = vadd.f32 %v1109_v32, %v541_v43  ;;  %v1163_v32 = vld [vmem:[%s1903_s3 + $0x30] sm:$0xff]  }
  0xe7   :  { %v836_v54 = vmax.f32 %v772_v42, 0.0  ;;  %v773_v56 = vadd.f32 %v1041_v33, %v405_v44  ;;  %v868_v58 = vmax.f32 %v804_v48, 0.0  ;;  %v805_v60 = vadd.f32 %v1105_v40, %v533_v50 }
  0xe8   :  { %903 = vst.msk [vmem:[%s1905_s4 + $0x30] sm:$0xff] %vm896_vm2, %v838_v47  ;;  %v839_v59 = vmax.f32 %v775_v49, 0.0  ;;  %935 = vst.msk [vmem:[%s1905_s4 + $0x130] sm:$0xff] %vm896_vm2, %v870_v53  ;;  %v871_v62 = vmax.f32 %v807_v55, 0.0  ;;  %v1113_v20 = vunpack.c.h.bf16 %v1177_v57  ;;  %v1060_v42 = vunpack.c.l.bf16 %v1164_v26 }
  0xe9   :  { %901 = vst.msk [vmem:[%s1905_s4 + $0x20] sm:$0xff] %vm896_vm2, %v836_v54  ;;  %v837_v63 = vmax.f32 %v773_v56, 0.0  ;;  %v1234_v0 = vpop.f32.mrb[8].mxu0  ;;  %933 = vst.msk [vmem:[%s1905_s4 + $0x120] sm:$0xff] %vm896_vm2, %v868_v58  ;;  %v869_v3 = vmax.f32 %v805_v60, 0.0  ;;  %v1266_v5 = vpop.f32.mrb[8].mxu1  ;;  %v1124_v46 = vunpack.c.l.bf16 %v1180_v31  ;;  %v1056_v47 = vunpack.c.l.bf16 %v1163_v32 }
  0xea   :  { %904 = vst.msk [vmem:[%s1905_s4 + $0x38] sm:$0xff] %vm896_vm2, %v839_v59  ;;  %v426_v4 = vadd.f32 %v1234_v0, %v1492_v37  ;;  %v417_v6 = vpop.f32.mrb[9].mxu0  ;;  %936 = vst.msk [vmem:[%s1905_s4 + $0x138] sm:$0xff] %vm896_vm2, %v871_v62  ;;  %v554_v9 = vadd.f32 %v1266_v5, %v1492_v37  ;;  %v545_v11 = vpop.f32.mrb[9].mxu1  ;;  %v1120_v52 = vunpack.c.l.bf16 %v1179_v38  ;;  %v1061_v53 = vunpack.c.h.bf16 %v1164_v26 }
  0xeb   :  { %902 = vst.msk [vmem:[%s1905_s4 + $0x28] sm:$0xff] %vm896_vm2, %v837_v63  ;;  %v418_v10 = vadd.f32 %v1492_v37, %v417_v6  ;;  %v1235_v12 = vpop.f32.mrb[10].mxu0  ;;  %934 = vst.msk [vmem:[%s1905_s4 + $0x128] sm:$0xff] %vm896_vm2, %v869_v3  ;;  %v546_v16 = vadd.f32 %v1492_v37, %v545_v11  ;;  %v1267_v18 = vpop.f32.mrb[10].mxu1  ;;  %v1125_v58 = vunpack.c.h.bf16 %v1180_v31  ;;  %v1057_v59 = vunpack.c.h.bf16 %v1163_v32 }
  0xec   :  { %v778_v15 = vadd.f32 %v1052_v61, %v426_v4  ;;  %v429_v17 = vadd.f32 %v1235_v12, %v1492_v37  ;;  %v420_v19 = vpop.f32.mrb[11].mxu0  ;;  %v810_v21 = vadd.f32 %v1116_v1, %v554_v9  ;;  %v557_v23 = vadd.f32 %v1267_v18, %v1492_v37  ;;  %v548_v25 = vpop.f32.mrb[11].mxu1  ;;  %v1182_v12 = vld [vmem:[%s1903_s3 + $0xc8] sm:$0xff]   ;;  %v1181_v18 = vld [vmem:[%s1903_s3 + $0xc0] sm:$0xff]  }
  0xed   :  { %v776_v22 = vadd.f32 %v1048_v2, %v418_v10  ;;  %v421_v24 = vadd.f32 %v1492_v37, %v420_v19  ;;  %v808_v28 = vadd.f32 %v1112_v7, %v546_v16  ;;  %v549_v30 = vadd.f32 %v1492_v37, %v548_v25  ;;  %v1166_v7 = vld [vmem:[%s1903_s3 + $0x48] sm:$0xff]  }
  0xee   :  { %v842_v27 = vmax.f32 %v778_v15, 0.0  ;;  %v779_v29 = vadd.f32 %v1053_v8, %v429_v17  ;;  %v874_v33 = vmax.f32 %v810_v21, 0.0  ;;  %v811_v35 = vadd.f32 %v1117_v13, %v557_v23  ;;  %v1165_v13 = vld [vmem:[%s1903_s3 + $0x40] sm:$0xff]  }
  0xef   :  { %v840_v34 = vmax.f32 %v776_v22, 0.0  ;;  %v777_v36 = vadd.f32 %v1049_v14, %v421_v24  ;;  %v872_v39 = vmax.f32 %v808_v28, 0.0  ;;  %v809_v41 = vadd.f32 %v1113_v20, %v549_v30 }
  0xf0   :  { %907 = vst.msk [vmem:[%s1905_s4 + $0x50] sm:$0xff] %vm896_vm2, %v842_v27  ;;  %v843_v40 = vmax.f32 %v779_v29, 0.0  ;;  %939 = vst.msk [vmem:[%s1905_s4 + $0x150] sm:$0xff] %vm896_vm2, %v874_v33  ;;  %v875_v43 = vmax.f32 %v811_v35, 0.0  ;;  %v1121_v1 = vunpack.c.h.bf16 %v1179_v38  ;;  %v1068_v22 = vunpack.c.l.bf16 %v1166_v7 }
  0xf1   :  { %905 = vst.msk [vmem:[%s1905_s4 + $0x40] sm:$0xff] %vm896_vm2, %v840_v34  ;;  %v841_v44 = vmax.f32 %v777_v36, 0.0  ;;  %v1238_v45 = vpop.f32.mrb[12].mxu0  ;;  %937 = vst.msk [vmem:[%s1905_s4 + $0x140] sm:$0xff] %vm896_vm2, %v872_v39  ;;  %v873_v48 = vmax.f32 %v809_v41, 0.0  ;;  %v1270_v50 = vpop.f32.mrb[12].mxu1  ;;  %v1132_v26 = vunpack.c.l.bf16 %v1182_v12  ;;  %v1064_v27 = vunpack.c.l.bf16 %v1165_v13 }
  0xf2   :  { %908 = vst.msk [vmem:[%s1905_s4 + $0x58] sm:$0xff] %vm896_vm2, %v843_v40  ;;  %v442_v49 = vadd.f32 %v1238_v45, %v1492_v37  ;;  %v433_v51 = vpop.f32.mrb[13].mxu0  ;;  %940 = vst.msk [vmem:[%s1905_s4 + $0x158] sm:$0xff] %vm896_vm2, %v875_v43  ;;  %v570_v54 = vadd.f32 %v1270_v50, %v1492_v37  ;;  %v561_v56 = vpop.f32.mrb[13].mxu1  ;;  %v1128_v32 = vunpack.c.l.bf16 %v1181_v18  ;;  %v1069_v33 = vunpack.c.h.bf16 %v1166_v7 }
  0xf3   :  { %906 = vst.msk [vmem:[%s1905_s4 + $0x48] sm:$0xff] %vm896_vm2, %v841_v44  ;;  %v434_v55 = vadd.f32 %v1492_v37, %v433_v51  ;;  %v1239_v57 = vpop.f32.mrb[14].mxu0  ;;  %938 = vst.msk [vmem:[%s1905_s4 + $0x148] sm:$0xff] %vm896_vm2, %v873_v48  ;;  %v562_v61 = vadd.f32 %v1492_v37, %v561_v56  ;;  %v1271_v63 = vpop.f32.mrb[14].mxu1  ;;  %v1133_v39 = vunpack.c.h.bf16 %v1182_v12  ;;  %v1065_v40 = vunpack.c.h.bf16 %v1165_v13 }
  0xf4   :  { %v782_v60 = vadd.f32 %v1060_v42, %v442_v49  ;;  %v445_v62 = vadd.f32 %v1239_v57, %v1492_v37  ;;  %v436_v0 = vpop.f32.mrb[15].mxu0  ;;  %v814_v2 = vadd.f32 %v1124_v46, %v570_v54  ;;  %v573_v4 = vadd.f32 %v1271_v63, %v1492_v37  ;;  %v564_v6 = vpop.f32.mrb[15].mxu1  ;;  %v1184_v57 = vld [vmem:[%s1903_s3 + $0xd8] sm:$0xff]   ;;  %v1183_v63 = vld [vmem:[%s1903_s3 + $0xd0] sm:$0xff]  }
  0xf5   :  { %v780_v3 = vadd.f32 %v1056_v47, %v434_v55  ;;  %v437_v5 = vadd.f32 %v1492_v37, %v436_v0  ;;  %v812_v9 = vadd.f32 %v1120_v52, %v562_v61  ;;  %v565_v11 = vadd.f32 %v1492_v37, %v564_v6  ;;  %v1168_v52 = vld [vmem:[%s1903_s3 + $0x58] sm:$0xff]  }
  0xf6   :  { %v846_v8 = vmax.f32 %v782_v60, 0.0  ;;  %v783_v10 = vadd.f32 %v1061_v53, %v445_v62  ;;  %v878_v14 = vmax.f32 %v814_v2, 0.0  ;;  %v815_v16 = vadd.f32 %v1125_v58, %v573_v4  ;;  %v1167_v58 = vld [vmem:[%s1903_s3 + $0x50] sm:$0xff]  }
  0xf7   :  { %v844_v15 = vmax.f32 %v780_v3, 0.0  ;;  %v781_v17 = vadd.f32 %v1057_v59, %v437_v5  ;;  %v876_v19 = vmax.f32 %v812_v9, 0.0  ;;  %v813_v21 = vadd.f32 %v1121_v1, %v565_v11 }
  0xf8   :  { %911 = vst.msk [vmem:[%s1905_s4 + $0x70] sm:$0xff] %vm896_vm2, %v846_v8  ;;  %v847_v20 = vmax.f32 %v783_v10, 0.0  ;;  %943 = vst.msk [vmem:[%s1905_s4 + $0x170] sm:$0xff] %vm896_vm2, %v878_v14  ;;  %v879_v23 = vmax.f32 %v815_v16, 0.0  ;;  %v1129_v46 = vunpack.c.h.bf16 %v1181_v18  ;;  %v1076_v3 = vunpack.c.l.bf16 %v1168_v52 }
  0xf9   :  { %909 = vst.msk [vmem:[%s1905_s4 + $0x60] sm:$0xff] %vm896_vm2, %v844_v15  ;;  %v845_v24 = vmax.f32 %v781_v17, 0.0  ;;  %v1242_v25 = vpop.f32.mrb[16].mxu0  ;;  %941 = vst.msk [vmem:[%s1905_s4 + $0x160] sm:$0xff] %vm896_vm2, %v876_v19  ;;  %v877_v28 = vmax.f32 %v813_v21, 0.0  ;;  %v1274_v30 = vpop.f32.mrb[16].mxu1  ;;  %v1140_v7 = vunpack.c.l.bf16 %v1184_v57  ;;  %v1072_v8 = vunpack.c.l.bf16 %v1167_v58 }
  0xfa   :  { %912 = vst.msk [vmem:[%s1905_s4 + $0x78] sm:$0xff] %vm896_vm2, %v847_v20  ;;  %v458_v29 = vadd.f32 %v1242_v25, %v1492_v37  ;;  %v449_v31 = vpop.f32.mrb[17].mxu0  ;;  %944 = vst.msk [vmem:[%s1905_s4 + $0x178] sm:$0xff] %vm896_vm2, %v879_v23  ;;  %v586_v34 = vadd.f32 %v1274_v30, %v1492_v37  ;;  %v577_v36 = vpop.f32.mrb[17].mxu1  ;;  %v1136_v13 = vunpack.c.l.bf16 %v1183_v63  ;;  %v1077_v14 = vunpack.c.h.bf16 %v1168_v52 }
  0xfb   :  { %910 = vst.msk [vmem:[%s1905_s4 + $0x68] sm:$0xff] %vm896_vm2, %v845_v24  ;;  %v450_v35 = vadd.f32 %v1492_v37, %v449_v31  ;;  %v1243_v38 = vpop.f32.mrb[18].mxu0  ;;  %942 = vst.msk [vmem:[%s1905_s4 + $0x168] sm:$0xff] %vm896_vm2, %v877_v28  ;;  %v578_v42 = vadd.f32 %v1492_v37, %v577_v36  ;;  %v1275_v44 = vpop.f32.mrb[18].mxu1  ;;  %v1141_v19 = vunpack.c.h.bf16 %v1184_v57  ;;  %v1073_v20 = vunpack.c.h.bf16 %v1167_v58 }
  0xfc   :  { %v786_v41 = vadd.f32 %v1068_v22, %v458_v29  ;;  %v461_v43 = vadd.f32 %v1243_v38, %v1492_v37  ;;  %v452_v45 = vpop.f32.mrb[19].mxu0  ;;  %v818_v47 = vadd.f32 %v1132_v26, %v586_v34  ;;  %v589_v49 = vadd.f32 %v1275_v44, %v1492_v37  ;;  %v580_v51 = vpop.f32.mrb[19].mxu1  ;;  %v1186_v38 = vld [vmem:[%s1903_s3 + $0xe8] sm:$0xff]   ;;  %v1185_v44 = vld [vmem:[%s1903_s3 + $0xe0] sm:$0xff]  }
  0xfd   :  { %v784_v48 = vadd.f32 %v1064_v27, %v450_v35  ;;  %v453_v50 = vadd.f32 %v1492_v37, %v452_v45  ;;  %v816_v54 = vadd.f32 %v1128_v32, %v578_v42  ;;  %v581_v56 = vadd.f32 %v1492_v37, %v580_v51  ;;  %v1170_v32 = vld [vmem:[%s1903_s3 + $0x68] sm:$0xff]  }
  0xfe   :  { %v850_v53 = vmax.f32 %v786_v41, 0.0  ;;  %v787_v55 = vadd.f32 %v1069_v33, %v461_v43  ;;  %v882_v59 = vmax.f32 %v818_v47, 0.0  ;;  %v819_v61 = vadd.f32 %v1133_v39, %v589_v49  ;;  %v1169_v39 = vld [vmem:[%s1903_s3 + $0x60] sm:$0xff]  }
  0xff   :  { %v848_v60 = vmax.f32 %v784_v48, 0.0  ;;  %v785_v62 = vadd.f32 %v1065_v40, %v453_v50  ;;  %v880_v0 = vmax.f32 %v816_v54, 0.0  ;;  %v817_v2 = vadd.f32 %v1129_v46, %v581_v56 }
 0x100   :  { %915 = vst.msk [vmem:[%s1905_s4 + $0x90] sm:$0xff] %vm896_vm2, %v850_v53  ;;  %v851_v1 = vmax.f32 %v787_v55, 0.0  ;;  %947 = vst.msk [vmem:[%s1905_s4 + $0x190] sm:$0xff] %vm896_vm2, %v882_v59  ;;  %v883_v4 = vmax.f32 %v819_v61, 0.0  ;;  %v1137_v26 = vunpack.c.h.bf16 %v1183_v63  ;;  %v1084_v48 = vunpack.c.l.bf16 %v1170_v32 }
 0x101   :  { %913 = vst.msk [vmem:[%s1905_s4 + $0x80] sm:$0xff] %vm896_vm2, %v848_v60  ;;  %v849_v5 = vmax.f32 %v785_v62, 0.0  ;;  %v1246_v6 = vpop.f32.mrb[20].mxu0  ;;  %945 = vst.msk [vmem:[%s1905_s4 + $0x180] sm:$0xff] %vm896_vm2, %v880_v0  ;;  %v881_v9 = vmax.f32 %v817_v2, 0.0  ;;  %v1278_v11 = vpop.f32.mrb[20].mxu1  ;;  %v1148_v52 = vunpack.c.l.bf16 %v1186_v38  ;;  %v1080_v53 = vunpack.c.l.bf16 %v1169_v39 }
 0x102   :  { %916 = vst.msk [vmem:[%s1905_s4 + $0x98] sm:$0xff] %vm896_vm2, %v851_v1  ;;  %v474_v10 = vadd.f32 %v1246_v6, %v1492_v37  ;;  %v465_v12 = vpop.f32.mrb[21].mxu0  ;;  %948 = vst.msk [vmem:[%s1905_s4 + $0x198] sm:$0xff] %vm896_vm2, %v883_v4  ;;  %v602_v15 = vadd.f32 %v1278_v11, %v1492_v37  ;;  %v593_v17 = vpop.f32.mrb[21].mxu1  ;;  %v1144_v58 = vunpack.c.l.bf16 %v1185_v44  ;;  %v1085_v59 = vunpack.c.h.bf16 %v1170_v32 }
 0x103   :  { %914 = vst.msk [vmem:[%s1905_s4 + $0x88] sm:$0xff] %vm896_vm2, %v849_v5  ;;  %v466_v16 = vadd.f32 %v1492_v37, %v465_v12  ;;  %v1247_v18 = vpop.f32.mrb[22].mxu0  ;;  %946 = vst.msk [vmem:[%s1905_s4 + $0x188] sm:$0xff] %vm896_vm2, %v881_v9  ;;  %v594_v22 = vadd.f32 %v1492_v37, %v593_v17  ;;  %v1279_v24 = vpop.f32.mrb[22].mxu1  ;;  %v1149_v0 = vunpack.c.h.bf16 %v1186_v38  ;;  %v1081_v1 = vunpack.c.h.bf16 %v1169_v39 }
 0x104   :  { %v790_v21 = vadd.f32 %v1076_v3, %v474_v10  ;;  %v477_v23 = vadd.f32 %v1247_v18, %v1492_v37  ;;  %v468_v25 = vpop.f32.mrb[23].mxu0  ;;  %v822_v27 = vadd.f32 %v1140_v7, %v602_v15  ;;  %v605_v29 = vadd.f32 %v1279_v24, %v1492_v37  ;;  %v596_v31 = vpop.f32.mrb[23].mxu1  ;;  %v1188_v18 = vld [vmem:[%s1903_s3 + $0xf8] sm:$0xff]   ;;  %v1187_v24 = vld [vmem:[%s1903_s3 + $0xf0] sm:$0xff]  }
 0x105   :  { %v788_v28 = vadd.f32 %v1072_v8, %v466_v16  ;;  %v469_v30 = vadd.f32 %v1492_v37, %v468_v25  ;;  %v820_v34 = vadd.f32 %v1136_v13, %v594_v22  ;;  %v597_v36 = vadd.f32 %v1492_v37, %v596_v31  ;;  %v1172_v13 = vld [vmem:[%s1903_s3 + $0x78] sm:$0xff]  }
 0x106   :  { %v854_v33 = vmax.f32 %v790_v21, 0.0  ;;  %v791_v35 = vadd.f32 %v1077_v14, %v477_v23  ;;  %v886_v40 = vmax.f32 %v822_v27, 0.0  ;;  %v823_v42 = vadd.f32 %v1141_v19, %v605_v29  ;;  %v1171_v19 = vld [vmem:[%s1903_s3 + $0x70] sm:$0xff]  }
 0x107   :  { %v852_v41 = vmax.f32 %v788_v28, 0.0  ;;  %v789_v43 = vadd.f32 %v1073_v20, %v469_v30  ;;  %v884_v45 = vmax.f32 %v820_v34, 0.0  ;;  %v821_v47 = vadd.f32 %v1137_v26, %v597_v36 }
 0x108   :  { %919 = vst.msk [vmem:[%s1905_s4 + $0xb0] sm:$0xff] %vm896_vm2, %v854_v33  ;;  %v855_v46 = vmax.f32 %v791_v35, 0.0  ;;  %951 = vst.msk [vmem:[%s1905_s4 + $0x1b0] sm:$0xff] %vm896_vm2, %v886_v40  ;;  %v887_v49 = vmax.f32 %v823_v42, 0.0  ;;  %v1145_v7 = vunpack.c.h.bf16 %v1185_v44  ;;  %v1092_v28 = vunpack.c.l.bf16 %v1172_v13 }
 0x109   :  { %917 = vst.msk [vmem:[%s1905_s4 + $0xa0] sm:$0xff] %vm896_vm2, %v852_v41  ;;  %v853_v50 = vmax.f32 %v789_v43, 0.0  ;;  %v1250_v51 = vpop.f32.mrb[24].mxu0  ;;  %949 = vst.msk [vmem:[%s1905_s4 + $0x1a0] sm:$0xff] %vm896_vm2, %v884_v45  ;;  %v885_v54 = vmax.f32 %v821_v47, 0.0  ;;  %v1282_v56 = vpop.f32.mrb[24].mxu1  ;;  %v1156_v32 = vunpack.c.l.bf16 %v1188_v18  ;;  %v1088_v33 = vunpack.c.l.bf16 %v1171_v19 }
 0x10a   :  { %920 = vst.msk [vmem:[%s1905_s4 + $0xb8] sm:$0xff] %vm896_vm2, %v855_v46  ;;  %v490_v55 = vadd.f32 %v1250_v51, %v1492_v37  ;;  %v481_v57 = vpop.f32.mrb[25].mxu0  ;;  %952 = vst.msk [vmem:[%s1905_s4 + $0x1b8] sm:$0xff] %vm896_vm2, %v887_v49  ;;  %v618_v60 = vadd.f32 %v1282_v56, %v1492_v37  ;;  %v609_v62 = vpop.f32.mrb[25].mxu1  ;;  %v1152_v39 = vunpack.c.l.bf16 %v1187_v24  ;;  %v1093_v40 = vunpack.c.h.bf16 %v1172_v13 }
 0x10b   :  { %918 = vst.msk [vmem:[%s1905_s4 + $0xa8] sm:$0xff] %vm896_vm2, %v853_v50  ;;  %v482_v61 = vadd.f32 %v1492_v37, %v481_v57  ;;  %v1251_v63 = vpop.f32.mrb[26].mxu0  ;;  %950 = vst.msk [vmem:[%s1905_s4 + $0x1a8] sm:$0xff] %vm896_vm2, %v885_v54  ;;  %v610_v3 = vadd.f32 %v1492_v37, %v609_v62  ;;  %v1283_v5 = vpop.f32.mrb[26].mxu1  ;;  %v1157_v45 = vunpack.c.h.bf16 %v1188_v18  ;;  %v1089_v46 = vunpack.c.h.bf16 %v1171_v19 }
 0x10c   :  { %v794_v2 = vadd.f32 %v1084_v48, %v490_v55  ;;  %v493_v4 = vadd.f32 %v1251_v63, %v1492_v37  ;;  %v484_v6 = vpop.f32.mrb[27].mxu0  ;;  %v826_v8 = vadd.f32 %v1148_v52, %v618_v60  ;;  %v621_v10 = vadd.f32 %v1283_v5, %v1492_v37  ;;  %v612_v12 = vpop.f32.mrb[27].mxu1 }
 0x10d   :  { %v792_v9 = vadd.f32 %v1080_v53, %v482_v61  ;;  %v485_v11 = vadd.f32 %v1492_v37, %v484_v6  ;;  %v824_v15 = vadd.f32 %v1144_v58, %v610_v3  ;;  %v613_v17 = vadd.f32 %v1492_v37, %v612_v12 }
 0x10e   :  { %v858_v14 = vmax.f32 %v794_v2, 0.0  ;;  %v795_v16 = vadd.f32 %v1085_v59, %v493_v4  ;;  %v890_v20 = vmax.f32 %v826_v8, 0.0  ;;  %v827_v22 = vadd.f32 %v1149_v0, %v621_v10 }
 0x10f   :  { %v856_v21 = vmax.f32 %v792_v9, 0.0  ;;  %v793_v23 = vadd.f32 %v1081_v1, %v485_v11  ;;  %v888_v25 = vmax.f32 %v824_v15, 0.0  ;;  %v825_v27 = vadd.f32 %v1145_v7, %v613_v17 }
 0x110   :  { %923 = vst.msk [vmem:[%s1905_s4 + $0xd0] sm:$0xff] %vm896_vm2, %v858_v14  ;;  %v859_v26 = vmax.f32 %v795_v16, 0.0  ;;  %955 = vst.msk [vmem:[%s1905_s4 + $0x1d0] sm:$0xff] %vm896_vm2, %v890_v20  ;;  %v891_v29 = vmax.f32 %v827_v22, 0.0  ;;  %v1153_v52 = vunpack.c.h.bf16 %v1187_v24 }
 0x111   :  { %921 = vst.msk [vmem:[%s1905_s4 + $0xc0] sm:$0xff] %vm896_vm2, %v856_v21  ;;  %v857_v30 = vmax.f32 %v793_v23, 0.0  ;;  %v1254_v31 = vpop.f32.mrb[28].mxu0  ;;  %953 = vst.msk [vmem:[%s1905_s4 + $0x1c0] sm:$0xff] %vm896_vm2, %v888_v25  ;;  %v889_v34 = vmax.f32 %v825_v27, 0.0  ;;  %v1286_v36 = vpop.f32.mrb[28].mxu1 }
 0x112   :  { %924 = vst.msk [vmem:[%s1905_s4 + $0xd8] sm:$0xff] %vm896_vm2, %v859_v26  ;;  %v506_v35 = vadd.f32 %v1254_v31, %v1492_v37  ;;  %v497_v38 = vpop.f32.mrb[29].mxu0  ;;  %956 = vst.msk [vmem:[%s1905_s4 + $0x1d8] sm:$0xff] %vm896_vm2, %v891_v29  ;;  %v634_v41 = vadd.f32 %v1286_v36, %v1492_v37  ;;  %v625_v43 = vpop.f32.mrb[29].mxu1 }
 0x113   :  { %922 = vst.msk [vmem:[%s1905_s4 + $0xc8] sm:$0xff] %vm896_vm2, %v857_v30  ;;  %v498_v42 = vadd.f32 %v1492_v37, %v497_v38  ;;  %v1255_v44 = vpop.f32.mrb[30].mxu0  ;;  %954 = vst.msk [vmem:[%s1905_s4 + $0x1c8] sm:$0xff] %vm896_vm2, %v889_v34  ;;  %v626_v48 = vadd.f32 %v1492_v37, %v625_v43  ;;  %v1287_v50 = vpop.f32.mrb[30].mxu1 }
 0x114   :  { %v798_v47 = vadd.f32 %v1092_v28, %v506_v35  ;;  %v509_v49 = vadd.f32 %v1255_v44, %v1492_v37  ;;  %v500_v51 = vpop.f32.mrb[31].mxu0  ;;  %v830_v53 = vadd.f32 %v1156_v32, %v634_v41  ;;  %v637_v55 = vadd.f32 %v1287_v50, %v1492_v37  ;;  %v628_v57 = vpop.f32.mrb[31].mxu1 }
 0x115   :  { %v796_v54 = vadd.f32 %v1088_v33, %v498_v42  ;;  %v501_v56 = vadd.f32 %v1492_v37, %v500_v51  ;;  %v828_v59 = vadd.f32 %v1152_v39, %v626_v48  ;;  %v629_v61 = vadd.f32 %v1492_v37, %v628_v57 }
 0x116   :  { %v862_v58 = vmax.f32 %v798_v47, 0.0  ;;  %v799_v60 = vadd.f32 %v1093_v40, %v509_v49  ;;  %v894_v62 = vmax.f32 %v830_v53, 0.0  ;;  %v831_v0 = vadd.f32 %v1157_v45, %v637_v55 }
 0x117   :  { %v860_v63 = vmax.f32 %v796_v54, 0.0  ;;  %v797_v1 = vadd.f32 %v1089_v46, %v501_v56  ;;  %v892_v2 = vmax.f32 %v828_v59, 0.0  ;;  %v829_v4 = vadd.f32 %v1153_v52, %v629_v61 }
 0x118   :  { %927 = vst.msk [vmem:[%s1905_s4 + $0xf0] sm:$0xff] %vm896_vm2, %v862_v58  ;;  %v863_v3 = vmax.f32 %v799_v60, 0.0  ;;  %959 = vst.msk [vmem:[%s1905_s4 + $0x1f0] sm:$0xff] %vm896_vm2, %v894_v62  ;;  %v895_v37 = vmax.f32 %v831_v0, 0.0 }
 0x119   :  { %925 = vst.msk [vmem:[%s1905_s4 + $0xe0] sm:$0xff] %vm896_vm2, %v860_v63  ;;  %v861_v5 = vmax.f32 %v797_v1, 0.0  ;;  %957 = vst.msk [vmem:[%s1905_s4 + $0x1e0] sm:$0xff] %vm896_vm2, %v892_v2  ;;  %v893_v6 = vmax.f32 %v829_v4, 0.0 }
 0x11a   :  { %928 = vst.msk [vmem:[%s1905_s4 + $0xf8] sm:$0xff] %vm896_vm2, %v863_v3  ;;  %960 = vst.msk [vmem:[%s1905_s4 + $0x1f8] sm:$0xff] %vm896_vm2, %v895_v37 }
 0x11b   :  { %926 = vst.msk [vmem:[%s1905_s4 + $0xe8] sm:$0xff] %vm896_vm2, %v861_v5  ;;  %958 = vst.msk [vmem:[%s1905_s4 + $0x1e8] sm:$0xff] %vm896_vm2, %v893_v6 }

// kernel: bottleneck_forward.4
= control target key start
LH: loop header
LB: loop body
LE: loop exit
PB: predicated region body
PF: predicated region fallthrough
CT: control target
= control target key end

     0   :  { %s5173_s12 = smov 0   ;;  %s6142_s0 = inlined_call_operand.vmem [shape: bf16[2,1,328,4], index: 0, kind: input, shape index: {}]   ;;  %s6143_s1 = inlined_call_operand.vmem [shape: bf16[9,4,4], index: 1, kind: input, shape index: {}]   ;;  %s6144_s2 = inlined_call_operand.vmem [shape: f32[1,4], index: 2, kind: input, shape index: {}]   ;;  %s6145_s3 = inlined_call_operand.vmem [shape: bf16[2,288,4], index: 3, kind: output, shape index: {}]  }
   0x1 LB: > { %s3935_s13 = sadd.s32 4294967295, %s5151_s12   ;;  %p3939_p0 = scmp.ge.s32.totalorder %s5151_s12, 1  ;;  %s5151_s12 = sphi %s5173_s12, %s13_s12  }
   0x2   : > { %p137_p1 = scmp.lt.s32.totalorder %s5151_s12, 3 }
   0x4   : > { %p138_p2 = pnand %p3939_p0, %p137_p1 }
   0x5   : > { %vm509_vm0 = vcmask (!%p138_p2), 1041408   ;;  %v4056_v0 = vld [vmem:[%s6143_s1 + $0x8] sm:$0x3] (!%p138_p2)  ;;  %v3942_v1 = vld [vmem:[%s6143_s1 + $0x2] sm:$0x3] (!%p138_p2)  ;;  %p161_p3 = scmp.lt.s32.totalorder (!%p138_p2), %s3935_s13, 1 }
   0x6   : > { %141 = sbr.rel (%p138_p2) target bundleno = 575 (0x23f), region = 32  ;;  %5056 = vmatprep.subr.msk.bf16.mxu0 (!%p138_p2), %vm509_vm0, %v4056_v0  ;;  %5052 = vmatprep.subr.msk.bf16.mxu1 (!%p138_p2), %vm509_vm0, %v3942_v1  ;;  %v5190_v2 = vsel (!%p138_p2), %vm509_vm0, %v4056_v0, 0  ;;  %v511_v3 = vsel (!%p138_p2), %vm509_vm0, %v3942_v1, 0  ;;  %v4076_v4 = vld [vmem:[%s6143_s1 + $0xa] sm:$0x3] (!%p138_p2)  ;;  %vm454_vm2 = vcmask (!%p138_p2), 31744  }
   0x7   : > { %4573 = vmatpush3.bf16.msra.mxu0 (!%p138_p2), %v5190_v2  ;;  %4421 = vmatpush3.bf16.msra.mxu1 (!%p138_p2), %v511_v3  ;;  %v208_v5 = vld [vmem:[%s6143_s1] sm:$0x3] (!%p138_p2)  ;;  %vm305_vm1 = vsmask.f32 (!%p138_p2), 7424  ;;  %v5211_v6 = vsel (!%p138_p2), %vm509_vm0, %v4076_v4, 0  ;;  %vm2112_vm4 = vcmask (!%p138_p2), 1045504  }
   0x8   : > { %5058 = vmatprep.subr.msk.bf16.mxu0 (!%p138_p2), %vm509_vm0, %v4076_v4  ;;  %5053 = vmatprep.subr.msk.bf16.mxu1 (!%p138_p2), %vm509_vm0, %v208_v5  ;;  %vm1665_vm3 = vsmask.f32 (!%p138_p2), 6400  ;;  %v727_v12 = vsel (!%p138_p2), %vm509_vm0, %v208_v5, 0  ;;  %v5259_v39 = vld [vmem:[%s6143_s1 + $0x4] sm:$0x3] (!%p138_p2)  ;;  %vm912_vm5 = vcmask (!%p138_p2), 1046528  }
   0x9   : > { %v5293_v1 = vld [vmem:[%s6143_s1 + $0xc] sm:$0x3] (!%p138_p2)  ;;  %vm2865_vm6 = vsmask.f32 (!%p138_p2), 5376  ;;  %vm3312_vm7 = vcmask (!%p138_p2), 1044480   ;;  %vm3843_vm8 = vcmask (!%p138_p2), 27648  }
   0xd   : > { %s6147_s13 = smov (!%p161_p3, %s3935_s13), 1 }
   0xe   : > { %s5062_s22 = smul.u32 164, %s6147_s13 }
   0xf   : > { %s5063_s15 = smul.u32 144, %s6147_s13 }
  0x10   : > { %s5208_s25 = scalar_lea.vmem %s6142_s0, %s5062_s22 }
  0x11   : > { %v172_v7 = vld [vmem:[%s5208_s25] sm:$0xf]  ;;  %v5215_v8 = vld [vmem:[%s5208_s25 + $0x4] sm:$0xf]  ;;  %v5221_v10 = vld [vmem:[%s5208_s25 + $0x8] sm:$0xff]   ;;  %s6021_s18 = scalar_lea.vmem %s6145_s3, %s5063_s15 }
  0x12   : > { %v5218_v9 = vcombine.low %v172_v7, %v5215_v8  ;;  %v1220_v11 = vld [vmem:[%s5208_s25 + $0x8] sm:$0xe]  ;;  %v5226_v13 = vld [vmem:[%s5208_s25 + $0xc] sm:$0xf]  ;;  %v314_v16 = vshll.u32 %v5221_v10, 16  ;;  %v318_v17 = vshrl.u32 %v5221_v10, 16 }
  0x13   : > { %v5233_v18 = vld [vmem:[%s5208_s25 + $0x10] sm:$0xff]   ;;  %v5239_v20 = vcombine.low %v1220_v11, %v5226_v13  ;;  %v5247_v28 = vld [vmem:[%s5208_s25 + $0x18] sm:$0xff]   ;;  %v5253_v34 = vld [vmem:[%s5208_s25 + $0x20] sm:$0xff]  }
  0x14   : > { %v307_v14 = vshrl.u32 %v5218_v9, 16  ;;  %v309_v15 = vshll.u32 %v5218_v9, 16  ;;  %v5236_v19 = vld [vmem:[%s5208_s25 + $0x10] sm:$0xff]   ;;  %v316_v22 = vrot.slane %v314_v16, 1  ;;  %v1675_v23 = vshrl.u32 %v5233_v18, 16  ;;  %v5250_v33 = vld [vmem:[%s5208_s25 + $0x18] sm:$0xff]  }
  0x15   : > { %v1678_v24 = vshll.u32 %v5233_v18, 16  ;;  %v1667_v25 = vshrl.u32 %v5239_v20, 16  ;;  %v1670_v26 = vshll.u32 %v5239_v20, 16  ;;  %v322_v27 = vshll.u32 %v5236_v19, 16  ;;  %v5268_v48 = vld [vmem:[%s5208_s25 + $0x20] sm:$0xff]   ;;  %v5271_v49 = vld [vmem:[%s5208_s25 + $0x28] sm:$0xff]  }
  0x16   : > { %v311_v21 = vrot.slane %v309_v15, 1  ;;  %v320_v30 = vor.u32 %v318_v17, %v316_v22  ;;  %v1677_v31 = vrot.slane %v1675_v23, 1  ;;  %v1684_v38 = vshrl.u32 %v5247_v28, 16  ;;  %v5277_v54 = vld [vmem:[%s5208_s25 + $0x28] sm:$0xff]   ;;  %v5283_v59 = vld [vmem:[%s5208_s25 + $0x30] sm:$0xff]   ;;  %v5307_v23 = vld [vmem:[%s5208_s25 + $0x38] sm:$0xff]  }
  0x17   : > { %v1680_v32 = vrot.slane %v1678_v24, 2  ;;  %v1669_v35 = vrot.slane %v1667_v25, 1  ;;  %v1672_v36 = vrot.slane %v1670_v26, 2  ;;  %v324_v37 = vrot.slane %v322_v27, 1  ;;  %v5288_v0 = vld [vmem:[%s5208_s25 + $0x30] sm:$0xff]  }
  0x18   : > { %v312_v29 = vor.u32 %v311_v21, %v307_v14  ;;  %v1687_v42 = vshll.u32 %v5247_v28, 16  ;;  %v326_v43 = vshrl.u32 %v5236_v19, 16  ;;  %v1686_v46 = vrot.slane %v1684_v38, 1 }
  0x19   : > { %v1681_v41 = vor.u32 %v1680_v32, %v1677_v31  ;;  %v1673_v44 = vor.u32 %v1672_v36, %v1669_v35  ;;  %v325_v45 = vsel %vm305_vm1, %v320_v30, %v324_v37  ;;  %v330_v47 = vshll.u32 %v5250_v33, 16  ;;  %v5316_v35 = vld [vmem:[%s5208_s25 + $0x38] sm:$0xff]  }
  0x1a   : > { %v317_v40 = vsel %vm305_vm1, %v312_v29, %v316_v22  ;;  %v1689_v50 = vrot.slane %v1687_v42, 2  ;;  %v328_v51 = vor.u32 %v326_v43, %v324_v37  ;;  %v1693_v52 = vshrl.u32 %v5253_v34, 16 }
  0x1b   : > { %4422 = vmatprep.mubr.msk.bf16.mxu1 %vm454_vm2, %v317_v40  ;;  %v1696_v53 = vshll.u32 %v5253_v34, 16  ;;  %v1682_v55 = vsel %vm1665_vm3, %v1673_v44, %v1681_v41  ;;  %v332_v56 = vrot.slane %v330_v47, 1  ;;  %v334_v57 = vshrl.u32 %v5250_v33, 16  ;;  %v5327_v44 = vld [vmem:[%s5208_s25 + $0x40] sm:$0xff]  }
  0x1c   : > { %4423 = vmatmul.mubr.msk.bf16.vlgmr.msra.gmra.mrb[0].mxu1 %vm454_vm2, %v325_v45  ;;  %v338_v58 = vshll.u32 %v5268_v48, 16  ;;  %4574 = vmatprep.mubr.msk.bf16.mxu0 %vm454_vm2, %v1682_v55  ;;  %v1690_v60 = vor.u32 %v1689_v50, %v1686_v46  ;;  %v1695_v61 = vrot.slane %v1693_v52, 1  ;;  %v1702_v63 = vshrl.u32 %v5271_v49, 16 }
  0x1d   : > { %4459 = vmatpush3.bf16.msra.mxu1 %v727_v12  ;;  %v1698_v62 = vrot.slane %v1696_v53, 2  ;;  %v333_v3 = vsel %vm305_vm1, %v328_v51, %v332_v56  ;;  %v336_v4 = vor.u32 %v334_v57, %v332_v56  ;;  %v1705_v7 = vshll.u32 %v5271_v49, 16  ;;  %v5332_v51 = vld [vmem:[%s5208_s25 + $0x40] sm:$0xff]  }
  0x1e   : > { %5054 = vmatprep.subr.msk.bf16.mxu1 %vm509_vm0, %v5259_v39  ;;  %v340_v5 = vrot.slane %v338_v58, 1  ;;  %v1691_v11 = vsel %vm1665_vm3, %v1681_v41, %v1690_v60  ;;  %4426 = vmatprep.mubr.msk.bf16.mxu1 %vm454_vm2, %v333_v3  ;;  %v1704_v14 = vrot.slane %v1702_v63, 1  ;;  %v342_v15 = vshrl.u32 %v5268_v48, 16  ;;  %v5343_v63 = vld [vmem:[%s5208_s25 + $0x48] sm:$0xff]  }
  0x1f   : > { %v1699_v12 = vor.u32 %v1698_v62, %v1695_v61  ;;  %4575 = vmatmul.mubr.msk.bf16.vlgmr.msra.gmra.mrb[0].mxu0 %vm454_vm2, %v1691_v11  ;;  %v1707_v17 = vrot.slane %v1705_v7, 2  ;;  %v346_v21 = vshll.u32 %v5277_v54, 16  ;;  %v1711_v22 = vshrl.u32 %v5283_v59, 16  ;;  %v5340_v62 = vld [vmem:[%s5208_s25 + $0x48] sm:$0xff]  }
  0x20   : > { %v341_v16 = vsel %vm305_vm1, %v336_v4, %v340_v5  ;;  %4611 = vmatpush3.bf16.msra.mxu0 %v5211_v6  ;;  %v344_v25 = vor.u32 %v342_v15, %v340_v5  ;;  %v1714_v26 = vshll.u32 %v5283_v59, 16  ;;  %v350_v27 = vshrl.u32 %v5277_v54, 16 }
  0x21   : > { %v1700_v24 = vsel %vm1665_vm3, %v1690_v60, %v1699_v12  ;;  %v1708_v29 = vor.u32 %v1707_v17, %v1704_v14  ;;  %v348_v30 = vrot.slane %v346_v21, 1  ;;  %v1713_v31 = vrot.slane %v1711_v22, 1  ;;  %5059 = vmatprep.subr.msk.bf16.mxu0 %vm509_vm0, %v5293_v1  ;;  %v5352_v14 = vld [vmem:[%s5208_s25 + $0x50] sm:$0xff]  }
  0x22   : > { %4578 = vmatprep.mubr.msk.bf16.mxu0 %vm454_vm2, %v1700_v24  ;;  %v354_v32 = vshll.u32 %v5288_v0, 16  ;;  %v1716_v6 = vrot.slane %v1714_v26, 2  ;;  %v1720_v36 = vshrl.u32 %v5307_v23, 16  ;;  %v1723_v37 = vshll.u32 %v5307_v23, 16 }
  0x23   : > { %v358_v38 = vshrl.u32 %v5288_v0, 16  ;;  %v1709_v40 = vsel %vm1665_vm3, %v1699_v12, %v1708_v29  ;;  %v349_v41 = vsel %vm305_vm1, %v344_v25, %v348_v30  ;;  %v352_v42 = vor.u32 %v350_v27, %v348_v30  ;;  %v5360_v25 = vld [vmem:[%s5208_s25 + $0x50] sm:$0xff]  }
  0x24   : > { %4427 = vmatmul.mubr.msk.bf16.gmra.mrb[4].mxu1 %vm454_vm2, %v341_v16  ;;  %v356_v43 = vrot.slane %v354_v32, 1  ;;  %v1717_v45 = vor.u32 %v1716_v6, %v1713_v31  ;;  %v1722_v46 = vrot.slane %v1720_v36, 1  ;;  %v1725_v47 = vrot.slane %v1723_v37, 2 }
  0x25   : > { %4430 = vmatprep.mubr.msk.bf16.mxu1 %vm454_vm2, %v349_v41  ;;  %v362_v50 = vshll.u32 %v5316_v35, 16  ;;  %v1729_v55 = vshrl.u32 %v5327_v44, 16  ;;  %v1732_v56 = vshll.u32 %v5327_v44, 16  ;;  %v366_v61 = vshrl.u32 %v5316_v35, 16  ;;  %v5370_v41 = vld [vmem:[%s5208_s25 + $0x58] sm:$0xff]  }
  0x26   : > { %v357_v52 = vsel %vm305_vm1, %v352_v42, %v356_v43  ;;  %v360_v53 = vor.u32 %v358_v38, %v356_v43  ;;  %v1718_v57 = vsel %vm1665_vm3, %v1708_v29, %v1717_v45  ;;  %v1726_v58 = vor.u32 %v1725_v47, %v1722_v46  ;;  %v5365_v29 = vld [vmem:[%s5208_s25 + $0x58] sm:$0xff]  }
  0x27   : > { %v364_v60 = vrot.slane %v362_v50, 1  ;;  %4579 = vmatmul.mubr.msk.bf16.gmra.mrb[4].mxu0 %vm454_vm2, %v1709_v40  ;;  %v1731_v3 = vrot.slane %v1729_v55, 1  ;;  %v1734_v4 = vrot.slane %v1732_v56, 2  ;;  %v370_v5 = vshll.u32 %v5332_v51, 16 }
  0x28   : > { %v374_v7 = vshrl.u32 %v5332_v51, 16  ;;  %4582 = vmatprep.mubr.msk.bf16.mxu0 %vm454_vm2, %v1718_v57  ;;  %v1738_v12 = vshrl.u32 %v5340_v62, 16  ;;  %v1741_v16 = vshll.u32 %v5340_v62, 16  ;;  %v378_v17 = vshll.u32 %v5343_v63, 16  ;;  %v2106_v57 = vld [vmem:[%s5208_s25 + $0x8] sm:$0xc] }
  0x29   : > { %v365_v11 = vsel %vm305_vm1, %v360_v53, %v364_v60  ;;  %v1735_v15 = vor.u32 %v1734_v4, %v1731_v3  ;;  %v372_v21 = vrot.slane %v370_v5, 1  ;;  %v1747_v22 = vshrl.u32 %v5352_v14, 16 }
  0x2a   : > { %v1750_v24 = vshll.u32 %v5352_v14, 16  ;;  %v1727_v26 = vsel %vm1665_vm3, %v1717_v45, %v1726_v58  ;;  %v368_v27 = vor.u32 %v366_v61, %v364_v60  ;;  %v1740_v30 = vrot.slane %v1738_v12, 1 }
  0x2b   : > { %v1743_v31 = vrot.slane %v1741_v16, 2  ;;  %v376_v32 = vor.u32 %v374_v7, %v372_v21  ;;  %v380_v6 = vrot.slane %v378_v17, 1  ;;  %v1736_v36 = vsel %vm1665_vm3, %v1726_v58, %v1735_v15  ;;  %v5384_v58 = vld [vmem:[%s5208_s25 + $0x60] sm:$0xff]  }
  0x2c   : > { %4431 = vmatmul.mubr.msk.bf16.gmra.mrb[8].mxu1 %vm454_vm2, %v357_v52  ;;  %v1749_v37 = vrot.slane %v1747_v22, 1  ;;  %v1752_v38 = vrot.slane %v1750_v24, 2  ;;  %v386_v40 = vshll.u32 %v5360_v25, 16  ;;  %v373_v42 = vsel %vm305_vm1, %v368_v27, %v372_v21 }
  0x2d   : > { %4434 = vmatprep.mubr.msk.bf16.mxu1 %vm454_vm2, %v365_v11  ;;  %v382_v43 = vshrl.u32 %v5343_v63, 16  ;;  %v1756_v45 = vshrl.u32 %v5365_v29, 16  ;;  %v1759_v46 = vshll.u32 %v5365_v29, 16  ;;  %v1744_v47 = vor.u32 %v1743_v31, %v1740_v30  ;;  %v5389_v11 = vld [vmem:[%s5208_s25 + $0x68] sm:$0xff]  }
  0x2e   : > { %v381_v50 = vsel %vm305_vm1, %v376_v32, %v380_v6  ;;  %v390_v52 = vshrl.u32 %v5360_v25, 16  ;;  %v394_v53 = vshll.u32 %v5370_v41, 16  ;;  %v1753_v55 = vor.u32 %v1752_v38, %v1749_v37  ;;  %v5406_v32 = vld [vmem:[%s5208_s25 + $0x70] sm:$0xff]  }
  0x2f   : > { %4583 = vmatmul.mubr.msk.bf16.gmra.mrb[8].mxu0 %vm454_vm2, %v1727_v26  ;;  %v388_v56 = vrot.slane %v386_v40, 1  ;;  %v384_v60 = vor.u32 %v382_v43, %v380_v6  ;;  %v1758_v61 = vrot.slane %v1756_v45, 1  ;;  %v1761_v3 = vrot.slane %v1759_v46, 2  ;;  %v5412_v40 = vld [vmem:[%s5208_s25 + $0x78] sm:$0xff]  }
  0x30   : > { %4586 = vmatprep.mubr.msk.bf16.mxu0 %vm454_vm2, %v1736_v36  ;;  %v1745_v4 = vsel %vm1665_vm3, %v1735_v15, %v1744_v47  ;;  %v396_v7 = vrot.slane %v394_v53, 1  ;;  %v1754_v12 = vsel %vm1665_vm3, %v1744_v47, %v1753_v55  ;;  %v4077_v16 = vcombine.low %v2106_v57, %v5226_v13 }
  0x31   : > { %v392_v5 = vor.u32 %v390_v52, %v388_v56  ;;  %v402_v17 = vshll.u32 %v5384_v58, 16  ;;  %v389_v21 = vsel %vm305_vm1, %v384_v60, %v388_v56  ;;  %v398_v22 = vshrl.u32 %v5370_v41, 16  ;;  %v5427_v56 = vld [vmem:[%s5208_s25 + $0x80] sm:$0xff]  }
  0x32   : > { %v5398_v15 = vor.u32 %v1761_v3, %v1758_v61  ;;  %v406_v26 = vshrl.u32 %v5384_v58, 16  ;;  %v410_v27 = vshll.u32 %v5389_v11, 16  ;;  %v2113_v13 = vrot.slane %v4077_v16, 2 }
  0x33   : > { %v397_v24 = vsel %vm305_vm1, %v392_v5, %v396_v7  ;;  %v2114_v30 = vrot.slane %v5233_v18, 2  ;;  %v404_v31 = vrot.slane %v402_v17, 1  ;;  %v400_v6 = vor.u32 %v398_v22, %v396_v7 }
  0x34   : > { %4435 = vmatmul.mubr.msk.bf16.gmra.mrb[12].mxu1 %vm454_vm2, %v373_v42  ;;  %v1763_v36 = vsel %vm1665_vm3, %v1753_v55, %v5398_v15  ;;  %v412_v38 = vrot.slane %v410_v27, 1  ;;  %v418_v18 = vshll.u32 %v5406_v32, 16  ;;  %v2116_v45 = vrot.slane %v5247_v28, 2  ;;  %v5457_v27 = vld [vmem:[%s5208_s25 + $0x90] ss:$0 sps:$4 sm:$0x11]  }
  0x35   : > { %4438 = vmatprep.mubr.msk.bf16.mxu1 %vm454_vm2, %v381_v50  ;;  %v408_v37 = vor.u32 %v406_v26, %v404_v31  ;;  %v2115_v42 = vsel %vm2112_vm4, %v2113_v13, %v2114_v30  ;;  %v405_v43 = vsel %vm305_vm1, %v400_v6, %v404_v31  ;;  %v414_v46 = vshrl.u32 %v5389_v11, 16 }
  0x36   : > { %v422_v50 = vshrl.u32 %v5406_v32, 16  ;;  %v426_v52 = vshll.u32 %v5412_v40, 16  ;;  %v2118_v53 = vrot.slane %v5253_v34, 2  ;;  %v420_v55 = vrot.slane %v418_v18, 1  ;;  %v5440_v34 = vld [vmem:[%s6143_s1 + $0xe] sm:$0x3] }
  0x37   : > { %4587 = vmatmul.mubr.msk.bf16.gmra.mrb[12].mxu0 %vm454_vm2, %v1745_v4  ;;  %v413_v47 = vsel %vm305_vm1, %v408_v37, %v412_v38  ;;  %v2644_v28 = vsel %vm509_vm0, %v5293_v1, 0  ;;  %v416_v57 = vor.u32 %v414_v46, %v412_v38  ;;  %v2117_v60 = vsel %vm2112_vm4, %v2114_v30, %v2116_v45  ;;  %v5434_v4 = vld [vmem:[%s5208_s25 + $0x88] sm:$0xff]  }
  0x38   : > { %4590 = vmatprep.mubr.msk.bf16.mxu0 %vm454_vm2, %v1754_v12  ;;  %v424_v61 = vor.u32 %v422_v50, %v420_v55  ;;  %v428_v3 = vrot.slane %v426_v52, 1  ;;  %v2119_v5 = vsel %vm2112_vm4, %v2116_v45, %v2118_v53  ;;  %v434_v7 = vshll.u32 %v5427_v56, 16 }
  0x39   : > { %v421_v1 = vsel %vm305_vm1, %v416_v57, %v420_v55  ;;  %v2120_v12 = vrot.slane %v5271_v49, 2  ;;  %v430_v16 = vshrl.u32 %v5412_v40, 16  ;;  %v442_v22 = vshll.u32 %v5434_v4, 16  ;;  %v5484_v55 = vld [vmem:[%s5208_s25 + $0x60] sm:$0xff]   ;;  %v5503_v57 = vld [vmem:[%s5208_s25 + $0x68] sm:$0xff]  }
  0x3a   : > { %v429_v17 = vsel %vm305_vm1, %v424_v61, %v428_v3  ;;  %v436_v26 = vrot.slane %v434_v7, 1  ;;  %v450_v37 = vshll.u32 %v5457_v27, 16  ;;  %v2124_v38 = vrot.slane %v5307_v23, 2  ;;  %v5521_v7 = vld [vmem:[%s5208_s25 + $0x78] sm:$0xff]  }
  0x3b   : > { %v432_v49 = vor.u32 %v430_v16, %v428_v3  ;;  %v2121_v13 = vsel %vm2112_vm4, %v2118_v53, %v2120_v12  ;;  %v444_v31 = vrot.slane %v442_v22, 1  ;;  %v2126_v18 = vrot.slane %v5327_v44, 2  ;;  %v5537_v22 = vld [vmem:[%s5208_s25 + $0x88] sm:$0xff]  }
  0x3c   : > { %4439 = vmatmul.mubr.msk.bf16.gmra.mrb[16].mxu1 %vm454_vm2, %v389_v21  ;;  %v438_v21 = vshrl.u32 %v5427_v56, 16  ;;  %v452_v45 = vrot.slane %v450_v37, 1  ;;  %v2128_v23 = vrot.slane %v5340_v62, 2  ;;  %v2130_v44 = vrot.slane %v5352_v14, 2 }
  0x3d   : > { %4442 = vmatprep.mubr.msk.bf16.mxu1 %vm454_vm2, %v397_v24  ;;  %v2122_v24 = vrot.slane %v5283_v59, 2  ;;  %v437_v59 = vsel %vm305_vm1, %v432_v49, %v436_v26  ;;  %v2132_v62 = vrot.slane %v5365_v29, 2  ;;  %v1005_v14 = vsel %vm509_vm0, %v5259_v39, 0 }
  0x3e   : > { %v440_v30 = vor.u32 %v438_v21, %v436_v26  ;;  %v2129_v52 = vsel %vm2112_vm4, %v2126_v18, %v2128_v23  ;;  %v2131_v53 = vsel %vm2112_vm4, %v2128_v23, %v2130_v44  ;;  %v2136_v61 = vrot.slane %v5503_v57, 2  ;;  %v5541_v26 = vld [vmem:[%s5208_s25 + $0x90] sm:$0xff]  }
  0x3f   : > { %4591 = vmatmul.mubr.msk.bf16.gmra.mrb[16].mxu0 %vm454_vm2, %v1763_v36  ;;  %v2123_v6 = vsel %vm2112_vm4, %v2120_v12, %v2122_v24  ;;  %v446_v36 = vshrl.u32 %v5434_v4, 16  ;;  %v2125_v46 = vsel %vm2112_vm4, %v2122_v24, %v2124_v38  ;;  %v2133_v29 = vsel %vm2112_vm4, %v2130_v44, %v2132_v62  ;;  %v5525_v12 = vld [vmem:[%s5208_s25 + $0x80] sm:$0xff]  }
  0x40   : > { %4612 = vmatprep.mubr.msk.bf16.mxu0 %vm454_vm2, %v2115_v42  ;;  %v445_v42 = vsel %vm305_vm1, %v440_v30, %v444_v31  ;;  %v2140_v16 = vrot.slane %v5521_v7, 2  ;;  %v2144_v49 = vrot.slane %v5537_v22, 2  ;;  %v2420_v30 = vld [vmem:[%s5208_s25 + $0x10] sm:$0xc] }
  0x44   : > { %4443 = vmatmul.mubr.msk.bf16.gmra.mrb[20].mxu1 %vm454_vm2, %v405_v43  ;;  %v448_v43 = vor.u32 %v446_v36, %v444_v31  ;;  %v5551_v31 = vld [vmem:[%s5208_s25 + $0x14] sm:$0xf] }
  0x45   : > { %4446 = vmatprep.mubr.msk.bf16.mxu1 %vm454_vm2, %v413_v47  ;;  %v2127_v47 = vsel %vm2112_vm4, %v2124_v38, %v2126_v18  ;;  %v5561_v37 = vcombine.low %v2420_v30, %v5551_v31  ;;  %v5564_v38 = vld [vmem:[%s5208_s25 + $0x18] sm:$0xff]  }
  0x46   : > { %v453_v50 = vsel %vm305_vm1, %v448_v43, %v452_v45  ;;  %v2553_v43 = vrot.slane %v5564_v38, 2 }
  0x47   : > { %4613 = vmatmul.mubr.msk.bf16.vlgmr.msra.gmra.mrb[0].mxu0 %vm454_vm2, %v2117_v60  ;;  %v5509_v60 = vld [vmem:[%s5208_s25 + $0x70] sm:$0xff]   ;;  %v2552_v18 = vrot.slane %v5561_v37, 2 }
  0x48   : > { %4649 = vmatpush3.bf16.msra.mxu0 %v2644_v28  ;;  %4616 = vmatprep.mubr.msk.bf16.mxu0 %vm454_vm2, %v2119_v5  ;;  %v2134_v28 = vrot.slane %v5484_v55, 2  ;;  %v2138_v3 = vrot.slane %v5509_v60, 2 }
  0x49   : > { %5060 = vmatprep.subr.msk.bf16.mxu0 %vm509_vm0, %v5440_v34 }
  0x4a   : > { %v2135_v39 = vsel %vm2112_vm4, %v2132_v62, %v2134_v28  ;;  %v2137_v5 = vsel %vm2112_vm4, %v2134_v28, %v2136_v61  ;;  %v2141_v21 = vsel %vm2112_vm4, %v2138_v3, %v2140_v16  ;;  %v3091_v62 = vsel %vm509_vm0, %v5440_v34, 0  ;;  %v5599_v28 = vld [vmem:[%s5208_s25 + $0x38] sm:$0xff]  }
  0x4c   : > { %4447 = vmatmul.mubr.msk.bf16.gmra.mrb[24].mxu1 %vm454_vm2, %v421_v1  ;;  %v2139_v1 = vsel %vm2112_vm4, %v2136_v61, %v2138_v3  ;;  %v2561_v61 = vrot.slane %v5599_v28, 2  ;;  %v5618_v3 = vld [vmem:[%s5208_s25 + $0x40] sm:$0xff]  }
  0x4d   : > { %4450 = vmatprep.mubr.msk.bf16.mxu1 %vm454_vm2, %v429_v17  ;;  %v2142_v17 = vrot.slane %v5525_v12, 2 }
  0x4f   : > { %4617 = vmatmul.mubr.msk.bf16.gmra.mrb[4].mxu0 %vm454_vm2, %v2121_v13  ;;  %v2143_v24 = vsel %vm2112_vm4, %v2140_v16, %v2142_v17  ;;  %v2146_v13 = vrot.slane %v5541_v26, 2  ;;  %v906_v16 = vld [vmem:[%s5208_s25] sm:$0xe] }
  0x50   : > { %4620 = vmatprep.mubr.msk.bf16.mxu0 %vm454_vm2, %v2123_v6  ;;  %v2145_v6 = vsel %vm2112_vm4, %v2142_v17, %v2144_v49  ;;  %v2563_v17 = vrot.slane %v5618_v3, 2 }
  0x51   : > { %v2147_v36 = vsel %vm2112_vm4, %v2144_v49, %v2146_v13 }
  0x52   : > { %v2564_v49 = vsel %vm2112_vm4, %v2561_v61, %v2563_v17 }
  0x54   : > { %4451 = vmatmul.mubr.msk.bf16.gmra.mrb[28].mxu1 %vm454_vm2, %v437_v59  ;;  %v5557_v59 = vld [vmem:[%s5208_s25 + $0x98] ss:$0 sps:$4 sm:$0x33]  }
  0x55   : > { %4454 = vmatprep.mubr.msk.bf16.mxu1 %vm454_vm2, %v445_v42  ;;  %v2148_v42 = vrot.slane %v5557_v59, 2 }
  0x57   : > { %4621 = vmatmul.mubr.msk.bf16.gmra.mrb[8].mxu0 %vm454_vm2, %v2125_v46  ;;  %v2149_v45 = vsel %vm2112_vm4, %v2146_v13, %v2148_v42  ;;  %v5577_v46 = vld [vmem:[%s5208_s25 + $0x20] sm:$0xff]   ;;  %v5636_v13 = vld [vmem:[%s5208_s25 + $0x50] sm:$0xff]  }
  0x58   : > { %4624 = vmatprep.mubr.msk.bf16.mxu0 %vm454_vm2, %v2127_v47  ;;  %v2554_v47 = vsel %vm2112_vm4, %v2552_v18, %v2553_v43  ;;  %v2555_v23 = vrot.slane %v5577_v46, 2  ;;  %v2567_v42 = vrot.slane %v5636_v13, 2 }
  0x5c   : > { %4455 = vmatmul.mubr.msk.bf16.gmra.mrb[32].mxu1 %vm454_vm2, %v453_v50  ;;  %v5581_v50 = vld [vmem:[%s5208_s25 + $0x28] sm:$0xff]  }
  0x5d   : > { %4460 = vmatprep.mubr.msk.bf16.mxu1 %vm454_vm2, %v5218_v9  ;;  %v5495_v9 = vld [vmem:[%s6143_s1 + $0x6] sm:$0x3]  ;;  %v2557_v44 = vrot.slane %v5581_v50, 2 }
  0x5f   : > { %4625 = vmatmul.mubr.msk.bf16.gmra.mrb[12].mxu0 %vm454_vm2, %v2129_v52  ;;  %v2556_v52 = vsel %vm2112_vm4, %v2553_v43, %v2555_v23 }
  0x60   : > { %4628 = vmatprep.mubr.msk.bf16.mxu0 %vm454_vm2, %v2131_v53  ;;  %v5593_v53 = vld [vmem:[%s5208_s25 + $0x30] sm:$0xff]  }
  0x64   : > { %4461 = vmatmul.mubr.msk.bf16.vlgmr.msra.gmra.mrb[0].mxu1 %vm454_vm2, %v5221_v10 }
  0x65   : > { %4464 = vmatprep.mubr.msk.bf16.mxu1 %vm454_vm2, %v5236_v19  ;;  %4497 = vmatpush3.bf16.msra.mxu1 %v1005_v14  ;;  %v2558_v14 = vsel %vm2112_vm4, %v2555_v23, %v2557_v44  ;;  %v918_v23 = vrot.slane %v5250_v33, 1 }
  0x66   : > { %5055 = vmatprep.subr.msk.bf16.mxu1 %vm509_vm0, %v5495_v9 }
  0x67   : > { %4629 = vmatmul.mubr.msk.bf16.gmra.mrb[16].mxu0 %vm454_vm2, %v2133_v29  ;;  %v5604_v29 = vld [vmem:[%s6143_s1 + $0x10] sm:$0x3] }
  0x68   : > { %4632 = vmatprep.mubr.msk.bf16.mxu0 %vm454_vm2, %v2135_v39  ;;  %v2559_v39 = vrot.slane %v5593_v53, 2 }
  0x6a   : > { %v2560_v34 = vsel %vm2112_vm4, %v2557_v44, %v2559_v39 }
  0x6c   : > { %4465 = vmatmul.mubr.msk.bf16.gmra.mrb[4].mxu1 %vm454_vm2, %v5250_v33 }
  0x6d   : > { %4468 = vmatprep.mubr.msk.bf16.mxu1 %vm454_vm2, %v5268_v48 }
  0x6f   : > { %4633 = vmatmul.mubr.msk.bf16.gmra.mrb[20].mxu0 %vm454_vm2, %v2137_v5  ;;  %v2562_v5 = vsel %vm2112_vm4, %v2559_v39, %v2561_v61  ;;  %v1444_v39 = vsel %vm509_vm0, %v5495_v9, 0  ;;  %v920_v61 = vrot.slane %v5268_v48, 1  ;;  %v5134_v9 = vld [vmem:[%s6143_s1 + $0x8] sm:$0x3] }
  0x70   : > { %4636 = vmatprep.mubr.msk.bf16.mxu0 %vm454_vm2, %v2139_v1  ;;  %v5622_v1 = vld [vmem:[%s5208_s25 + $0x48] sm:$0xff]  }
  0x71   : > { %v921_v48 = vsel %vm912_vm5, %v918_v23, %v920_v61 }
  0x74   : > { %4469 = vmatmul.mubr.msk.bf16.gmra.mrb[8].mxu1 %vm454_vm2, %v5277_v54 }
  0x75   : > { %4472 = vmatprep.mubr.msk.bf16.mxu1 %vm454_vm2, %v5288_v0 }
  0x77   : > { %4637 = vmatmul.mubr.msk.bf16.gmra.mrb[24].mxu0 %vm454_vm2, %v2141_v21  ;;  %v3999_v21 = vcombine.low %v906_v16, %v5215_v8  ;;  %v5641_v8 = vld [vmem:[%s5208_s25 + $0x58] sm:$0xff]   ;;  %v922_v16 = vrot.slane %v5277_v54, 1 }
  0x78   : > { %4640 = vmatprep.mubr.msk.bf16.mxu0 %vm454_vm2, %v2143_v24  ;;  %v2565_v24 = vrot.slane %v5622_v1, 2  ;;  %v2569_v43 = vrot.slane %v5641_v8, 2 }
  0x79   : > { %v913_v30 = vrot.slane %v3999_v21, 1  ;;  %v5683_v21 = vld [vmem:[%s5208_s25 + $0x78] sm:$0xff]   ;;  %v923_v54 = vsel %vm912_vm5, %v920_v61, %v922_v16 }
  0x7a   : > { %v2570_v44 = vsel %vm2112_vm4, %v2567_v42, %v2569_v43 }
  0x7c   : > { %4473 = vmatmul.mubr.msk.bf16.gmra.mrb[12].mxu1 %vm454_vm2, %v5316_v35 }
  0x7d   : > { %4476 = vmatprep.mubr.msk.bf16.mxu1 %vm454_vm2, %v5332_v51 }
  0x7f   : > { %4641 = vmatmul.mubr.msk.bf16.gmra.mrb[28].mxu0 %vm454_vm2, %v2145_v6  ;;  %v914_v6 = vrot.slane %v5221_v10, 1  ;;  %v916_v10 = vrot.slane %v5236_v19, 1 }
  0x80   : > { %4644 = vmatprep.mubr.msk.bf16.mxu0 %vm454_vm2, %v2147_v36  ;;  %v2566_v36 = vsel %vm2112_vm4, %v2563_v17, %v2565_v24 }
  0x81   : > { %v915_v18 = vsel %vm912_vm5, %v913_v30, %v914_v6  ;;  %v924_v30 = vrot.slane %v5288_v0, 1 }
  0x84   : > { %4477 = vmatmul.mubr.msk.bf16.gmra.mrb[16].mxu1 %vm454_vm2, %v5343_v63 }
  0x85   : > { %4480 = vmatprep.mubr.msk.bf16.mxu1 %vm454_vm2, %v5360_v25 }
  0x87   : > { %4645 = vmatmul.mubr.msk.bf16.gmra.mrb[32].mxu0 %vm454_vm2, %v2149_v45  ;;  %v2568_v45 = vsel %vm2112_vm4, %v2565_v24, %v2567_v42  ;;  %v926_v42 = vrot.slane %v5316_v35, 1  ;;  %v928_v35 = vrot.slane %v5332_v51, 1 }
  0x88   : > { %4650 = vmatprep.mubr.msk.bf16.mxu0 %vm454_vm2, %v2554_v47  ;;  %v5654_v47 = vld [vmem:[%s5208_s25 + $0x60] sm:$0xff]  }
  0x89   : > { %v2571_v19 = vrot.slane %v5654_v47, 2 }
  0x8c   : > { %4481 = vmatmul.mubr.msk.bf16.gmra.mrb[20].mxu1 %vm454_vm2, %v5370_v41 }
  0x8d   : > { %4484 = vmatprep.mubr.msk.bf16.mxu1 %vm454_vm2, %v5384_v58 }
  0x8f   : > { %4651 = vmatmul.mubr.msk.bf16.vlgmr.msra.gmra.mrb[0].mxu0 %vm454_vm2, %v2556_v52  ;;  %v5659_v52 = vld [vmem:[%s5208_s25 + $0x68] sm:$0xff]  }
  0x90   : > { %4687 = vmatpush3.bf16.msra.mxu0 %v3091_v62  ;;  %4654 = vmatprep.mubr.msk.bf16.mxu0 %vm454_vm2, %v2558_v14  ;;  %v917_v62 = vsel %vm912_vm5, %v914_v6, %v916_v10  ;;  %v919_v14 = vsel %vm912_vm5, %v916_v10, %v918_v23  ;;  %v2573_v33 = vrot.slane %v5659_v52, 2  ;;  %v925_v10 = vsel %vm912_vm5, %v922_v16, %v924_v30 }
  0x91   : > { %5061 = vmatprep.subr.msk.bf16.mxu0 %vm509_vm0, %v5604_v29  ;;  %v2867_v16 = vshrl.u32 %v5561_v37, 16 }
  0x92   : > { %v2574_v17 = vsel %vm2112_vm4, %v2571_v19, %v2573_v33 }
  0x94   : > { %4485 = vmatmul.mubr.msk.bf16.gmra.mrb[24].mxu1 %vm454_vm2, %v5389_v11 }
  0x95   : > { %4488 = vmatprep.mubr.msk.bf16.mxu1 %vm454_vm2, %v5406_v32 }
  0x97   : > { %4655 = vmatmul.mubr.msk.bf16.gmra.mrb[4].mxu0 %vm454_vm2, %v2560_v34  ;;  %v2572_v34 = vsel %vm2112_vm4, %v2569_v43, %v2571_v19  ;;  %v5701_v43 = vld [vmem:[%s5208_s25 + $0x88] sm:$0xff]   ;;  %v930_v19 = vrot.slane %v5343_v63, 1  ;;  %v2870_v63 = vshll.u32 %v5561_v37, 16 }
  0x98   : > { %4658 = vmatprep.mubr.msk.bf16.mxu0 %vm454_vm2, %v2562_v5  ;;  %v5674_v5 = vld [vmem:[%s5208_s25 + $0x70] sm:$0xff]   ;;  %v2581_v23 = vrot.slane %v5701_v43, 2 }
  0x99   : > { %v2575_v24 = vrot.slane %v5674_v5, 2  ;;  %v931_v51 = vsel %vm912_vm5, %v928_v35, %v930_v19 }
  0x9b   : > { %v2576_v6 = vsel %vm2112_vm4, %v2573_v33, %v2575_v24  ;;  %v929_v33 = vsel %vm912_vm5, %v926_v42, %v928_v35 }
  0x9c   : > { %4489 = vmatmul.mubr.msk.bf16.gmra.mrb[28].mxu1 %vm454_vm2, %v5412_v40 }
  0x9d   : > { %4492 = vmatprep.mubr.msk.bf16.mxu1 %vm454_vm2, %v5427_v56 }
  0x9f   : > { %4659 = vmatmul.mubr.msk.bf16.gmra.mrb[8].mxu0 %vm454_vm2, %v2564_v49  ;;  %v2577_v49 = vrot.slane %v5683_v21, 2 }
  0xa0   : > { %4662 = vmatprep.mubr.msk.bf16.mxu0 %vm454_vm2, %v2566_v36  ;;  %v5696_v36 = vld [vmem:[%s5208_s25 + $0x80] sm:$0xff]  }
  0xa1   : > { %v2579_v0 = vrot.slane %v5696_v36, 2 }
  0xa4   : > { %4493 = vmatmul.mubr.msk.bf16.gmra.mrb[32].mxu1 %vm454_vm2, %v5434_v4 }
  0xa5   : > { %4498 = vmatprep.mubr.msk.bf16.mxu1 %vm454_vm2, %v915_v18  ;;  %v2578_v18 = vsel %vm2112_vm4, %v2575_v24, %v2577_v49 }
  0xa7   : > { %4663 = vmatmul.mubr.msk.bf16.gmra.mrb[12].mxu0 %vm454_vm2, %v2568_v45  ;;  %v927_v45 = vsel %vm912_vm5, %v924_v30, %v926_v42  ;;  %v934_v30 = vrot.slane %v5370_v41, 1  ;;  %v2872_v42 = vrot.slane %v2870_v63, 3  ;;  %v2893_v41 = vshrl.u32 %v5581_v50, 16 }
  0xa8   : > { %4666 = vmatprep.mubr.msk.bf16.mxu0 %vm454_vm2, %v2570_v44  ;;  %v2580_v44 = vsel %vm2112_vm4, %v2577_v49, %v2579_v0  ;;  %v5130_v49 = vld [vmem:[%s5208_s25 + $0xa0] ss:$0 sps:$4 sm:$0x33]  }
  0xac   : > { %4499 = vmatmul.mubr.msk.bf16.vlgmr.msra.gmra.mrb[0].mxu1 %vm454_vm2, %v917_v62  ;;  %v5714_v62 = vld [vmem:[%s5208_s25 + $0x90] sm:$0xff]  }
  0xad   : > { %4502 = vmatprep.mubr.msk.bf16.mxu1 %vm454_vm2, %v919_v14  ;;  %4535 = vmatpush3.bf16.msra.mxu1 %v1444_v39  ;;  %v5718_v14 = vld [vmem:[%s5208_s25 + $0x98] sm:$0xff]   ;;  %v2582_v39 = vsel %vm2112_vm4, %v2579_v0, %v2581_v23  ;;  %v2583_v61 = vrot.slane %v5714_v62, 2  ;;  %v2587_v0 = vrot.slane %v5130_v49, 2 }
  0xae   : > { %5057 = vmatprep.subr.msk.bf16.mxu1 %vm509_vm0, %v5134_v9  ;;  %v2875_v9 = vshrl.u32 %v5564_v38, 16 }
  0xaf   : > { %4667 = vmatmul.mubr.msk.bf16.gmra.mrb[16].mxu0 %vm454_vm2, %v2572_v34  ;;  %v2585_v34 = vrot.slane %v5718_v14, 2  ;;  %v2584_v24 = vsel %vm2112_vm4, %v2581_v23, %v2583_v61  ;;  %v2887_v23 = vshll.u32 %v5577_v46, 16 }
  0xb0   : > { %4670 = vmatprep.mubr.msk.bf16.mxu0 %vm454_vm2, %v2574_v17  ;;  %v2878_v17 = vshll.u32 %v5564_v38, 16  ;;  %v2877_v37 = vrot.slane %v2875_v9, 2  ;;  %v2895_v9 = vrot.slane %v2893_v41, 2  ;;  %v2920_v41 = vshrl.u32 %v5618_v3, 16 }
  0xb4   : > { %4503 = vmatmul.mubr.msk.bf16.gmra.mrb[4].mxu1 %vm454_vm2, %v921_v48  ;;  %v932_v48 = vrot.slane %v5360_v25, 1 }
  0xb5   : > { %4506 = vmatprep.mubr.msk.bf16.mxu1 %vm454_vm2, %v923_v54  ;;  %v2586_v54 = vsel %vm2112_vm4, %v2583_v61, %v2585_v34 }
  0xb6   : > { %v935_v25 = vsel %vm912_vm5, %v932_v48, %v934_v30 }
  0xb7   : > { %4671 = vmatmul.mubr.msk.bf16.gmra.mrb[20].mxu0 %vm454_vm2, %v2576_v6  ;;  %v2869_v6 = vrot.slane %v2867_v16, 2  ;;  %v938_v16 = vrot.slane %v5389_v11, 1  ;;  %v2911_v11 = vshrl.u32 %v5599_v28, 16 }
  0xb8   : > { %4674 = vmatprep.mubr.msk.bf16.mxu0 %vm454_vm2, %v2578_v18  ;;  %v2880_v18 = vrot.slane %v2878_v17, 3 }
  0xb9   : > { %v2873_v35 = vor.u32 %v2872_v42, %v2869_v6  ;;  %v2914_v6 = vshll.u32 %v5599_v28, 16 }
  0xbc   : > { %4507 = vmatmul.mubr.msk.bf16.gmra.mrb[8].mxu1 %vm454_vm2, %v925_v10  ;;  %v933_v10 = vsel %vm912_vm5, %v930_v19, %v932_v48  ;;  %v936_v19 = vrot.slane %v5384_v58, 1  ;;  %v2902_v58 = vshrl.u32 %v5593_v53, 16 }
  0xbd   : > { %4510 = vmatprep.mubr.msk.bf16.mxu1 %vm454_vm2, %v927_v45  ;;  %v2884_v45 = vshrl.u32 %v5577_v46, 16 }
  0xbe   : > { %v937_v48 = vsel %vm912_vm5, %v934_v30, %v936_v19  ;;  %v940_v30 = vrot.slane %v5406_v32, 1  ;;  %v2923_v32 = vshll.u32 %v5618_v3, 16 }
  0xbf   : > { %4675 = vmatmul.mubr.msk.bf16.gmra.mrb[24].mxu0 %vm454_vm2, %v2580_v44  ;;  %v2881_v44 = vor.u32 %v2880_v18, %v2877_v37  ;;  %v2886_v61 = vrot.slane %v2884_v45, 2  ;;  %v2904_v37 = vrot.slane %v2902_v58, 2  ;;  %v2913_v45 = vrot.slane %v2911_v11, 2 }
  0xc0   : > { %4678 = vmatprep.mubr.msk.bf16.mxu0 %vm454_vm2, %v2582_v39  ;;  %v2896_v39 = vshll.u32 %v5581_v50, 16  ;;  %v2938_v58 = vshrl.u32 %v5636_v13, 16  ;;  %v2950_v11 = vshll.u32 %v5641_v8, 16 }
  0xc1   : > { %v2882_v63 = vsel %vm2865_vm6, %v2873_v35, %v2881_v44  ;;  %v941_v35 = vsel %vm912_vm5, %v938_v16, %v940_v30 }
  0xc2   : > { %v2898_v17 = vrot.slane %v2896_v39, 3 }
  0xc4   : > { %4511 = vmatmul.mubr.msk.bf16.gmra.mrb[12].mxu1 %vm454_vm2, %v929_v33  ;;  %v2588_v33 = vsel %vm2112_vm4, %v2585_v34, %v2587_v0  ;;  %v2905_v34 = vshll.u32 %v5593_v53, 16  ;;  %v2899_v49 = vor.u32 %v2898_v17, %v2895_v9  ;;  %v3405_v0 = vsel %vm509_vm0, %v5604_v29, 0 }
  0xc5   : > { %4514 = vmatprep.mubr.msk.bf16.mxu1 %vm454_vm2, %v931_v51  ;;  %v2889_v51 = vrot.slane %v2887_v23, 3  ;;  %v2916_v23 = vrot.slane %v2914_v6, 3  ;;  %v2929_v29 = vshrl.u32 %v5622_v1, 16 }
  0xc6   : > { %v2907_v18 = vrot.slane %v2905_v34, 3  ;;  %v2941_v34 = vshll.u32 %v5636_v13, 16 }
  0xc7   : > { %4679 = vmatmul.mubr.msk.bf16.gmra.mrb[28].mxu0 %vm454_vm2, %v2584_v24  ;;  %v2890_v24 = vor.u32 %v2889_v51, %v2886_v61  ;;  %v2917_v39 = vor.u32 %v2916_v23, %v2913_v45  ;;  %v2922_v61 = vrot.slane %v2920_v41, 2  ;;  %v2925_v51 = vrot.slane %v2923_v32, 3 }
  0xc8   : > { %4682 = vmatprep.mubr.msk.bf16.mxu0 %vm454_vm2, %v2586_v54  ;;  %v939_v54 = vsel %vm912_vm5, %v936_v19, %v938_v16  ;;  %v2932_v19 = vshll.u32 %v5622_v1, 16  ;;  %v2931_v17 = vrot.slane %v2929_v29, 2  ;;  %v2952_v23 = vrot.slane %v2950_v11, 3  ;;  %v5136_v29 = vld [vmem:[%s5208_s25 + $0x18] sm:$0xff]  }
  0xc9   : > { %v2891_v42 = vsel %vm2865_vm6, %v2881_v44, %v2890_v24  ;;  %v2908_v44 = vor.u32 %v2907_v18, %v2904_v37  ;;  %v2943_v37 = vrot.slane %v2941_v34, 3  ;;  %v1352_v18 = vrot.slane %v5239_v20, 1 }
  0xca   : > { %v2956_v32 = vshrl.u32 %v5654_v47, 16  ;;  %v2959_v20 = vshll.u32 %v5654_v47, 16  ;;  %v2977_v34 = vshll.u32 %v5674_v5, 16  ;;  %v2986_v11 = vshll.u32 %v5683_v21, 16 }
  0xcb   : > { %v2909_v16 = vsel %vm2865_vm6, %v2899_v49, %v2908_v44  ;;  %v2918_v9 = vsel %vm2865_vm6, %v2908_v44, %v2917_v39 }
  0xcc   : > { %4515 = vmatmul.mubr.msk.bf16.gmra.mrb[16].mxu1 %vm454_vm2, %v933_v10  ;;  %v942_v10 = vrot.slane %v5412_v40, 1 }
  0xcd   : > { %4518 = vmatprep.mubr.msk.bf16.mxu1 %vm454_vm2, %v935_v25  ;;  %v2900_v25 = vsel %vm2865_vm6, %v2890_v24, %v2899_v49 }
  0xce   : > { %v943_v40 = vsel %vm912_vm5, %v940_v30, %v942_v10  ;;  %v948_v30 = vrot.slane %v5457_v27, 1 }
  0xcf   : > { %4683 = vmatmul.mubr.msk.bf16.gmra.mrb[32].mxu0 %vm454_vm2, %v2588_v33  ;;  %v944_v33 = vrot.slane %v5427_v56, 1 }
  0xd0   : > { %4688 = vmatprep.mubr.msk.bf16.mxu0 %vm454_vm2, %v2882_v63  ;;  %v946_v63 = vrot.slane %v5434_v4, 1  ;;  %v2947_v4 = vshrl.u32 %v5641_v8, 16 }
  0xd1   : > { %v945_v24 = vsel %vm912_vm5, %v942_v10, %v944_v33  ;;  %v5135_v10 = vld [vmem:[%s5208_s25 + $0x10] sm:$0xff]  }
  0xd2   : > { %v947_v56 = vsel %vm912_vm5, %v944_v33, %v946_v63  ;;  %v2949_v45 = vrot.slane %v2947_v4, 2  ;;  %v2983_v4 = vshrl.u32 %v5683_v21, 16 }
  0xd4   : > { %4519 = vmatmul.mubr.msk.bf16.gmra.mrb[20].mxu1 %vm454_vm2, %v937_v48  ;;  %v2934_v48 = vrot.slane %v2932_v19, 3  ;;  %v2953_v44 = vor.u32 %v2952_v23, %v2949_v45  ;;  %v1355_v19 = vrot.slane %v5136_v29, 1  ;;  %v2985_v45 = vrot.slane %v2983_v4, 2 }
  0xd5   : > { %4522 = vmatprep.mubr.msk.bf16.mxu1 %vm454_vm2, %v939_v54  ;;  %v2926_v54 = vor.u32 %v2925_v51, %v2922_v61  ;;  %v2958_v61 = vrot.slane %v2956_v32, 2  ;;  %v2961_v51 = vrot.slane %v2959_v20, 3  ;;  %v2988_v23 = vrot.slane %v2986_v11, 3  ;;  %v5142_v11 = vld [vmem:[%s5208_s25 + $0x48] sm:$0xff]  }
  0xd6   : > { %v2935_v49 = vor.u32 %v2934_v48, %v2931_v17  ;;  %v2995_v32 = vshll.u32 %v5696_v36, 16  ;;  %v3022_v4 = vshll.u32 %v5718_v14, 16 }
  0xd7   : > { %4689 = vmatmul.mubr.msk.bf16.vlgmr.msra.gmra.mrb[0].mxu0 %vm454_vm2, %v2891_v42  ;;  %v2927_v6 = vsel %vm2865_vm6, %v2917_v39, %v2926_v54  ;;  %v2940_v42 = vrot.slane %v2938_v58, 2  ;;  %v2968_v39 = vshll.u32 %v5659_v52, 16  ;;  %v2974_v58 = vshrl.u32 %v5674_v5, 16 }
  0xd8   : > { %4725 = vmatpush3.bf16.msra.mxu0 %v3405_v0  ;;  %4692 = vmatprep.mubr.msk.bf16.mxu0 %vm454_vm2, %v2900_v25  ;;  %v1353_v0 = vrot.slane %v5135_v10, 1  ;;  %v2936_v25 = vsel %vm2865_vm6, %v2926_v54, %v2935_v49  ;;  %v2962_v54 = vor.u32 %v2961_v51, %v2958_v61  ;;  %v5139_v10 = vld [vmem:[%s5208_s25 + $0x30] sm:$0xff]   ;;  %v2989_v20 = vor.u32 %v2988_v23, %v2985_v45  ;;  %v5141_v51 = vld [vmem:[%s5208_s25 + $0x40] sm:$0xff]  }
  0xd9   : > { %v2944_v41 = vor.u32 %v2943_v37, %v2940_v42  ;;  %v2970_v48 = vrot.slane %v2968_v39, 3  ;;  %v2976_v37 = vrot.slane %v2974_v58, 2  ;;  %v5140_v39 = vld [vmem:[%s5208_s25 + $0x38] sm:$0xff]   ;;  %v2997_v61 = vrot.slane %v2995_v32, 3 }
  0xda   : > { %v1354_v27 = vsel %vm912_vm5, %v1352_v18, %v1353_v0  ;;  %v2963_v42 = vsel %vm2865_vm6, %v2953_v44, %v2962_v54  ;;  %v2979_v18 = vrot.slane %v2977_v34, 3  ;;  %v1363_v29 = vrot.slane %v5140_v39, 1 }
  0xdb   : > { %v2945_v33 = vsel %vm2865_vm6, %v2935_v49, %v2944_v41  ;;  %v3013_v58 = vshll.u32 %v5714_v62, 16  ;;  %v3024_v23 = vrot.slane %v3022_v4, 3  ;;  %v3318_v4 = vrot.slane %v5581_v50, 3 }
  0xdc   : > { %4523 = vmatmul.mubr.msk.bf16.gmra.mrb[24].mxu1 %vm454_vm2, %v941_v35  ;;  %v949_v35 = vsel %vm912_vm5, %v946_v63, %v948_v30  ;;  %v3320_v50 = vrot.slane %v5593_v53, 3 }
  0xdd   : > { %4526 = vmatprep.mubr.msk.bf16.mxu1 %vm454_vm2, %v943_v40  ;;  %v2965_v40 = vshrl.u32 %v5659_v52, 16 }
  0xdf   : > { %4693 = vmatmul.mubr.msk.bf16.gmra.mrb[4].mxu0 %vm454_vm2, %v2909_v16  ;;  %v5137_v16 = vld [vmem:[%s5208_s25 + $0x20] sm:$0xff]   ;;  %v2967_v17 = vrot.slane %v2965_v40, 2  ;;  %v3004_v40 = vshll.u32 %v5701_v43, 16 }
  0xe0   : > { %4696 = vmatprep.mubr.msk.bf16.mxu0 %vm454_vm2, %v2918_v9  ;;  %v1357_v63 = vrot.slane %v5137_v16, 1  ;;  %v2954_v9 = vsel %vm2865_vm6, %v2944_v41, %v2953_v44  ;;  %v2980_v41 = vor.u32 %v2979_v18, %v2976_v37  ;;  %v3001_v44 = vshrl.u32 %v5701_v43, 16  ;;  %v5143_v18 = vld [vmem:[%s5208_s25 + $0x50] sm:$0xff]  }
  0xe1   : > { %v2971_v49 = vor.u32 %v2970_v48, %v2967_v17  ;;  %v1365_v16 = vrot.slane %v5141_v51, 1  ;;  %v3006_v17 = vrot.slane %v3004_v40, 3  ;;  %v3015_v37 = vrot.slane %v3013_v58, 3  ;;  %v5144_v40 = vld [vmem:[%s5208_s25 + $0x58] sm:$0xff]  }
  0xe2   : > { %v1371_v39 = vrot.slane %v5144_v40, 1  ;;  %v1774_v40 = vshrl.u32 %v5503_v57, 16 }
  0xe4   : > { %4527 = vmatmul.mubr.msk.bf16.gmra.mrb[28].mxu1 %vm454_vm2, %v945_v24  ;;  %v1356_v24 = vsel %vm912_vm5, %v1353_v0, %v1355_v19  ;;  %v1361_v0 = vrot.slane %v5139_v10, 1  ;;  %v1369_v10 = vrot.slane %v5143_v18, 1  ;;  %v3322_v18 = vrot.slane %v5599_v28, 3 }
  0xe5   : > { %4530 = vmatprep.mubr.msk.bf16.mxu1 %vm454_vm2, %v947_v56  ;;  %v1358_v56 = vsel %vm912_vm5, %v1355_v19, %v1357_v63  ;;  %v2981_v19 = vsel %vm2865_vm6, %v2971_v49, %v2980_v41 }
  0xe6   : > { %v1364_v48 = vsel %vm912_vm5, %v1361_v0, %v1363_v29  ;;  %v3323_v53 = vsel %vm3312_vm7, %v3320_v50, %v3322_v18 }
  0xe7   : > { %4697 = vmatmul.mubr.msk.bf16.gmra.mrb[8].mxu0 %vm454_vm2, %v2927_v6  ;;  %v5138_v6 = vld [vmem:[%s5208_s25 + $0x28] sm:$0xff]  }
  0xe8   : > { %4700 = vmatprep.mubr.msk.bf16.mxu0 %vm454_vm2, %v2936_v25  ;;  %v1359_v30 = vrot.slane %v5138_v6, 1  ;;  %v2972_v25 = vsel %vm2865_vm6, %v2962_v54, %v2971_v49  ;;  %v1366_v54 = vsel %vm912_vm5, %v1363_v29, %v1365_v16  ;;  %v3019_v49 = vshrl.u32 %v5718_v14, 16 }
  0xe9   : > { %v1367_v6 = vrot.slane %v5142_v11, 1  ;;  %v1379_v11 = vrot.slane %v5521_v7, 1 }
  0xea   : > { %v3021_v45 = vrot.slane %v3019_v49, 2 }
  0xec   : > { %4531 = vmatmul.mubr.msk.bf16.gmra.mrb[32].mxu1 %vm454_vm2, %v949_v35  ;;  %v1360_v35 = vsel %vm912_vm5, %v1357_v63, %v1359_v30  ;;  %v2990_v63 = vsel %vm2865_vm6, %v2980_v41, %v2989_v20 }
  0xed   : > { %4536 = vmatprep.mubr.msk.bf16.mxu1 %vm454_vm2, %v1354_v27  ;;  %v2992_v27 = vshrl.u32 %v5696_v36, 16 }
  0xef   : > { %4701 = vmatmul.mubr.msk.bf16.gmra.mrb[12].mxu0 %vm454_vm2, %v2945_v33  ;;  %v2994_v33 = vrot.slane %v2992_v27, 2 }
  0xf0   : > { %4704 = vmatprep.mubr.msk.bf16.mxu0 %vm454_vm2, %v2954_v9  ;;  %v3003_v9 = vrot.slane %v3001_v44, 2  ;;  %v3306_v44 = vld [vmem:[%s5208_s25 + $0x10] sm:$0x8] }
  0xf2   : > { %v3007_v34 = vor.u32 %v3006_v17, %v3003_v9 }
  0xf4   : > { %4537 = vmatmul.mubr.msk.bf16.vlgmr.msra.gmra.mrb[0].mxu1 %vm454_vm2, %v1356_v24  ;;  %v2998_v24 = vor.u32 %v2997_v61, %v2994_v33  ;;  %v1373_v61 = vrot.slane %v5484_v55, 1 }
  0xf5   : > { %4540 = vmatprep.mubr.msk.bf16.mxu1 %vm454_vm2, %v1358_v56  ;;  %4763 = vmatpush3.bf16.msra.mxu1 %v5190_v2  ;;  %v1362_v2 = vsel %vm912_vm5, %v1359_v30, %v1361_v0  ;;  %v3010_v56 = vshrl.u32 %v5714_v62, 16  ;;  %v5854_v0 = vld [vmem:[%s5208_s25 + $0xa0] ss:$0 sps:$4 sm:$0x77]  }
  0xf6   : > { %v2999_v30 = vsel %vm2865_vm6, %v2989_v20, %v2998_v24  ;;  %v3028_v27 = vshrl.u32 %v5854_v0, 16  ;;  %v3031_v32 = vshll.u32 %v5854_v0, 16  ;;  %v3025_v20 = vor.u32 %v3024_v23, %v3021_v45 }
  0xf7   : > { %4705 = vmatmul.mubr.msk.bf16.gmra.mrb[16].mxu0 %vm454_vm2, %v2963_v42  ;;  %v3012_v42 = vrot.slane %v3010_v56, 2  ;;  %v1374_v17 = vsel %vm912_vm5, %v1371_v39, %v1373_v61  ;;  %v1377_v56 = vrot.slane %v5509_v60, 1  ;;  %v1385_v45 = vrot.slane %v5541_v26, 1 }
  0xf8   : > { %4708 = vmatprep.mubr.msk.bf16.mxu0 %vm454_vm2, %v2972_v25  ;;  %v3008_v25 = vsel %vm2865_vm6, %v2998_v24, %v3007_v34  ;;  %v3033_v33 = vrot.slane %v3031_v32, 3  ;;  %v3314_v24 = vrot.slane %v5564_v38, 3  ;;  %v3316_v38 = vrot.slane %v5577_v46, 3 }
  0xf9   : > { %v3016_v41 = vor.u32 %v3015_v37, %v3012_v42  ;;  %v1380_v46 = vsel %vm912_vm5, %v1377_v56, %v1379_v11  ;;  %v1765_v23 = vshrl.u32 %v5484_v55, 16 }
  0xfa   : > { %v3319_v42 = vsel %vm3312_vm7, %v3316_v38, %v3318_v4 }
  0xfb   : > { %v3017_v29 = vsel %vm2865_vm6, %v3007_v34, %v3016_v41  ;;  %v3026_v51 = vsel %vm2865_vm6, %v3016_v41, %v3025_v20  ;;  %v5133_v41 = vld [vmem:[%s5208_s25 + $0x98] ss:$0 sps:$4 sm:$0x11]   ;;  %v1767_v32 = vrot.slane %v1765_v23, 1 }
  0xfc   : > { %4541 = vmatmul.mubr.msk.bf16.gmra.mrb[4].mxu1 %vm454_vm2, %v1360_v35  ;;  %v1368_v35 = vsel %vm912_vm5, %v1365_v16, %v1367_v6  ;;  %v4155_v16 = vcombine.low %v3306_v44, %v5551_v31  ;;  %v3326_v44 = vrot.slane %v5622_v1, 3 }
  0xfd   : > { %4544 = vmatprep.mubr.msk.bf16.mxu1 %vm454_vm2, %v1362_v2  ;;  %v1370_v2 = vsel %vm912_vm5, %v1367_v6, %v1369_v10  ;;  %v3317_v6 = vsel %vm3312_vm7, %v3314_v24, %v3316_v38 }
  0xff   : > { %4709 = vmatmul.mubr.msk.bf16.gmra.mrb[20].mxu0 %vm454_vm2, %v2981_v19  ;;  %v3030_v19 = vrot.slane %v3028_v27, 2 }
 0x100   : > { %4712 = vmatprep.mubr.msk.bf16.mxu0 %vm454_vm2, %v2990_v63  ;;  %v1372_v63 = vsel %vm912_vm5, %v1369_v10, %v1371_v39  ;;  %v1383_v10 = vrot.slane %v5537_v22, 1  ;;  %v1777_v39 = vshll.u32 %v5503_v57, 16 }
 0x101   : > { %v3034_v9 = vor.u32 %v3033_v33, %v3030_v19  ;;  %v1786_v33 = vshll.u32 %v5509_v60, 16 }
 0x102   : > { %v1386_v27 = vsel %vm912_vm5, %v1383_v10, %v1385_v45 }
 0x103   : > { %v3035_v31 = vsel %vm2865_vm6, %v3025_v20, %v3034_v9 }
 0x104   : > { %4545 = vmatmul.mubr.msk.bf16.gmra.mrb[8].mxu1 %vm454_vm2, %v1364_v48  ;;  %v3313_v48 = vrot.slane %v4155_v16, 3  ;;  %v1779_v16 = vrot.slane %v1777_v39, 2 }
 0x105   : > { %4548 = vmatprep.mubr.msk.bf16.mxu1 %vm454_vm2, %v1366_v54  ;;  %v1375_v54 = vrot.slane %v5503_v57, 1 }
 0x106   : > { %v3315_v58 = vsel %vm3312_vm7, %v3313_v48, %v3314_v24  ;;  %v3330_v48 = vrot.slane %v5641_v8, 3  ;;  %v1792_v24 = vshrl.u32 %v5521_v7, 16 }
 0x107   : > { %4713 = vmatmul.mubr.msk.bf16.gmra.mrb[24].mxu0 %vm454_vm2, %v2999_v30  ;;  %v1376_v34 = vsel %vm912_vm5, %v1373_v61, %v1375_v54  ;;  %v1378_v49 = vsel %vm912_vm5, %v1375_v54, %v1377_v56  ;;  %v1381_v30 = vrot.slane %v5525_v12, 1  ;;  %v1795_v54 = vshll.u32 %v5521_v7, 16 }
 0x108   : > { %4716 = vmatprep.mubr.msk.bf16.mxu0 %vm454_vm2, %v3008_v25  ;;  %v3321_v25 = vsel %vm3312_vm7, %v3318_v4, %v3320_v50 }
 0x109   : > { %v1382_v37 = vsel %vm912_vm5, %v1379_v11, %v1381_v30  ;;  %v1384_v28 = vsel %vm912_vm5, %v1381_v30, %v1383_v10  ;;  %v1797_v38 = vrot.slane %v1795_v54, 2  ;;  %v1810_v30 = vshrl.u32 %v5537_v22, 16 }
 0x10b   : > { %v1812_v10 = vrot.slane %v1810_v30, 1 }
 0x10c   : > { %4549 = vmatmul.mubr.msk.bf16.gmra.mrb[12].mxu1 %vm454_vm2, %v1368_v35  ;;  %v1768_v35 = vshll.u32 %v5484_v55, 16  ;;  %v1387_v55 = vrot.slane %v5133_v41, 1  ;;  %v1831_v41 = vshll.u32 %v5557_v59, 16 }
 0x10d   : > { %4552 = vmatprep.mubr.msk.bf16.mxu1 %vm454_vm2, %v1370_v2  ;;  %v3324_v2 = vrot.slane %v5618_v3, 3  ;;  %v1783_v3 = vshrl.u32 %v5509_v60, 16 }
 0x10e   : > { %v1770_v20 = vrot.slane %v1768_v35, 2  ;;  %v1388_v1 = vsel %vm912_vm5, %v1385_v45, %v1387_v55  ;;  %v3336_v45 = vrot.slane %v5674_v5, 3 }
 0x10f   : > { %4717 = vmatmul.mubr.msk.bf16.gmra.mrb[28].mxu0 %vm454_vm2, %v3017_v29  ;;  %v3325_v29 = vsel %vm3312_vm7, %v3322_v18, %v3324_v2  ;;  %v3327_v61 = vsel %vm3312_vm7, %v3324_v2, %v3326_v44  ;;  %v1785_v9 = vrot.slane %v1783_v3, 1  ;;  %v3346_v3 = vrot.slane %v5718_v14, 3 }
 0x110   : > { %4720 = vmatprep.mubr.msk.bf16.mxu0 %vm454_vm2, %v3026_v51  ;;  %v1771_v19 = vor.u32 %v1770_v20, %v1767_v32  ;;  %v1776_v51 = vrot.slane %v1774_v40, 1  ;;  %v3342_v40 = vrot.slane %v5701_v43, 3 }
 0x112   : > { %v1772_v57 = vsel %vm1665_vm3, %v5398_v15, %v1771_v19  ;;  %v1780_v60 = vor.u32 %v1779_v16, %v1776_v51  ;;  %v1804_v15 = vshll.u32 %v5525_v12, 16 }
 0x114   : > { %4553 = vmatmul.mubr.msk.bf16.gmra.mrb[16].mxu1 %vm454_vm2, %v1372_v63  ;;  %v3328_v63 = vrot.slane %v5636_v13, 3  ;;  %v1801_v13 = vshrl.u32 %v5525_v12, 16  ;;  %v1781_v8 = vsel %vm1665_vm3, %v1771_v19, %v1780_v60  ;;  %v1806_v11 = vrot.slane %v1804_v15, 2 }
 0x115   : > { %4556 = vmatprep.mubr.msk.bf16.mxu1 %vm454_vm2, %v1374_v17  ;;  %v1788_v17 = vrot.slane %v1786_v33, 2 }
 0x116   : > { %v1803_v4 = vrot.slane %v1801_v13, 1 }
 0x117   : > { %4721 = vmatmul.mubr.msk.bf16.gmra.mrb[32].mxu0 %vm454_vm2, %v3035_v31  ;;  %v3329_v31 = vsel %vm3312_vm7, %v3326_v44, %v3328_v63  ;;  %v1789_v56 = vor.u32 %v1788_v17, %v1785_v9  ;;  %v3340_v44 = vrot.slane %v5696_v36, 3  ;;  %v3344_v36 = vrot.slane %v5714_v62, 3 }
 0x118   : > { %4726 = vmatprep.mubr.msk.bf16.mxu0 %vm454_vm2, %v3315_v58  ;;  %v3331_v58 = vsel %vm3312_vm7, %v3328_v63, %v3330_v48  ;;  %v1807_v50 = vor.u32 %v1806_v11, %v1803_v4 }
 0x119   : > { %v1790_v7 = vsel %vm1665_vm3, %v1780_v60, %v1789_v56  ;;  %v3345_v43 = vsel %vm3312_vm7, %v3342_v40, %v3344_v36  ;;  %v3347_v33 = vsel %vm3312_vm7, %v3344_v36, %v3346_v3 }
 0x11c   : > { %4557 = vmatmul.mubr.msk.bf16.gmra.mrb[20].mxu1 %vm454_vm2, %v1376_v34  ;;  %v1794_v34 = vrot.slane %v1792_v24, 1 }
 0x11d   : > { %4560 = vmatprep.mubr.msk.bf16.mxu1 %vm454_vm2, %v1378_v49  ;;  %v3332_v49 = vrot.slane %v5654_v47, 3  ;;  %v1819_v47 = vshrl.u32 %v5541_v26, 16 }
 0x11e   : > { %v1798_v12 = vor.u32 %v1797_v38, %v1794_v34 }
 0x11f   : > { %4727 = vmatmul.mubr.msk.bf16.vlgmr.msra.gmra.mrb[0].mxu0 %vm454_vm2, %v3317_v6  ;;  %v3334_v6 = vrot.slane %v5659_v52, 3  ;;  %v1821_v23 = vrot.slane %v1819_v47, 1 }
 0x120   : > { %4730 = vmatprep.mubr.msk.bf16.mxu0 %vm454_vm2, %v3319_v42  ;;  %v1813_v42 = vshll.u32 %v5537_v22, 16  ;;  %v1799_v52 = vsel %vm1665_vm3, %v1789_v56, %v1798_v12  ;;  %v1808_v22 = vsel %vm1665_vm3, %v1798_v12, %v1807_v50 }
 0x121   : > { %v3335_v18 = vsel %vm3312_vm7, %v3332_v49, %v3334_v6  ;;  %v3337_v2 = vsel %vm3312_vm7, %v3334_v6, %v3336_v45 }
 0x124   : > { %4561 = vmatmul.mubr.msk.bf16.gmra.mrb[24].mxu1 %vm454_vm2, %v1380_v46  ;;  %v3333_v46 = vsel %vm3312_vm7, %v3330_v48, %v3332_v49  ;;  %v6012_v49 = vld [vmem:[%s6144_s2] ss:$0 sm:$0xff] }
 0x125   : > { %4564 = vmatprep.mubr.msk.bf16.mxu1 %vm454_vm2, %v1382_v37  ;;  %v1822_v37 = vshll.u32 %v5541_v26, 16 }
 0x127   : > { %4731 = vmatmul.mubr.msk.bf16.gmra.mrb[4].mxu0 %vm454_vm2, %v3321_v25  ;;  %v1815_v25 = vrot.slane %v1813_v42, 2  ;;  %v1824_v35 = vrot.slane %v1822_v37, 2 }
 0x128   : > { %4734 = vmatprep.mubr.msk.bf16.mxu0 %vm454_vm2, %v3323_v53  ;;  %v3338_v53 = vrot.slane %v5683_v21, 3  ;;  %v1833_v21 = vrot.slane %v1831_v41, 2 }
 0x129   : > { %v1816_v26 = vor.u32 %v1815_v25, %v1812_v10 }
 0x12a   : > { %v3339_v5 = vsel %vm3312_vm7, %v3336_v45, %v3338_v53  ;;  %v3341_v39 = vsel %vm3312_vm7, %v3338_v53, %v3340_v44 }
 0x12b   : > { %v1817_v32 = vsel %vm1665_vm3, %v1807_v50, %v1816_v26 }
 0x12c   : > { %4565 = vmatmul.mubr.msk.bf16.gmra.mrb[28].mxu1 %vm454_vm2, %v1384_v28  ;;  %v1828_v28 = vshrl.u32 %v5557_v59, 16 }
 0x12d   : > { %4568 = vmatprep.mubr.msk.bf16.mxu1 %vm454_vm2, %v1386_v27  ;;  %v1825_v27 = vor.u32 %v1824_v35, %v1821_v23 }
 0x12e   : > { %v1830_v20 = vrot.slane %v1828_v28, 1 }
 0x12f   : > { %4735 = vmatmul.mubr.msk.bf16.gmra.mrb[8].mxu0 %vm454_vm2, %v3325_v29  ;;  %v1826_v55 = vsel %vm1665_vm3, %v1816_v26, %v1825_v27  ;;  %v3343_v29 = vsel %vm3312_vm7, %v3340_v44, %v3342_v40 }
 0x130   : > { %4738 = vmatprep.mubr.msk.bf16.mxu0 %vm454_vm2, %v3327_v61  ;;  %v1834_v59 = vor.u32 %v1833_v21, %v1830_v20  ;;  %v3348_v61 = vrot.slane %v5854_v0, 3 }
 0x132   : > { %v1835_v19 = vsel %vm1665_vm3, %v1825_v27, %v1834_v59 }
 0x134   : > { %4569 = vmatmul.mubr.msk.bf16.gmra.mrb[32].mxu1 %vm454_vm2, %v1388_v1  ;;  %v3349_v1 = vsel %vm3312_vm7, %v3346_v3, %v3348_v61 }
 0x135   : > { %4594 = vmatprep.mubr.msk.bf16.mxu1 %vm454_vm2, %v1772_v57 }
 0x137   : > { %4739 = vmatmul.mubr.msk.bf16.gmra.mrb[12].mxu0 %vm454_vm2, %v3329_v31 }
 0x138   : > { %4742 = vmatprep.mubr.msk.bf16.mxu0 %vm454_vm2, %v3331_v58 }
 0x13c   : > { %4595 = vmatmul.mubr.msk.bf16.vlgmr.msra.gmra.mrb[20].mxu1 %vm454_vm2, %v1781_v8 }
 0x13d   : > { %4598 = vmatprep.mubr.msk.bf16.mxu1 %vm454_vm2, %v1790_v7 }
 0x13f   : > { %4743 = vmatmul.mubr.msk.bf16.gmra.mrb[16].mxu0 %vm454_vm2, %v3333_v46 }
 0x140   : > { %4746 = vmatprep.mubr.msk.bf16.mxu0 %vm454_vm2, %v3335_v18 }
 0x144   : > { %4599 = vmatmul.mubr.msk.bf16.gmra.mrb[24].mxu1 %vm454_vm2, %v1799_v52 }
 0x145   : > { %4602 = vmatprep.mubr.msk.bf16.mxu1 %vm454_vm2, %v1808_v22 }
 0x147   : > { %4747 = vmatmul.mubr.msk.bf16.gmra.mrb[20].mxu0 %vm454_vm2, %v3337_v2 }
 0x148   : > { %4750 = vmatprep.mubr.msk.bf16.mxu0 %vm454_vm2, %v3339_v5 }
 0x14c   : > { %4603 = vmatmul.mubr.msk.bf16.gmra.mrb[28].mxu1 %vm454_vm2, %v1817_v32 }
 0x14d   : > { %4606 = vmatprep.mubr.msk.bf16.mxu1 %vm454_vm2, %v1826_v55 }
 0x14f   : > { %4751 = vmatmul.mubr.msk.bf16.gmra.mrb[24].mxu0 %vm454_vm2, %v3341_v39 }
 0x150   : > { %4754 = vmatprep.mubr.msk.bf16.mxu0 %vm454_vm2, %v3343_v29 }
 0x154   : > { %4607 = vmatmul.mubr.msk.bf16.gmra.mrb[32].mxu1 %vm454_vm2, %v1835_v19 }
 0x157   : > { %4755 = vmatmul.mubr.msk.bf16.gmra.mrb[28].mxu0 %vm454_vm2, %v3345_v43 }
 0x158   : > { %4758 = vmatprep.mubr.msk.bf16.mxu0 %vm454_vm2, %v3347_v33 }
 0x15f   : > { %4759 = vmatmul.mubr.msk.bf16.gmra.mrb[32].mxu0 %vm454_vm2, %v3349_v1 }
 0x1c7   : > { %v4538_v51 = vpop.f32.mrb[0].mxu1 }
 0x1c8   : > { %v1480_v62 = vpop.f32.mrb[1].mxu1 }
 0x1c9   : > { %v4539_v16 = vpop.f32.mrb[2].mxu1 }
 0x1ca   : > { %v1483_v14 = vpop.f32.mrb[3].mxu1 }
 0x1cf   : > { %v4542_v63 = vpop.f32.mrb[4].mxu1 }
 0x1d0   : > { %v1496_v57 = vpop.f32.mrb[5].mxu1 }
 0x1d1   : > { %v4543_v9 = vpop.f32.mrb[6].mxu1 }
 0x1d2   : > { %v1499_v17 = vpop.f32.mrb[7].mxu1 }
 0x1d7   : > { %v4546_v48 = vpop.f32.mrb[8].mxu1 }
 0x1d8   : > { %v5987_v60 = vpop.f32.mrb[9].mxu1 }
 0x1d9   : > { %v5989_v24 = vpop.f32.mrb[10].mxu1 }
 0x1da   : > { %v5991_v54 = vpop.f32.mrb[11].mxu1 }
 0x1df   : > { %v5993_v0 = vpop.f32.mrb[12].mxu1 }
 0x1e0   : > { %v5995_v31 = vpop.f32.mrb[13].mxu1 }
 0x1e1   : > { %v5997_v56 = vpop.f32.mrb[14].mxu1 }
 0x1e2   : > { %v5999_v13 = vpop.f32.mrb[15].mxu1 }
 0x1e7   : > { %v6001_v15 = vpop.f32.mrb[16].mxu1 }
 0x1e8   : > { %v6003_v58 = vpop.f32.mrb[17].mxu1 }
 0x1e9   : > { %v6005_v8 = vpop.f32.mrb[18].mxu1 }
 0x1ea   : > { %v6007_v34 = vpop.f32.mrb[19].mxu1 }
 0x1f2   : > { %v4728_v38 = vpop.f32.mrb[0].mxu0 }
 0x1f3   : > { %v4764_v7 = vadd.f32 %v4728_v38, %v4538_v51  ;;  %v3441_v4 = vpop.f32.mrb[1].mxu0 }
 0x1f4   : > { %v4765_v11 = vadd.f32 %v3441_v4, %v1480_v62  ;;  %v4729_v6 = vpop.f32.mrb[2].mxu0 }
 0x1f5   : > { %v3629_v12 = vadd.f32 %v4764_v7, %v6012_v49  ;;  %v4766_v30 = vadd.f32 %v4729_v6, %v4539_v16  ;;  %v3444_v42 = vpop.f32.mrb[3].mxu0 }
 0x1f6   : > { %v3627_v46 = vadd.f32 %v4765_v11, %v6012_v49  ;;  %v4767_v50 = vadd.f32 %v3444_v42, %v1483_v14 }
 0x1f7   : > { %v3665_v47 = vmax.f32 %v3629_v12, 0.0  ;;  %v3630_v37 = vadd.f32 %v4766_v30, %v6012_v49 }
 0x1f8   : > { %v3663_v18 = vmax.f32 %v3627_v46, 0.0  ;;  %v3628_v52 = vadd.f32 %v4767_v50, %v6012_v49 }
 0x1f9   : > { %v4215_v10 = vpack.c.bf16 %v3665_v47, %v3665_v47  ;;  %v3666_v25 = vmax.f32 %v3630_v37, 0.0 }
 0x1fa   : > { %v4213_v45 = vpack.c.bf16 %v3663_v18, %v3663_v18  ;;  %v3664_v22 = vmax.f32 %v3628_v52, 0.0  ;;  %v4732_v23 = vpop.f32.mrb[4].mxu0 }
 0x1fb   : > { %3846 = vst.msk [vmem:[%s6021_s18 + $0x8] sm:$0xf] %vm3843_vm8, %v4215_v10  ;;  %v4216_v35 = vpack.c.bf16 %v3666_v25, %v3666_v25  ;;  %v4768_v53 = vadd.f32 %v4732_v23, %v4542_v63  ;;  %v3457_v26 = vpop.f32.mrb[5].mxu0 }
 0x1fc   : > { %3844 = vst.msk [vmem:[%s6021_s18] sm:$0xf] %vm3843_vm8, %v4213_v45  ;;  %v4214_v28 = vpack.c.bf16 %v3664_v22, %v3664_v22  ;;  %v4769_v41 = vadd.f32 %v3457_v26, %v1496_v57  ;;  %v4733_v2 = vpop.f32.mrb[6].mxu0 }
 0x1fd   : > { %3847 = vst.msk [vmem:[%s6021_s18 + $0xc] sm:$0xf] %vm3843_vm8, %v4216_v35  ;;  %v3633_v27 = vadd.f32 %v4768_v53, %v6012_v49  ;;  %v4770_v5 = vadd.f32 %v4733_v2, %v4543_v9  ;;  %v3460_v32 = vpop.f32.mrb[7].mxu0 }
 0x1fe   : > { %3845 = vst.msk [vmem:[%s6021_s18 + $0x4] sm:$0xf] %vm3843_vm8, %v4214_v28  ;;  %v3631_v20 = vadd.f32 %v4769_v41, %v6012_v49  ;;  %v4771_v21 = vadd.f32 %v3460_v32, %v1499_v17 }
 0x1ff   : > { %v3669_v44 = vmax.f32 %v3633_v27, 0.0  ;;  %v3634_v55 = vadd.f32 %v4770_v5, %v6012_v49 }
 0x200   : > { %v3667_v40 = vmax.f32 %v3631_v20, 0.0  ;;  %v3632_v59 = vadd.f32 %v4771_v21, %v6012_v49 }
 0x201   : > { %v4219_v39 = vpack.c.bf16 %v3669_v44, %v3669_v44  ;;  %v3670_v29 = vmax.f32 %v3634_v55, 0.0 }
 0x202   : > { %v4217_v19 = vpack.c.bf16 %v3667_v40, %v3667_v40  ;;  %v3668_v36 = vmax.f32 %v3632_v59, 0.0  ;;  %v4736_v3 = vpop.f32.mrb[8].mxu0 }
 0x203   : > { %3850 = vst.msk [vmem:[%s6021_s18 + $0x18] sm:$0xf] %vm3843_vm8, %v4219_v39  ;;  %v4220_v43 = vpack.c.bf16 %v3670_v29, %v3670_v29  ;;  %v4772_v33 = vadd.f32 %v4736_v3, %v4546_v48  ;;  %v3473_v61 = vpop.f32.mrb[9].mxu0 }
 0x204   : > { %3848 = vst.msk [vmem:[%s6021_s18 + $0x10] sm:$0xf] %vm3843_vm8, %v4217_v19  ;;  %v4218_v1 = vpack.c.bf16 %v3668_v36, %v3668_v36  ;;  %v4773_v51 = vadd.f32 %v3473_v61, %v5987_v60  ;;  %v4737_v62 = vpop.f32.mrb[10].mxu0 }
 0x205   : > { %3851 = vst.msk [vmem:[%s6021_s18 + $0x1c] sm:$0xf] %vm3843_vm8, %v4220_v43  ;;  %v3637_v16 = vadd.f32 %v4772_v33, %v6012_v49  ;;  %v4774_v14 = vadd.f32 %v4737_v62, %v5989_v24  ;;  %v3476_v63 = vpop.f32.mrb[11].mxu0 }
 0x206   : > { %3849 = vst.msk [vmem:[%s6021_s18 + $0x14] sm:$0xf] %vm3843_vm8, %v4218_v1  ;;  %v3635_v57 = vadd.f32 %v4773_v51, %v6012_v49  ;;  %v4775_v9 = vadd.f32 %v3476_v63, %v5991_v54 }
 0x207   : > { %v3673_v17 = vmax.f32 %v3637_v16, 0.0  ;;  %v3638_v48 = vadd.f32 %v4774_v14, %v6012_v49 }
 0x208   : > { %v3671_v60 = vmax.f32 %v3635_v57, 0.0  ;;  %v3636_v38 = vadd.f32 %v4775_v9, %v6012_v49 }
 0x209   : > { %v4223_v7 = vpack.c.bf16 %v3673_v17, %v3673_v17  ;;  %v3674_v4 = vmax.f32 %v3638_v48, 0.0 }
 0x20a   : > { %v4221_v11 = vpack.c.bf16 %v3671_v60, %v3671_v60  ;;  %v3672_v24 = vmax.f32 %v3636_v38, 0.0  ;;  %v4740_v6 = vpop.f32.mrb[12].mxu0 }
 0x20b   : > { %3854 = vst.msk [vmem:[%s6021_s18 + $0x28] sm:$0xf] %vm3843_vm8, %v4223_v7  ;;  %v4224_v12 = vpack.c.bf16 %v3674_v4, %v3674_v4  ;;  %v4776_v30 = vadd.f32 %v4740_v6, %v5993_v0  ;;  %v3489_v42 = vpop.f32.mrb[13].mxu0 }
 0x20c   : > { %3852 = vst.msk [vmem:[%s6021_s18 + $0x20] sm:$0xf] %vm3843_vm8, %v4221_v11  ;;  %v4222_v54 = vpack.c.bf16 %v3672_v24, %v3672_v24  ;;  %v4777_v46 = vadd.f32 %v3489_v42, %v5995_v31  ;;  %v4741_v50 = vpop.f32.mrb[14].mxu0 }
 0x20d   : > { %3855 = vst.msk [vmem:[%s6021_s18 + $0x2c] sm:$0xf] %vm3843_vm8, %v4224_v12  ;;  %v3641_v47 = vadd.f32 %v4776_v30, %v6012_v49  ;;  %v4778_v37 = vadd.f32 %v4741_v50, %v5997_v56  ;;  %v3492_v18 = vpop.f32.mrb[15].mxu0 }
 0x20e   : > { %3853 = vst.msk [vmem:[%s6021_s18 + $0x24] sm:$0xf] %vm3843_vm8, %v4222_v54  ;;  %v3639_v0 = vadd.f32 %v4777_v46, %v6012_v49  ;;  %v4779_v10 = vadd.f32 %v3492_v18, %v5999_v13 }
 0x20f   : > { %v4596_v52 = vpop.f32.mrb[20].mxu1  ;;  %v3677_v45 = vmax.f32 %v3641_v47, 0.0  ;;  %v3642_v31 = vadd.f32 %v4778_v37, %v6012_v49 }
 0x210   : > { %v2007_v25 = vpop.f32.mrb[21].mxu1  ;;  %v3675_v23 = vmax.f32 %v3639_v0, 0.0  ;;  %v3640_v35 = vadd.f32 %v4779_v10, %v6012_v49 }
 0x211   : > { %v4597_v22 = vpop.f32.mrb[22].mxu1  ;;  %v4227_v53 = vpack.c.bf16 %v3677_v45, %v3677_v45  ;;  %v3678_v26 = vmax.f32 %v3642_v31, 0.0 }
 0x212   : > { %v2010_v56 = vpop.f32.mrb[23].mxu1  ;;  %v4225_v28 = vpack.c.bf16 %v3675_v23, %v3675_v23  ;;  %v3676_v41 = vmax.f32 %v3640_v35, 0.0  ;;  %v4744_v2 = vpop.f32.mrb[16].mxu0 }
 0x213   : > { %3858 = vst.msk [vmem:[%s6021_s18 + $0x38] sm:$0xf] %vm3843_vm8, %v4227_v53  ;;  %v4228_v13 = vpack.c.bf16 %v3678_v26, %v3678_v26  ;;  %v4780_v27 = vadd.f32 %v4744_v2, %v6001_v15  ;;  %v3505_v5 = vpop.f32.mrb[17].mxu0 }
 0x214   : > { %3856 = vst.msk [vmem:[%s6021_s18 + $0x30] sm:$0xf] %vm3843_vm8, %v4225_v28  ;;  %v4226_v32 = vpack.c.bf16 %v3676_v41, %v3676_v41  ;;  %v4781_v20 = vadd.f32 %v3505_v5, %v6003_v58  ;;  %v4745_v21 = vpop.f32.mrb[18].mxu0 }
 0x215   : > { %3859 = vst.msk [vmem:[%s6021_s18 + $0x3c] sm:$0xf] %vm3843_vm8, %v4228_v13  ;;  %v3645_v44 = vadd.f32 %v4780_v27, %v6012_v49  ;;  %v4782_v55 = vadd.f32 %v4745_v21, %v6005_v8  ;;  %v3508_v40 = vpop.f32.mrb[19].mxu0 }
 0x216   : > { %3857 = vst.msk [vmem:[%s6021_s18 + $0x34] sm:$0xf] %vm3843_vm8, %v4226_v32  ;;  %v3643_v15 = vadd.f32 %v4781_v20, %v6012_v49  ;;  %v4783_v39 = vadd.f32 %v3508_v40, %v6007_v34 }
 0x217   : > { %v4600_v59 = vpop.f32.mrb[24].mxu1  ;;  %v3681_v19 = vmax.f32 %v3645_v44, 0.0  ;;  %v3646_v58 = vadd.f32 %v4782_v55, %v6012_v49 }
 0x218   : > { %v2023_v29 = vpop.f32.mrb[25].mxu1  ;;  %v3679_v3 = vmax.f32 %v3643_v15, 0.0  ;;  %v3644_v43 = vadd.f32 %v4783_v39, %v6012_v49 }
 0x219   : > { %v4601_v36 = vpop.f32.mrb[26].mxu1  ;;  %v4231_v33 = vpack.c.bf16 %v3681_v19, %v3681_v19  ;;  %v3682_v61 = vmax.f32 %v3646_v58, 0.0 }
 0x21a   : > { %v2026_v8 = vpop.f32.mrb[27].mxu1  ;;  %v4229_v1 = vpack.c.bf16 %v3679_v3, %v3679_v3  ;;  %v3680_v51 = vmax.f32 %v3644_v43, 0.0  ;;  %v4748_v62 = vpop.f32.mrb[20].mxu0 }
 0x21b   : > { %3862 = vst.msk [vmem:[%s6021_s18 + $0x48] sm:$0xf] %vm3843_vm8, %v4231_v33  ;;  %v4232_v34 = vpack.c.bf16 %v3682_v61, %v3682_v61  ;;  %v4784_v16 = vadd.f32 %v4748_v62, %v4596_v52  ;;  %v3521_v14 = vpop.f32.mrb[21].mxu0 }
 0x21c   : > { %3860 = vst.msk [vmem:[%s6021_s18 + $0x40] sm:$0xf] %vm3843_vm8, %v4229_v1  ;;  %v4230_v63 = vpack.c.bf16 %v3680_v51, %v3680_v51  ;;  %v4785_v57 = vadd.f32 %v3521_v14, %v2007_v25  ;;  %v4749_v9 = vpop.f32.mrb[22].mxu0 }
 0x21d   : > { %3863 = vst.msk [vmem:[%s6021_s18 + $0x4c] sm:$0xf] %vm3843_vm8, %v4232_v34  ;;  %v3649_v17 = vadd.f32 %v4784_v16, %v6012_v49  ;;  %v4786_v48 = vadd.f32 %v4749_v9, %v4597_v22  ;;  %v3524_v60 = vpop.f32.mrb[23].mxu0 }
 0x21e   : > { %3861 = vst.msk [vmem:[%s6021_s18 + $0x44] sm:$0xf] %vm3843_vm8, %v4230_v63  ;;  %v3647_v7 = vadd.f32 %v4785_v57, %v6012_v49  ;;  %v4787_v4 = vadd.f32 %v3524_v60, %v2010_v56 }
 0x21f   : > { %v4604_v38 = vpop.f32.mrb[28].mxu1  ;;  %v3685_v24 = vmax.f32 %v3649_v17, 0.0  ;;  %v3650_v6 = vadd.f32 %v4786_v48, %v6012_v49 }
 0x220   : > { %v2039_v11 = vpop.f32.mrb[29].mxu1  ;;  %v3683_v30 = vmax.f32 %v3647_v7, 0.0  ;;  %v3648_v42 = vadd.f32 %v4787_v4, %v6012_v49 }
 0x221   : > { %v4605_v12 = vpop.f32.mrb[30].mxu1  ;;  %v4235_v46 = vpack.c.bf16 %v3685_v24, %v3685_v24  ;;  %v3686_v50 = vmax.f32 %v3650_v6, 0.0 }
 0x222   : > { %v2042_v54 = vpop.f32.mrb[31].mxu1  ;;  %v4233_v47 = vpack.c.bf16 %v3683_v30, %v3683_v30  ;;  %v3684_v37 = vmax.f32 %v3648_v42, 0.0  ;;  %v4752_v18 = vpop.f32.mrb[24].mxu0 }
 0x223   : > { %3866 = vst.msk [vmem:[%s6021_s18 + $0x58] sm:$0xf] %vm3843_vm8, %v4235_v46  ;;  %v4236_v52 = vpack.c.bf16 %v3686_v50, %v3686_v50  ;;  %v4788_v0 = vadd.f32 %v4752_v18, %v4600_v59  ;;  %v3537_v10 = vpop.f32.mrb[25].mxu0 }
 0x224   : > { %3864 = vst.msk [vmem:[%s6021_s18 + $0x50] sm:$0xf] %vm3843_vm8, %v4233_v47  ;;  %v4234_v25 = vpack.c.bf16 %v3684_v37, %v3684_v37  ;;  %v4789_v45 = vadd.f32 %v3537_v10, %v2023_v29  ;;  %v4753_v31 = vpop.f32.mrb[26].mxu0 }
 0x225   : > { %3867 = vst.msk [vmem:[%s6021_s18 + $0x5c] sm:$0xf] %vm3843_vm8, %v4236_v52  ;;  %v3653_v22 = vadd.f32 %v4788_v0, %v6012_v49  ;;  %v4790_v23 = vadd.f32 %v4753_v31, %v4601_v36  ;;  %v3540_v35 = vpop.f32.mrb[27].mxu0 }
 0x226   : > { %3865 = vst.msk [vmem:[%s6021_s18 + $0x54] sm:$0xf] %vm3843_vm8, %v4234_v25  ;;  %v3651_v53 = vadd.f32 %v4789_v45, %v6012_v49  ;;  %v4791_v26 = vadd.f32 %v3540_v35, %v2026_v8 }
 0x227   : > { %v4608_v56 = vpop.f32.mrb[32].mxu1  ;;  %v3689_v41 = vmax.f32 %v3653_v22, 0.0  ;;  %v3654_v2 = vadd.f32 %v4790_v23, %v6012_v49 }
 0x228   : > { %v2055_v28 = vpop.f32.mrb[33].mxu1  ;;  %v3687_v27 = vmax.f32 %v3651_v53, 0.0  ;;  %v3652_v5 = vadd.f32 %v4791_v26, %v6012_v49 }
 0x229   : > { %v4609_v13 = vpop.f32.mrb[34].mxu1  ;;  %v4239_v20 = vpack.c.bf16 %v3689_v41, %v3689_v41  ;;  %v3690_v21 = vmax.f32 %v3654_v2, 0.0 }
 0x22a   : > { %v2058_v32 = vpop.f32.mrb[35].mxu1  ;;  %v4237_v44 = vpack.c.bf16 %v3687_v27, %v3687_v27  ;;  %v3688_v55 = vmax.f32 %v3652_v5, 0.0  ;;  %v4756_v40 = vpop.f32.mrb[28].mxu0 }
 0x22b   : > { %3870 = vst.msk [vmem:[%s6021_s18 + $0x68] sm:$0xf] %vm3843_vm8, %v4239_v20  ;;  %v4240_v59 = vpack.c.bf16 %v3690_v21, %v3690_v21  ;;  %v4792_v15 = vadd.f32 %v4756_v40, %v4604_v38  ;;  %v3553_v39 = vpop.f32.mrb[29].mxu0 }
 0x22c   : > { %3868 = vst.msk [vmem:[%s6021_s18 + $0x60] sm:$0xf] %vm3843_vm8, %v4237_v44  ;;  %v4238_v29 = vpack.c.bf16 %v3688_v55, %v3688_v55  ;;  %v4793_v19 = vadd.f32 %v3553_v39, %v2039_v11  ;;  %v4757_v58 = vpop.f32.mrb[30].mxu0 }
 0x22d   : > { %3871 = vst.msk [vmem:[%s6021_s18 + $0x6c] sm:$0xf] %vm3843_vm8, %v4240_v59  ;;  %v3657_v36 = vadd.f32 %v4792_v15, %v6012_v49  ;;  %v4794_v3 = vadd.f32 %v4757_v58, %v4605_v12  ;;  %v3556_v43 = vpop.f32.mrb[31].mxu0 }
 0x22e   : > { %3869 = vst.msk [vmem:[%s6021_s18 + $0x64] sm:$0xf] %vm3843_vm8, %v4238_v29  ;;  %v3655_v8 = vadd.f32 %v4793_v19, %v6012_v49  ;;  %v4795_v33 = vadd.f32 %v3556_v43, %v2042_v54 }
 0x22f   : > { %v3693_v61 = vmax.f32 %v3657_v36, 0.0  ;;  %v3658_v1 = vadd.f32 %v4794_v3, %v6012_v49 }
 0x230   : > { %v3691_v51 = vmax.f32 %v3655_v8, 0.0  ;;  %v3656_v62 = vadd.f32 %v4795_v33, %v6012_v49 }
 0x231   : > { %v4243_v34 = vpack.c.bf16 %v3693_v61, %v3693_v61  ;;  %v3694_v16 = vmax.f32 %v3658_v1, 0.0 }
 0x232   : > { %v4241_v14 = vpack.c.bf16 %v3691_v51, %v3691_v51  ;;  %v3692_v63 = vmax.f32 %v3656_v62, 0.0  ;;  %v4760_v57 = vpop.f32.mrb[32].mxu0 }
 0x233   : > { %3874 = vst.msk [vmem:[%s6021_s18 + $0x78] sm:$0xf] %vm3843_vm8, %v4243_v34  ;;  %v4244_v9 = vpack.c.bf16 %v3694_v16, %v3694_v16  ;;  %v4796_v17 = vadd.f32 %v4760_v57, %v4608_v56  ;;  %v3569_v48 = vpop.f32.mrb[33].mxu0 }
 0x234   : > { %3872 = vst.msk [vmem:[%s6021_s18 + $0x70] sm:$0xf] %vm3843_vm8, %v4241_v14  ;;  %v4242_v60 = vpack.c.bf16 %v3692_v63, %v3692_v63  ;;  %v4797_v38 = vadd.f32 %v3569_v48, %v2055_v28  ;;  %v4761_v7 = vpop.f32.mrb[34].mxu0 }
 0x235   : > { %3875 = vst.msk [vmem:[%s6021_s18 + $0x7c] sm:$0xf] %vm3843_vm8, %v4244_v9  ;;  %v3661_v4 = vadd.f32 %v4796_v17, %v6012_v49  ;;  %v4798_v11 = vadd.f32 %v4761_v7, %v4609_v13  ;;  %v3572_v24 = vpop.f32.mrb[35].mxu0 }
 0x236   : > { %3873 = vst.msk [vmem:[%s6021_s18 + $0x74] sm:$0xf] %vm3843_vm8, %v4242_v60  ;;  %v3659_v6 = vadd.f32 %v4797_v38, %v6012_v49  ;;  %v4799_v12 = vadd.f32 %v3572_v24, %v2058_v32 }
 0x237   : > { %v3697_v30 = vmax.f32 %v3661_v4, 0.0  ;;  %v3662_v42 = vadd.f32 %v4798_v11, %v6012_v49 }
 0x238   : > { %v3695_v54 = vmax.f32 %v3659_v6, 0.0  ;;  %v3660_v46 = vadd.f32 %v4799_v12, %v6012_v49 }
 0x239   : > { %v4247_v50 = vpack.c.bf16 %v3697_v30, %v3697_v30  ;;  %v3698_v47 = vmax.f32 %v3662_v42, 0.0 }
 0x23a   : > { %v4245_v37 = vpack.c.bf16 %v3695_v54, %v3695_v54  ;;  %v3696_v18 = vmax.f32 %v3660_v46, 0.0 }
 0x23b   : > { %3878 = vst.msk [vmem:[%s6021_s18 + $0x88] sm:$0xf] %vm3843_vm8, %v4247_v50  ;;  %v4248_v52 = vpack.c.bf16 %v3698_v47, %v3698_v47 }
 0x23c   : > { %3876 = vst.msk [vmem:[%s6021_s18 + $0x80] sm:$0xf] %vm3843_vm8, %v4245_v37  ;;  %v4246_v0 = vpack.c.bf16 %v3696_v18, %v3696_v18 }
 0x23d   : > { %3879 = vst.msk [vmem:[%s6021_s18 + $0x8c] sm:$0xf] %vm3843_vm8, %v4248_v52 }
 0x23e   : > { %3877 = vst.msk [vmem:[%s6021_s18 + $0x84] sm:$0xf] %vm3843_vm8, %v4246_v0 }
 0x23f PF: > { %s13_s12 = sadd.s32 1, %s5151_s12  }
 0x240   : > { %p10_p4 = scmp.ge.s32.totalorder %s13_s12, 4  }
 0x242   :  { %12 = sbr.rel (!%p10_p4) target bundleno = 1 (0x1), region = 70 }

</bundles_post_ra>
